<compile_context>
chip_gen: v7x
topology: tpu7x:2x2x1
jax: 0.10.0
libtpu: 0.0.40
codegen_flags: <defaults>
</compile_context>

<pallas_src>
import functools
import math

import jax
import jax.numpy as jnp
from jax import lax
from jax.experimental import pallas as pl
from jax.experimental.pallas import tpu as pltpu

LN_EPS = 1e-5      # torch.nn.LayerNorm default
ATTN_EPS = 1e-6    # fast_transformers (Causal)LinearAttention default eps

# MXU input dtype. Weights are pre-cast once in the wrapper; accumulation stays f32
# via preferred_element_type. Flip to jnp.float32 for bit-closer parity (slower).
MATMUL_DTYPE = jnp.bfloat16

_WEIGHT_KEYS = ("wqkv_s", "wo_s", "wq_c", "wkv_c", "wo_c", "w1", "w2")
_STACKED_ORDER = ("wqkv_s", "bqkv_s", "wo_s", "bo_s",
                  "wq_c", "bq_c", "wkv_c", "bkv_c", "wo_c", "bo_c",
                  "w1", "b1", "w2", "b2",
                  "g1", "be1", "g2", "be2", "g3", "be3")


def _mm(a, b):
    # bf16 x bf16 MXU matmul, f32 accumulation.
    return jnp.dot(a.astype(MATMUL_DTYPE), b.astype(MATMUL_DTYPE),
                   preferred_element_type=jnp.float32)


def _layernorm(x, gamma, beta):
    mu = jnp.mean(x, axis=-1, keepdims=True)
    var = jnp.mean((x - mu) ** 2, axis=-1, keepdims=True)
    return (x - mu) * jax.lax.rsqrt(var + LN_EPS) * gamma + beta


def _elu_plus_one(x):
    # fast_transformers elu_feature_map: elu(x, alpha=1) + 1 (exp only on the <=0 branch)
    return jnp.where(x > 0, x + 1.0, jnp.exp(jnp.minimum(x, 0.0)))


def _gelu_exact(x):
    # torch.nn.functional.gelu default (exact, erf based)
    return 0.5 * x * (1.0 + jax.lax.erf(x * (1.0 / math.sqrt(2.0))))


def _decoder_stack_kernel(n_heads, chunk,
                          x_ref, mem_ref,
                          wqkv_ref, bqkv_ref, wos_ref, bos_ref,
                          wqc_ref, bqc_ref, wkvc_ref, bkvc_ref, woc_ref, boc_ref,
                          w1_ref, b1_ref, w2_ref, b2_ref,
                          g1_ref, be1_ref, g2_ref, be2_ref, g3_ref, be3_ref,
                          gf_ref, bf_ref,
                          o_ref,
                          resid_ref, q_ref, k_ref, v_ref, attn_ref):
    l = pl.program_id(1)                       # layer index (grid axis 1, "arbitrary")
    L, D = resid_ref.shape
    H = n_heads
    Dh = D // H
    C = chunk
    n_chunks = L // C
    Lm = mem_ref.shape[1]

    # Residual stream lives in VMEM across the whole layer stack (no HBM round trips).
    @pl.when(l == 0)
    def _():
        resid_ref[...] = x_ref[0].astype(jnp.float32)

    x = resid_ref[...]                         # (L, D) f32 layer input

    # ---------------- causal linear self-attention (chunked KV-state) ----------------
    # One big lane-dense (L,D)x(D,3D) projection (hoisted out of the recurrence);
    # feature map applied once; results stored HEAD-MAJOR (H, L, Dh) so the per-chunk
    # contractions are batch-leading (no per-einsum relayout inside the serial loop).
    qkv = _mm(x, wqkv_ref[0]) + bqkv_ref[0]                         # (L, 3D) f32
    qk = _elu_plus_one(qkv[:, :2 * D])                              # phi on Q|K slab
    q_ref[...] = jnp.swapaxes(qk[:, :D].reshape(L, H, Dh), 0, 1)    # (H, L, Dh)
    k_ref[...] = jnp.swapaxes(qk[:, D:].reshape(L, H, Dh), 0, 1)
    v_ref[...] = jnp.swapaxes(qkv[:, 2 * D:].reshape(L, H, Dh), 0, 1)

    # intra-chunk (diagonal tile) causal mask — (1, C, C), broadcast over heads
    row = lax.broadcasted_iota(jnp.int32, (1, C, C), 1)
    col = lax.broadcasted_iota(jnp.int32, (1, C, C), 2)
    causal = row >= col

    def chunk_body(ci, carry):
        s_state, z_state = carry                                    # (H,Dh,Dh), (H,Dh)
        start = pl.multiple_of(ci * C, C)
        qc = q_ref[:, pl.ds(start, C), :]                           # (H, C, Dh)
        kc = k_ref[:, pl.ds(start, C), :]
        vc = v_ref[:, pl.ds(start, C), :]

        # contribution of all strictly-previous chunks (no mask needed)
        num = jnp.einsum("hcd,hde->hce", qc, s_state,
                         preferred_element_type=jnp.float32)        # (H, C, Dh)
        den = jnp.sum(qc * z_state[:, None, :], axis=-1)            # (H, C) lane-dense

        # diagonal tile: small (H,C,C) masked scores
        sc = jnp.einsum("hcd,hed->hce", qc, kc,
                        preferred_element_type=jnp.float32)         # (H, C, C)
        sc = jnp.where(causal, sc, 0.0)
        num = num + jnp.einsum("hce,hed->hcd", sc, vc,
                               preferred_element_type=jnp.float32)
        den = den + jnp.sum(sc, axis=-1)

        attn_ref[:, pl.ds(start, C), :] = num / (den[:, :, None] + ATTN_EPS)

        # fold this chunk's keys/values into the running state
        s_new = s_state + jnp.einsum("hcd,hce->hde", kc, vc,
                                     preferred_element_type=jnp.float32)
        z_new = z_state + jnp.sum(kc, axis=1)
        return s_new, z_new

    lax.fori_loop(0, n_chunks, chunk_body,
                  (jnp.zeros((H, Dh, Dh), jnp.float32),
                   jnp.zeros((H, Dh), jnp.float32)),
                  unroll=True)

    attn = jnp.swapaxes(attn_ref[...], 0, 1).reshape(L, D)          # back to (L, D)
    attn = _mm(attn, wos_ref[0]) + bos_ref[0]                       # output projection
    u = _layernorm(x + attn, g1_ref[0], be1_ref[0])                 # norm1

    # ---------------- non-causal linear cross-attention over memory ----------------
    kv_m = _mm(mem_ref[0], wkvc_ref[0]) + bkvc_ref[0]               # fused K|V (Lm, 2D)
    k_m = jnp.swapaxes(_elu_plus_one(kv_m[:, :D]).reshape(Lm, H, Dh), 0, 1)   # (H,Lm,Dh)
    v_m = jnp.swapaxes(kv_m[:, D:].reshape(Lm, H, Dh), 0, 1)                  # (H,Lm,Dh)
    s_mem = jnp.einsum("hmd,hme->hde", k_m, v_m,
                       preferred_element_type=jnp.float32)          # (H, Dh, Dh)
    z_mem = jnp.sum(k_m, axis=1)                                    # (H, Dh)

    q_c = jnp.swapaxes(
        _elu_plus_one(_mm(u, wqc_ref[0]) + bqc_ref[0]).reshape(L, H, Dh), 0, 1)
    num_c = jnp.einsum("hld,hde->hle", q_c, s_mem,
                       preferred_element_type=jnp.float32)          # (H, L, Dh)
    den_c = jnp.sum(q_c * z_mem[:, None, :], axis=-1)               # (H, L)
    cross = num_c / (den_c[:, :, None] + ATTN_EPS)
    cross = jnp.swapaxes(cross, 0, 1).reshape(L, D)
    cross = _mm(cross, woc_ref[0]) + boc_ref[0]
    u2 = _layernorm(u + cross, g2_ref[0], be2_ref[0])               # norm2

    # ---------------- feed-forward ----------------
    y = _gelu_exact(_mm(u2, w1_ref[0]) + b1_ref[0])
    y = _mm(y, w2_ref[0]) + b2_ref[0]
    out = _layernorm(u2 + y, g3_ref[0], be3_ref[0])                 # norm3

    resid_ref[...] = out                                            # feed the next layer

    @pl.when(l == pl.num_programs(1) - 1)
    def _():
        # final_normalization=True: LayerNorm after the last layer, then write the
        # output block (written once per batch element; flushed when `b` advances).
        o_ref[0] = _layernorm(out, gf_ref[...], bf_ref[...]).astype(o_ref.dtype)


def _stack_spec(per_layer_shape):
    nd = len(per_layer_shape)
    return pl.BlockSpec((1,) + tuple(per_layer_shape),
                        lambda b, l, _nd=nd: (l,) + (0,) * _nd)


def _bcast_spec(shape):
    nd = len(shape)
    return pl.BlockSpec(tuple(shape), lambda b, l, _nd=nd: (0,) * _nd)


def _tpu_caps():
    """MXU tile width and a generation-appropriate scoped-VMEM limit."""
    kind = ""
    try:
        kind = jax.devices()[0].device_kind.lower()
    except Exception:
        pass
    mxu = 128 if any(v in kind for v in ("v2", "v3", "v4", "v5")) else 256
    vmem_phys = 64 * 1024 * 1024 if "v7" in kind else 128 * 1024 * 1024
    try:
        vmem_phys = pltpu.get_tpu_info().vmem_capacity_bytes
    except Exception:
        pass
    # Leave ~20% (and at least 8 MiB) headroom for the compiler's own scratch.
    vmem_limit = int(max(min(vmem_phys * 0.8, vmem_phys - 8 * 1024 * 1024),
                         32 * 1024 * 1024))
    return mxu, vmem_limit


def linear_transformer_causal_decoder(memory, target, params, n_heads):
    """memory: (B, Lm, D), target: (B, L, D) -> (B, L, D)."""
    B, L, D = target.shape
    Bm, Lm, Dm = memory.shape
    assert B == Bm and D == Dm and D % n_heads == 0
    n_layers = params["wqkv_s"].shape[0]
    Dh = D // n_heads

    mxu, vmem_limit = _tpu_caps()
    # Chunk size for the causal KV-state recurrence: match the MXU tile
    # (128 on v5e and earlier, 256 on v6e/v7x).
    chunk = L if L <= mxu else mxu
    assert L % chunk == 0  # TODO(synk): pad ragged sequence lengths to the chunk size

    # Pre-cast matmul weight matrices ONCE so the per-layer weight DMA stream (the
    # dominant HBM traffic on the layer axis) moves bf16 bytes; biases / LN params
    # stay f32, all accumulation is f32. Memory only feeds matmuls -> cast it too.
    stacked = [params[k].astype(MATMUL_DTYPE) if k in _WEIGHT_KEYS else params[k]
               for k in _STACKED_ORDER]
    memory = memory.astype(MATMUL_DTYPE)

    kernel = functools.partial(_decoder_stack_kernel, n_heads, chunk)

    in_specs = ([pl.BlockSpec((1, L, D), lambda b, l: (b, 0, 0)),     # target block
                 pl.BlockSpec((1, Lm, D), lambda b, l: (b, 0, 0))]    # memory block
                + [_stack_spec(w.shape[1:]) for w in stacked]         # per-layer weights
                + [_bcast_spec(params["gf"].shape),                   # final LN
                   _bcast_spec(params["bf"].shape)])

    # TODO(synk): on v7x (2 TensorCores) only the batch axis is parallel; B == 1
    # leaves one core idle — a head/L-split parallel axis would fix that.
    return pl.pallas_call(
        kernel,
        out_shape=jax.ShapeDtypeStruct((B, L, D), target.dtype),
        grid=(B, n_layers),                        # layer axis innermost & sequential
        in_specs=in_specs,
        out_specs=pl.BlockSpec((1, L, D), lambda b, l: (b, 0, 0)),
        scratch_shapes=[
            pltpu.VMEM((L, D), jnp.float32),                 # residual stream
            pltpu.VMEM((n_heads, L, Dh), jnp.float32),       # phi(Q), head-major
            pltpu.VMEM((n_heads, L, Dh), jnp.float32),       # phi(K), head-major
            pltpu.VMEM((n_heads, L, Dh), jnp.float32),       # V,      head-major
            pltpu.VMEM((n_heads, L, Dh), jnp.float32),       # attn out, head-major
            # TODO(synk): store the head-major slabs as bf16 (and single-buffer w1/w2)
            # if a large L*D config overruns v7x's 64 MiB VMEM.
        ],
        compiler_params=pltpu.CompilerParams(
            dimension_semantics=("parallel", "arbitrary"),
            vmem_limit_bytes=vmem_limit,
        ),
    )(target, memory, *stacked, params["gf"], params["bf"])


def init_params(key, d_model, n_heads, n_layers, dim_feedforward):
    """Deterministic synthetic params (torch nn.Linear-style init).
    Linear weights stored as (in, out); biases as (1, out). QKV / cross-KV fused."""
    def lin(k, fan_in, fan_out):
        k1, k2 = jax.random.split(k)
        lim = 1.0 / math.sqrt(fan_in)
        w = jax.random.uniform(k1, (fan_in, fan_out), jnp.float32, -lim, lim)
        b = jax.random.uniform(k2, (1, fan_out), jnp.float32, -lim, lim)
        return w, b

    per_layer = []
    for _ in range(n_layers):
        keys = jax.random.split(key, 11)
        key = keys[0]
        wq_s, bq_s = lin(keys[1], d_model, d_model)
        wk_s, bk_s = lin(keys[2], d_model, d_model)
        wv_s, bv_s = lin(keys[3], d_model, d_model)
        wo_s, bo_s = lin(keys[4], d_model, d_model)
        wq_c, bq_c = lin(keys[5], d_model, d_model)
        wk_c, bk_c = lin(keys[6], d_model, d_model)
        wv_c, bv_c = lin(keys[7], d_model, d_model)
        wo_c, bo_c = lin(keys[8], d_model, d_model)
        w1, b1 = lin(keys[9], d_model, dim_feedforward)
        w2, b2 = lin(keys[10], dim_feedforward, d_model)
        per_layer.append(dict(
            wqkv_s=jnp.concatenate([wq_s, wk_s, wv_s], axis=1),
            bqkv_s=jnp.concatenate([bq_s, bk_s, bv_s], axis=1),
            wo_s=wo_s, bo_s=bo_s,
            wq_c=wq_c, bq_c=bq_c,
            wkv_c=jnp.concatenate([wk_c, wv_c], axis=1),
            bkv_c=jnp.concatenate([bk_c, bv_c], axis=1),
            wo_c=wo_c, bo_c=bo_c,
            w1=w1, b1=b1, w2=w2, b2=b2,
            g1=jnp.ones((1, d_model), jnp.float32),
            be1=jnp.zeros((1, d_model), jnp.float32),
            g2=jnp.ones((1, d_model), jnp.float32),
            be2=jnp.zeros((1, d_model), jnp.float32),
            g3=jnp.ones((1, d_model), jnp.float32),
            be3=jnp.zeros((1, d_model), jnp.float32),
        ))
    params = {k: jnp.stack([lyr[k] for lyr in per_layer], axis=0)
              for k in per_layer[0]}
    params["gf"] = jnp.ones((1, d_model), jnp.float32)
    params["bf"] = jnp.zeros((1, d_model), jnp.float32)
    return params


if __name__ == "__main__":
    d_model, n_heads, n_layers, dim_feedforward = 32, 4, 2, 64
    batch, tgt_len, mem_len = 2, 8, 8

    key = jax.random.PRNGKey(0)
    k_p, k_m, k_t = jax.random.split(key, 3)
    params = init_params(k_p, d_model, n_heads, n_layers, dim_feedforward)
    memory = jax.random.normal(k_m, (batch, mem_len, d_model), jnp.float32)
    target = jax.random.normal(k_t, (batch, tgt_len, d_model), jnp.float32)

    out = linear_transformer_causal_decoder(memory, target, params, n_heads)
    out = jax.block_until_ready(out)
    assert out.shape == (batch, tgt_len, d_model)
    assert bool(jnp.all(jnp.isfinite(out)))
    print("KERNEL_OK")
</pallas_src>

<mosaic_0001>
module attributes {stable_mosaic.version = 11 : i64} {
  func.func @_decoder_stack_kernel(%arg0: i32, %arg1: i32, %arg2: memref<1x8x32xf32, #tpu.memory_space<vmem>>, %arg3: memref<1x8x32xbf16, #tpu.memory_space<vmem>>, %arg4: memref<1x32x96xbf16, #tpu.memory_space<vmem>>, %arg5: memref<1x1x96xf32, #tpu.memory_space<vmem>>, %arg6: memref<1x32x32xbf16, #tpu.memory_space<vmem>>, %arg7: memref<1x1x32xf32, #tpu.memory_space<vmem>>, %arg8: memref<1x32x32xbf16, #tpu.memory_space<vmem>>, %arg9: memref<1x1x32xf32, #tpu.memory_space<vmem>>, %arg10: memref<1x32x64xbf16, #tpu.memory_space<vmem>>, %arg11: memref<1x1x64xf32, #tpu.memory_space<vmem>>, %arg12: memref<1x32x32xbf16, #tpu.memory_space<vmem>>, %arg13: memref<1x1x32xf32, #tpu.memory_space<vmem>>, %arg14: memref<1x32x64xbf16, #tpu.memory_space<vmem>>, %arg15: memref<1x1x64xf32, #tpu.memory_space<vmem>>, %arg16: memref<1x64x32xbf16, #tpu.memory_space<vmem>>, %arg17: memref<1x1x32xf32, #tpu.memory_space<vmem>>, %arg18: memref<1x1x32xf32, #tpu.memory_space<vmem>>, %arg19: memref<1x1x32xf32, #tpu.memory_space<vmem>>, %arg20: memref<1x1x32xf32, #tpu.memory_space<vmem>>, %arg21: memref<1x1x32xf32, #tpu.memory_space<vmem>>, %arg22: memref<1x1x32xf32, #tpu.memory_space<vmem>>, %arg23: memref<1x1x32xf32, #tpu.memory_space<vmem>>, %arg24: memref<1x32xf32, #tpu.memory_space<vmem>>, %arg25: memref<1x32xf32, #tpu.memory_space<vmem>>, %arg26: memref<1x8x32xf32, #tpu.memory_space<vmem>>, %arg27: memref<8x32xf32, #tpu.memory_space<vmem>>, %arg28: memref<4x8x8xf32, #tpu.memory_space<vmem>>, %arg29: memref<4x8x8xf32, #tpu.memory_space<vmem>>, %arg30: memref<4x8x8xf32, #tpu.memory_space<vmem>>, %arg31: memref<4x8x8xf32, #tpu.memory_space<vmem>>) attributes {dimension_semantics = [#tpu.dimension_semantics<parallel>, #tpu.dimension_semantics<arbitrary>], iteration_bounds = array<i64: 2, 2>, scalar_prefetch = 0 : i64, scratch_operands = 5 : i64, tpu.core_type = #tpu.core_type<tc>, window_params = [{transform_indices = @transform_0, window_bounds = array<i64: 1, 8, 32>}, {transform_indices = @transform_1, window_bounds = array<i64: 1, 8, 32>}, {transform_indices = @transform_2, window_bounds = array<i64: 1, 32, 96>}, {transform_indices = @transform_3, window_bounds = array<i64: 1, 1, 96>}, {transform_indices = @transform_4, window_bounds = array<i64: 1, 32, 32>}, {transform_indices = @transform_5, window_bounds = array<i64: 1, 1, 32>}, {transform_indices = @transform_6, window_bounds = array<i64: 1, 32, 32>}, {transform_indices = @transform_7, window_bounds = array<i64: 1, 1, 32>}, {transform_indices = @transform_8, window_bounds = array<i64: 1, 32, 64>}, {transform_indices = @transform_9, window_bounds = array<i64: 1, 1, 64>}, {transform_indices = @transform_10, window_bounds = array<i64: 1, 32, 32>}, {transform_indices = @transform_11, window_bounds = array<i64: 1, 1, 32>}, {transform_indices = @transform_12, window_bounds = array<i64: 1, 32, 64>}, {transform_indices = @transform_13, window_bounds = array<i64: 1, 1, 64>}, {transform_indices = @transform_14, window_bounds = array<i64: 1, 64, 32>}, {transform_indices = @transform_15, window_bounds = array<i64: 1, 1, 32>}, {transform_indices = @transform_16, window_bounds = array<i64: 1, 1, 32>}, {transform_indices = @transform_17, window_bounds = array<i64: 1, 1, 32>}, {transform_indices = @transform_18, window_bounds = array<i64: 1, 1, 32>}, {transform_indices = @transform_19, window_bounds = array<i64: 1, 1, 32>}, {transform_indices = @transform_20, window_bounds = array<i64: 1, 1, 32>}, {transform_indices = @transform_21, window_bounds = array<i64: 1, 1, 32>}, {pipeline_mode = #tpu.pipeline_mode<synchronous>, transform_indices = @transform_22, window_bounds = array<i64: 1, 32>}, {pipeline_mode = #tpu.pipeline_mode<synchronous>, transform_indices = @transform_23, window_bounds = array<i64: 1, 32>}, {transform_indices = @transform_24, window_bounds = array<i64: 1, 8, 32>}]} {
    %c0_i32 = arith.constant 0 : i32
    %0 = arith.cmpi eq, %arg1, %c0_i32 : i32
    %1 = arith.extui %0 : i1 to i32
    %c0_i32_0 = arith.constant 0 : i32
    %2 = arith.cmpi ne, %1, %c0_i32_0 : i32
    scf.if %2 {
      %c0_139 = arith.constant 0 : index
      %c0_140 = arith.constant 0 : index
      %c0_141 = arith.constant 0 : index
      %254 = vector.load %arg2[%c0_139, %c0_140, %c0_141] : memref<1x8x32xf32, #tpu.memory_space<vmem>>, vector<1x8x32xf32>
      %255 = vector.shape_cast %254 : vector<1x8x32xf32> to vector<8x32xf32>
      %c0_142 = arith.constant 0 : index
      %c0_143 = arith.constant 0 : index
      %256 = vector.load %arg27[%c0_142, %c0_143] : memref<8x32xf32, #tpu.memory_space<vmem>>, vector<8x32xf32>
      tpu.vector_store %arg27[%c0_142, %c0_143], %255 {strides = array<i32>} : memref<8x32xf32, #tpu.memory_space<vmem>>, vector<8x32xf32>,
    } else {
    }
    %c0 = arith.constant 0 : index
    %c0_1 = arith.constant 0 : index
    %3 = vector.load %arg27[%c0, %c0_1] : memref<8x32xf32, #tpu.memory_space<vmem>>, vector<8x32xf32>
    %c0_2 = arith.constant 0 : index
    %c0_3 = arith.constant 0 : index
    %c0_4 = arith.constant 0 : index
    %4 = vector.load %arg4[%c0_2, %c0_3, %c0_4] : memref<1x32x96xbf16, #tpu.memory_space<vmem>>, vector<1x32x96xbf16>
    %5 = vector.shape_cast %4 : vector<1x32x96xbf16> to vector<32x96xbf16>
    %6 = arith.truncf %3 : vector<8x32xf32> to vector<8x32xbf16>
    %cst = arith.constant dense<0.000000e+00> : vector<8x96xf32>
    %7 = tpu.matmul %6, %5, %cst {dimension_numbers = #tpu.dot_dimension_numbers<[1], [0], [0], [1], [0, 0, 1, 1], [], []>} : vector<8x32xbf16>, vector<32x96xbf16>, vector<8x96xf32> -> vector<8x96xf32>
    %c0_5 = arith.constant 0 : index
    %c0_6 = arith.constant 0 : index
    %c0_7 = arith.constant 0 : index
    %8 = vector.load %arg5[%c0_5, %c0_6, %c0_7] : memref<1x1x96xf32, #tpu.memory_space<vmem>>, vector<1x1x96xf32>
    %9 = vector.shape_cast %8 : vector<1x1x96xf32> to vector<1x96xf32>
    %10 = vector.broadcast %9 : vector<1x96xf32> to vector<8x96xf32>
    %11 = arith.addf %7, %10 : vector<8x96xf32>
    %12 = vector.extract_strided_slice %11 {offsets = [0, 0], sizes = [8, 64], strides = [1, 1]} : vector<8x96xf32> to vector<8x64xf32>
    %cst_8 = arith.constant 0.000000e+00 : f32
    %13 = vector.broadcast %cst_8 : f32 to vector<8x64xf32>
    %14 = arith.cmpf ogt, %12, %13 : vector<8x64xf32>
    %cst_9 = arith.constant 1.000000e+00 : f32
    %15 = vector.broadcast %cst_9 : f32 to vector<8x64xf32>
    %16 = arith.addf %12, %15 : vector<8x64xf32>
    %cst_10 = arith.constant 0.000000e+00 : f32
    %17 = vector.broadcast %cst_10 : f32 to vector<8x64xf32>
    %18 = arith.minimumf %12, %17 : vector<8x64xf32>
    %19 = math.exp %18 : vector<8x64xf32>
    %20 = arith.select %14, %16, %19 : vector<8x64xi1>, vector<8x64xf32>
    %21 = vector.extract_strided_slice %20 {offsets = [0, 0], sizes = [8, 32], strides = [1, 1]} : vector<8x64xf32> to vector<8x32xf32>
    %22 = vector.shape_cast %21 : vector<8x32xf32> to vector<8x4x8xf32>
    %23 = tpu.transpose %22, [1, 0, 2] : vector<8x4x8xf32> -> vector<4x8x8xf32>
    %c0_11 = arith.constant 0 : index
    %c0_12 = arith.constant 0 : index
    %c0_13 = arith.constant 0 : index
    %24 = vector.load %arg28[%c0_11, %c0_12, %c0_13] : memref<4x8x8xf32, #tpu.memory_space<vmem>>, vector<4x8x8xf32>
    tpu.vector_store %arg28[%c0_11, %c0_12, %c0_13], %23 {strides = array<i32>} : memref<4x8x8xf32, #tpu.memory_space<vmem>>, vector<4x8x8xf32>,
    %25 = vector.extract_strided_slice %20 {offsets = [0, 32], sizes = [8, 32], strides = [1, 1]} : vector<8x64xf32> to vector<8x32xf32>
    %26 = vector.shape_cast %25 : vector<8x32xf32> to vector<8x4x8xf32>
    %27 = tpu.transpose %26, [1, 0, 2] : vector<8x4x8xf32> -> vector<4x8x8xf32>
    %c0_14 = arith.constant 0 : index
    %c0_15 = arith.constant 0 : index
    %c0_16 = arith.constant 0 : index
    %28 = vector.load %arg29[%c0_14, %c0_15, %c0_16] : memref<4x8x8xf32, #tpu.memory_space<vmem>>, vector<4x8x8xf32>
    tpu.vector_store %arg29[%c0_14, %c0_15, %c0_16], %27 {strides = array<i32>} : memref<4x8x8xf32, #tpu.memory_space<vmem>>, vector<4x8x8xf32>,
    %29 = vector.extract_strided_slice %11 {offsets = [0, 64], sizes = [8, 32], strides = [1, 1]} : vector<8x96xf32> to vector<8x32xf32>
    %30 = vector.shape_cast %29 : vector<8x32xf32> to vector<8x4x8xf32>
    %31 = tpu.transpose %30, [1, 0, 2] : vector<8x4x8xf32> -> vector<4x8x8xf32>
    %c0_17 = arith.constant 0 : index
    %c0_18 = arith.constant 0 : index
    %c0_19 = arith.constant 0 : index
    %32 = vector.load %arg30[%c0_17, %c0_18, %c0_19] : memref<4x8x8xf32, #tpu.memory_space<vmem>>, vector<4x8x8xf32>
    tpu.vector_store %arg30[%c0_17, %c0_18, %c0_19], %31 {strides = array<i32>} : memref<4x8x8xf32, #tpu.memory_space<vmem>>, vector<4x8x8xf32>,
    %33 = tpu.iota {dimensions = array<i32: 1>} : vector<1x8x8xi32>
    %34 = tpu.iota {dimensions = array<i32: 2>} : vector<1x8x8xi32>
    %35 = arith.cmpi sge, %33, %34 : vector<1x8x8xi32>
    %cst_20 = arith.constant 0.000000e+00 : f32
    %36 = vector.broadcast %cst_20 : f32 to vector<4x8x8xf32>
    %cst_21 = arith.constant 0.000000e+00 : f32
    %37 = vector.broadcast %cst_21 : f32 to vector<4x8xf32>
    %c0_i32_22 = arith.constant 0 : i32
    %c8_i32 = arith.constant 8 : i32
    %38 = arith.muli %c0_i32_22, %c8_i32 : i32
    %39 = tpu.assume_multiple %38, 8 : i32
    %c0_23 = arith.constant 0 : index
    %40 = arith.index_cast %39 : i32 to index
    %c0_24 = arith.constant 0 : index
    %41 = vector.load %arg28[%c0_23, %40, %c0_24] : memref<4x8x8xf32, #tpu.memory_space<vmem>>, vector<4x8x8xf32>
    %c0_25 = arith.constant 0 : index
    %42 = arith.index_cast %39 : i32 to index
    %c0_26 = arith.constant 0 : index
    %43 = vector.load %arg29[%c0_25, %42, %c0_26] : memref<4x8x8xf32, #tpu.memory_space<vmem>>, vector<4x8x8xf32>
    %c0_27 = arith.constant 0 : index
    %44 = arith.index_cast %39 : i32 to index
    %c0_28 = arith.constant 0 : index
    %45 = vector.load %arg30[%c0_27, %44, %c0_28] : memref<4x8x8xf32, #tpu.memory_space<vmem>>, vector<4x8x8xf32>
    "tpu.trace_start"() <{level = 10 : i32, message = "hcd,hde->hce"}> : () -> ()
    %cst_29 = arith.constant dense<0.000000e+00> : vector<4x8x8xf32>
    %46 = tpu.matmul %41, %36, %cst_29 {dimension_numbers = #tpu.dot_dimension_numbers<[2], [1], [1], [2], [0, 0, 0, 1, 1, 2], [0], [0]>} : vector<4x8x8xf32>, vector<4x8x8xf32>, vector<4x8x8xf32> -> vector<4x8x8xf32>
    "tpu.trace_stop"() : () -> ()
    %47 = vector.shape_cast %37 : vector<4x8xf32> to vector<4x1x8xf32>
    %48 = vector.broadcast %47 : vector<4x1x8xf32> to vector<4x8x8xf32>
    %49 = arith.mulf %41, %48 : vector<4x8x8xf32>
    %cst_30 = arith.constant dense<0.000000e+00> : vector<4x8xf32>
    %50 = vector.multi_reduction <add>, %49, %cst_30 [2] : vector<4x8x8xf32> to vector<4x8xf32>
    "tpu.trace_start"() <{level = 10 : i32, message = "hcd,hed->hce"}> : () -> ()
    %cst_31 = arith.constant dense<0.000000e+00> : vector<4x8x8xf32>
    %51 = tpu.matmul %41, %43, %cst_31 {dimension_numbers = #tpu.dot_dimension_numbers<[2], [2], [1], [1], [0, 0, 0, 1, 1, 1], [0], [0]>} : vector<4x8x8xf32>, vector<4x8x8xf32>, vector<4x8x8xf32> -> vector<4x8x8xf32>
    %cst_32 = arith.constant 0.000000e+00 : f32
    "tpu.trace_stop"() : () -> ()
    %52 = vector.shape_cast %35 : vector<1x8x8xi1> to vector<1x8x8xi1>
    %53 = vector.broadcast %52 : vector<1x8x8xi1> to vector<4x8x8xi1>
    %54 = vector.broadcast %cst_32 : f32 to vector<4x8x8xf32>
    %55 = arith.select %53, %51, %54 : vector<4x8x8xi1>, vector<4x8x8xf32>
    "tpu.trace_start"() <{level = 10 : i32, message = "hce,hed->hcd"}> : () -> ()
    %cst_33 = arith.constant dense<0.000000e+00> : vector<4x8x8xf32>
    %56 = tpu.matmul %55, %45, %cst_33 {dimension_numbers = #tpu.dot_dimension_numbers<[2], [1], [1], [2], [0, 0, 0, 1, 1, 2], [0], [0]>} : vector<4x8x8xf32>, vector<4x8x8xf32>, vector<4x8x8xf32> -> vector<4x8x8xf32>
    "tpu.trace_stop"() : () -> ()
    %57 = arith.addf %46, %56 : vector<4x8x8xf32>
    %cst_34 = arith.constant dense<0.000000e+00> : vector<4x8xf32>
    %58 = vector.multi_reduction <add>, %55, %cst_34 [2] : vector<4x8x8xf32> to vector<4x8xf32>
    %59 = arith.addf %50, %58 : vector<4x8xf32>
    %60 = vector.shape_cast %59 : vector<4x8xf32> to vector<4x8x1xf32>
    %cst_35 = arith.constant 9.99999997E-7 : f32
    %61 = vector.broadcast %cst_35 : f32 to vector<4x8x1xf32>
    %62 = arith.addf %60, %61 : vector<4x8x1xf32>
    %63 = vector.broadcast %62 : vector<4x8x1xf32> to vector<4x8x8xf32>
    %64 = arith.divf %57, %63 : vector<4x8x8xf32>
    %c0_36 = arith.constant 0 : index
    %65 = arith.index_cast %39 : i32 to index
    %c0_37 = arith.constant 0 : index
    %66 = vector.load %arg31[%c0_36, %65, %c0_37] : memref<4x8x8xf32, #tpu.memory_space<vmem>>, vector<4x8x8xf32>
    tpu.vector_store %arg31[%c0_36, %65, %c0_37], %64 {strides = array<i32>} : memref<4x8x8xf32, #tpu.memory_space<vmem>>, vector<4x8x8xf32>,
    "tpu.trace_start"() <{level = 10 : i32, message = "hcd,hce->hde"}> : () -> ()
    %cst_38 = arith.constant dense<0.000000e+00> : vector<4x8x8xf32>
    %67 = tpu.matmul %43, %45, %cst_38 {dimension_numbers = #tpu.dot_dimension_numbers<[1], [1], [2], [2], [0, 0, 0, 2, 1, 2], [0], [0]>} : vector<4x8x8xf32>, vector<4x8x8xf32>, vector<4x8x8xf32> -> vector<4x8x8xf32>
    "tpu.trace_stop"() : () -> ()
    %68 = arith.addf %36, %67 : vector<4x8x8xf32>
    %cst_39 = arith.constant dense<0.000000e+00> : vector<4x8xf32>
    %69 = vector.multi_reduction <add>, %43, %cst_39 [1] : vector<4x8x8xf32> to vector<4x8xf32>
    %70 = arith.addf %37, %69 : vector<4x8xf32>
    %c1_i32 = arith.constant 1 : i32
    %c0_40 = arith.constant 0 : index
    %c0_41 = arith.constant 0 : index
    %c0_42 = arith.constant 0 : index
    %71 = vector.load %arg31[%c0_40, %c0_41, %c0_42] : memref<4x8x8xf32, #tpu.memory_space<vmem>>, vector<4x8x8xf32>
    %72 = tpu.transpose %71, [1, 0, 2] : vector<4x8x8xf32> -> vector<8x4x8xf32>
    %73 = vector.shape_cast %72 : vector<8x4x8xf32> to vector<8x32xf32>
    %c0_43 = arith.constant 0 : index
    %c0_44 = arith.constant 0 : index
    %c0_45 = arith.constant 0 : index
    %74 = vector.load %arg6[%c0_43, %c0_44, %c0_45] : memref<1x32x32xbf16, #tpu.memory_space<vmem>>, vector<1x32x32xbf16>
    %75 = vector.shape_cast %74 : vector<1x32x32xbf16> to vector<32x32xbf16>
    %76 = arith.truncf %73 : vector<8x32xf32> to vector<8x32xbf16>
    %cst_46 = arith.constant dense<0.000000e+00> : vector<8x32xf32>
    %77 = tpu.matmul %76, %75, %cst_46 {dimension_numbers = #tpu.dot_dimension_numbers<[1], [0], [0], [1], [0, 0, 1, 1], [], []>} : vector<8x32xbf16>, vector<32x32xbf16>, vector<8x32xf32> -> vector<8x32xf32>
    %c0_47 = arith.constant 0 : index
    %c0_48 = arith.constant 0 : index
    %c0_49 = arith.constant 0 : index
    %78 = vector.load %arg7[%c0_47, %c0_48, %c0_49] : memref<1x1x32xf32, #tpu.memory_space<vmem>>, vector<1x1x32xf32>
    %79 = vector.shape_cast %78 : vector<1x1x32xf32> to vector<1x32xf32>
    %80 = vector.broadcast %79 : vector<1x32xf32> to vector<8x32xf32>
    %81 = arith.addf %77, %80 : vector<8x32xf32>
    %82 = arith.addf %3, %81 : vector<8x32xf32>
    %c0_50 = arith.constant 0 : index
    %c0_51 = arith.constant 0 : index
    %c0_52 = arith.constant 0 : index
    %83 = vector.load %arg18[%c0_50, %c0_51, %c0_52] : memref<1x1x32xf32, #tpu.memory_space<vmem>>, vector<1x1x32xf32>
    %84 = vector.shape_cast %83 : vector<1x1x32xf32> to vector<1x32xf32>
    %c0_53 = arith.constant 0 : index
    %c0_54 = arith.constant 0 : index
    %c0_55 = arith.constant 0 : index
    %85 = vector.load %arg19[%c0_53, %c0_54, %c0_55] : memref<1x1x32xf32, #tpu.memory_space<vmem>>, vector<1x1x32xf32>
    %86 = vector.shape_cast %85 : vector<1x1x32xf32> to vector<1x32xf32>
    %cst_56 = arith.constant dense<0.000000e+00> : vector<8xf32>
    %87 = vector.multi_reduction <add>, %82, %cst_56 [1] : vector<8x32xf32> to vector<8xf32>
    %88 = vector.shape_cast %87 : vector<8xf32> to vector<8x1xf32>
    %cst_57 = arith.constant 3.200000e+01 : f32
    %89 = vector.broadcast %cst_57 : f32 to vector<8x1xf32>
    %90 = arith.divf %88, %89 : vector<8x1xf32>
    %91 = vector.broadcast %90 : vector<8x1xf32> to vector<8x32xf32>
    %92 = arith.subf %82, %91 : vector<8x32xf32>
    %93 = arith.mulf %92, %92 : vector<8x32xf32>
    %cst_58 = arith.constant dense<0.000000e+00> : vector<8xf32>
    %94 = vector.multi_reduction <add>, %93, %cst_58 [1] : vector<8x32xf32> to vector<8xf32>
    %95 = vector.shape_cast %94 : vector<8xf32> to vector<8x1xf32>
    %cst_59 = arith.constant 3.200000e+01 : f32
    %96 = vector.broadcast %cst_59 : f32 to vector<8x1xf32>
    %97 = arith.divf %95, %96 : vector<8x1xf32>
    %98 = vector.broadcast %90 : vector<8x1xf32> to vector<8x32xf32>
    %99 = arith.subf %82, %98 : vector<8x32xf32>
    %cst_60 = arith.constant 9.99999974E-6 : f32
    %100 = vector.broadcast %cst_60 : f32 to vector<8x1xf32>
    %101 = arith.addf %97, %100 : vector<8x1xf32>
    %102 = math.rsqrt %101 : vector<8x1xf32>
    %103 = vector.broadcast %102 : vector<8x1xf32> to vector<8x32xf32>
    %104 = arith.mulf %99, %103 : vector<8x32xf32>
    %105 = vector.broadcast %84 : vector<1x32xf32> to vector<8x32xf32>
    %106 = arith.mulf %104, %105 : vector<8x32xf32>
    %107 = vector.broadcast %86 : vector<1x32xf32> to vector<8x32xf32>
    %108 = arith.addf %106, %107 : vector<8x32xf32>
    %c0_61 = arith.constant 0 : index
    %c0_62 = arith.constant 0 : index
    %c0_63 = arith.constant 0 : index
    %109 = vector.load %arg3[%c0_61, %c0_62, %c0_63] : memref<1x8x32xbf16, #tpu.memory_space<vmem>>, vector<1x8x32xbf16>
    %110 = vector.shape_cast %109 : vector<1x8x32xbf16> to vector<8x32xbf16>
    %c0_64 = arith.constant 0 : index
    %c0_65 = arith.constant 0 : index
    %c0_66 = arith.constant 0 : index
    %111 = vector.load %arg10[%c0_64, %c0_65, %c0_66] : memref<1x32x64xbf16, #tpu.memory_space<vmem>>, vector<1x32x64xbf16>
    %112 = vector.shape_cast %111 : vector<1x32x64xbf16> to vector<32x64xbf16>
    %cst_67 = arith.constant dense<0.000000e+00> : vector<8x64xf32>
    %113 = tpu.matmul %110, %112, %cst_67 {dimension_numbers = #tpu.dot_dimension_numbers<[1], [0], [0], [1], [0, 0, 1, 1], [], []>} : vector<8x32xbf16>, vector<32x64xbf16>, vector<8x64xf32> -> vector<8x64xf32>
    %c0_68 = arith.constant 0 : index
    %c0_69 = arith.constant 0 : index
    %c0_70 = arith.constant 0 : index
    %114 = vector.load %arg11[%c0_68, %c0_69, %c0_70] : memref<1x1x64xf32, #tpu.memory_space<vmem>>, vector<1x1x64xf32>
    %115 = vector.shape_cast %114 : vector<1x1x64xf32> to vector<1x64xf32>
    %116 = vector.broadcast %115 : vector<1x64xf32> to vector<8x64xf32>
    %117 = arith.addf %113, %116 : vector<8x64xf32>
    %118 = vector.extract_strided_slice %117 {offsets = [0, 0], sizes = [8, 32], strides = [1, 1]} : vector<8x64xf32> to vector<8x32xf32>
    %cst_71 = arith.constant 0.000000e+00 : f32
    %119 = vector.broadcast %cst_71 : f32 to vector<8x32xf32>
    %120 = arith.cmpf ogt, %118, %119 : vector<8x32xf32>
    %cst_72 = arith.constant 1.000000e+00 : f32
    %121 = vector.broadcast %cst_72 : f32 to vector<8x32xf32>
    %122 = arith.addf %118, %121 : vector<8x32xf32>
    %cst_73 = arith.constant 0.000000e+00 : f32
    %123 = vector.broadcast %cst_73 : f32 to vector<8x32xf32>
    %124 = arith.minimumf %118, %123 : vector<8x32xf32>
    %125 = math.exp %124 : vector<8x32xf32>
    %126 = arith.select %120, %122, %125 : vector<8x32xi1>, vector<8x32xf32>
    %127 = vector.shape_cast %126 : vector<8x32xf32> to vector<8x4x8xf32>
    %128 = tpu.transpose %127, [1, 0, 2] : vector<8x4x8xf32> -> vector<4x8x8xf32>
    %129 = vector.extract_strided_slice %117 {offsets = [0, 32], sizes = [8, 32], strides = [1, 1]} : vector<8x64xf32> to vector<8x32xf32>
    %130 = vector.shape_cast %129 : vector<8x32xf32> to vector<8x4x8xf32>
    %131 = tpu.transpose %130, [1, 0, 2] : vector<8x4x8xf32> -> vector<4x8x8xf32>
    "tpu.trace_start"() <{level = 10 : i32, message = "hmd,hme->hde"}> : () -> ()
    %cst_74 = arith.constant dense<0.000000e+00> : vector<4x8x8xf32>
    %132 = tpu.matmul %128, %131, %cst_74 {dimension_numbers = #tpu.dot_dimension_numbers<[1], [1], [2], [2], [0, 0, 0, 2, 1, 2], [0], [0]>} : vector<4x8x8xf32>, vector<4x8x8xf32>, vector<4x8x8xf32> -> vector<4x8x8xf32>
    "tpu.trace_stop"() : () -> ()
    %cst_75 = arith.constant dense<0.000000e+00> : vector<4x8xf32>
    %133 = vector.multi_reduction <add>, %128, %cst_75 [1] : vector<4x8x8xf32> to vector<4x8xf32>
    %c0_76 = arith.constant 0 : index
    %c0_77 = arith.constant 0 : index
    %c0_78 = arith.constant 0 : index
    %134 = vector.load %arg8[%c0_76, %c0_77, %c0_78] : memref<1x32x32xbf16, #tpu.memory_space<vmem>>, vector<1x32x32xbf16>
    %135 = vector.shape_cast %134 : vector<1x32x32xbf16> to vector<32x32xbf16>
    %136 = arith.truncf %108 : vector<8x32xf32> to vector<8x32xbf16>
    %cst_79 = arith.constant dense<0.000000e+00> : vector<8x32xf32>
    %137 = tpu.matmul %136, %135, %cst_79 {dimension_numbers = #tpu.dot_dimension_numbers<[1], [0], [0], [1], [0, 0, 1, 1], [], []>} : vector<8x32xbf16>, vector<32x32xbf16>, vector<8x32xf32> -> vector<8x32xf32>
    %c0_80 = arith.constant 0 : index
    %c0_81 = arith.constant 0 : index
    %c0_82 = arith.constant 0 : index
    %138 = vector.load %arg9[%c0_80, %c0_81, %c0_82] : memref<1x1x32xf32, #tpu.memory_space<vmem>>, vector<1x1x32xf32>
    %139 = vector.shape_cast %138 : vector<1x1x32xf32> to vector<1x32xf32>
    %140 = vector.broadcast %139 : vector<1x32xf32> to vector<8x32xf32>
    %141 = arith.addf %137, %140 : vector<8x32xf32>
    %cst_83 = arith.constant 0.000000e+00 : f32
    %142 = vector.broadcast %cst_83 : f32 to vector<8x32xf32>
    %143 = arith.cmpf ogt, %141, %142 : vector<8x32xf32>
    %cst_84 = arith.constant 1.000000e+00 : f32
    %144 = vector.broadcast %cst_84 : f32 to vector<8x32xf32>
    %145 = arith.addf %141, %144 : vector<8x32xf32>
    %cst_85 = arith.constant 0.000000e+00 : f32
    %146 = vector.broadcast %cst_85 : f32 to vector<8x32xf32>
    %147 = arith.minimumf %141, %146 : vector<8x32xf32>
    %148 = math.exp %147 : vector<8x32xf32>
    %149 = arith.select %143, %145, %148 : vector<8x32xi1>, vector<8x32xf32>
    %150 = vector.shape_cast %149 : vector<8x32xf32> to vector<8x4x8xf32>
    %151 = tpu.transpose %150, [1, 0, 2] : vector<8x4x8xf32> -> vector<4x8x8xf32>
    "tpu.trace_start"() <{level = 10 : i32, message = "hld,hde->hle"}> : () -> ()
    %cst_86 = arith.constant dense<0.000000e+00> : vector<4x8x8xf32>
    %152 = tpu.matmul %151, %132, %cst_86 {dimension_numbers = #tpu.dot_dimension_numbers<[2], [1], [1], [2], [0, 0, 0, 1, 1, 2], [0], [0]>} : vector<4x8x8xf32>, vector<4x8x8xf32>, vector<4x8x8xf32> -> vector<4x8x8xf32>
    "tpu.trace_stop"() : () -> ()
    %153 = vector.shape_cast %133 : vector<4x8xf32> to vector<4x1x8xf32>
    %154 = vector.broadcast %153 : vector<4x1x8xf32> to vector<4x8x8xf32>
    %155 = arith.mulf %151, %154 : vector<4x8x8xf32>
    %cst_87 = arith.constant dense<0.000000e+00> : vector<4x8xf32>
    %156 = vector.multi_reduction <add>, %155, %cst_87 [2] : vector<4x8x8xf32> to vector<4x8xf32>
    %157 = vector.shape_cast %156 : vector<4x8xf32> to vector<4x8x1xf32>
    %cst_88 = arith.constant 9.99999997E-7 : f32
    %158 = vector.broadcast %cst_88 : f32 to vector<4x8x1xf32>
    %159 = arith.addf %157, %158 : vector<4x8x1xf32>
    %160 = vector.broadcast %159 : vector<4x8x1xf32> to vector<4x8x8xf32>
    %161 = arith.divf %152, %160 : vector<4x8x8xf32>
    %162 = tpu.transpose %161, [1, 0, 2] : vector<4x8x8xf32> -> vector<8x4x8xf32>
    %163 = vector.shape_cast %162 : vector<8x4x8xf32> to vector<8x32xf32>
    %c0_89 = arith.constant 0 : index
    %c0_90 = arith.constant 0 : index
    %c0_91 = arith.constant 0 : index
    %164 = vector.load %arg12[%c0_89, %c0_90, %c0_91] : memref<1x32x32xbf16, #tpu.memory_space<vmem>>, vector<1x32x32xbf16>
    %165 = vector.shape_cast %164 : vector<1x32x32xbf16> to vector<32x32xbf16>
    %166 = arith.truncf %163 : vector<8x32xf32> to vector<8x32xbf16>
    %cst_92 = arith.constant dense<0.000000e+00> : vector<8x32xf32>
    %167 = tpu.matmul %166, %165, %cst_92 {dimension_numbers = #tpu.dot_dimension_numbers<[1], [0], [0], [1], [0, 0, 1, 1], [], []>} : vector<8x32xbf16>, vector<32x32xbf16>, vector<8x32xf32> -> vector<8x32xf32>
    %c0_93 = arith.constant 0 : index
    %c0_94 = arith.constant 0 : index
    %c0_95 = arith.constant 0 : index
    %168 = vector.load %arg13[%c0_93, %c0_94, %c0_95] : memref<1x1x32xf32, #tpu.memory_space<vmem>>, vector<1x1x32xf32>
    %169 = vector.shape_cast %168 : vector<1x1x32xf32> to vector<1x32xf32>
    %170 = vector.broadcast %169 : vector<1x32xf32> to vector<8x32xf32>
    %171 = arith.addf %167, %170 : vector<8x32xf32>
    %172 = arith.addf %108, %171 : vector<8x32xf32>
    %c0_96 = arith.constant 0 : index
    %c0_97 = arith.constant 0 : index
    %c0_98 = arith.constant 0 : index
    %173 = vector.load %arg20[%c0_96, %c0_97, %c0_98] : memref<1x1x32xf32, #tpu.memory_space<vmem>>, vector<1x1x32xf32>
    %174 = vector.shape_cast %173 : vector<1x1x32xf32> to vector<1x32xf32>
    %c0_99 = arith.constant 0 : index
    %c0_100 = arith.constant 0 : index
    %c0_101 = arith.constant 0 : index
    %175 = vector.load %arg21[%c0_99, %c0_100, %c0_101] : memref<1x1x32xf32, #tpu.memory_space<vmem>>, vector<1x1x32xf32>
    %176 = vector.shape_cast %175 : vector<1x1x32xf32> to vector<1x32xf32>
    %cst_102 = arith.constant dense<0.000000e+00> : vector<8xf32>
    %177 = vector.multi_reduction <add>, %172, %cst_102 [1] : vector<8x32xf32> to vector<8xf32>
    %178 = vector.shape_cast %177 : vector<8xf32> to vector<8x1xf32>
    %cst_103 = arith.constant 3.200000e+01 : f32
    %179 = vector.broadcast %cst_103 : f32 to vector<8x1xf32>
    %180 = arith.divf %178, %179 : vector<8x1xf32>
    %181 = vector.broadcast %180 : vector<8x1xf32> to vector<8x32xf32>
    %182 = arith.subf %172, %181 : vector<8x32xf32>
    %183 = arith.mulf %182, %182 : vector<8x32xf32>
    %cst_104 = arith.constant dense<0.000000e+00> : vector<8xf32>
    %184 = vector.multi_reduction <add>, %183, %cst_104 [1] : vector<8x32xf32> to vector<8xf32>
    %185 = vector.shape_cast %184 : vector<8xf32> to vector<8x1xf32>
    %cst_105 = arith.constant 3.200000e+01 : f32
    %186 = vector.broadcast %cst_105 : f32 to vector<8x1xf32>
    %187 = arith.divf %185, %186 : vector<8x1xf32>
    %188 = vector.broadcast %180 : vector<8x1xf32> to vector<8x32xf32>
    %189 = arith.subf %172, %188 : vector<8x32xf32>
    %cst_106 = arith.constant 9.99999974E-6 : f32
    %190 = vector.broadcast %cst_106 : f32 to vector<8x1xf32>
    %191 = arith.addf %187, %190 : vector<8x1xf32>
    %192 = math.rsqrt %191 : vector<8x1xf32>
    %193 = vector.broadcast %192 : vector<8x1xf32> to vector<8x32xf32>
    %194 = arith.mulf %189, %193 : vector<8x32xf32>
    %195 = vector.broadcast %174 : vector<1x32xf32> to vector<8x32xf32>
    %196 = arith.mulf %194, %195 : vector<8x32xf32>
    %197 = vector.broadcast %176 : vector<1x32xf32> to vector<8x32xf32>
    %198 = arith.addf %196, %197 : vector<8x32xf32>
    %c0_107 = arith.constant 0 : index
    %c0_108 = arith.constant 0 : index
    %c0_109 = arith.constant 0 : index
    %199 = vector.load %arg14[%c0_107, %c0_108, %c0_109] : memref<1x32x64xbf16, #tpu.memory_space<vmem>>, vector<1x32x64xbf16>
    %200 = vector.shape_cast %199 : vector<1x32x64xbf16> to vector<32x64xbf16>
    %201 = arith.truncf %198 : vector<8x32xf32> to vector<8x32xbf16>
    %cst_110 = arith.constant dense<0.000000e+00> : vector<8x64xf32>
    %202 = tpu.matmul %201, %200, %cst_110 {dimension_numbers = #tpu.dot_dimension_numbers<[1], [0], [0], [1], [0, 0, 1, 1], [], []>} : vector<8x32xbf16>, vector<32x64xbf16>, vector<8x64xf32> -> vector<8x64xf32>
    %c0_111 = arith.constant 0 : index
    %c0_112 = arith.constant 0 : index
    %c0_113 = arith.constant 0 : index
    %203 = vector.load %arg15[%c0_111, %c0_112, %c0_113] : memref<1x1x64xf32, #tpu.memory_space<vmem>>, vector<1x1x64xf32>
    %204 = vector.shape_cast %203 : vector<1x1x64xf32> to vector<1x64xf32>
    %205 = vector.broadcast %204 : vector<1x64xf32> to vector<8x64xf32>
    %206 = arith.addf %202, %205 : vector<8x64xf32>
    %cst_114 = arith.constant 5.000000e-01 : f32
    %207 = vector.broadcast %cst_114 : f32 to vector<8x64xf32>
    %208 = arith.mulf %207, %206 : vector<8x64xf32>
    %cst_115 = arith.constant 0.707106769 : f32
    %209 = vector.broadcast %cst_115 : f32 to vector<8x64xf32>
    %210 = arith.mulf %206, %209 : vector<8x64xf32>
    %211 = math.erf %210 : vector<8x64xf32>
    %cst_116 = arith.constant 1.000000e+00 : f32
    %212 = vector.broadcast %cst_116 : f32 to vector<8x64xf32>
    %213 = arith.addf %212, %211 : vector<8x64xf32>
    %214 = arith.mulf %208, %213 : vector<8x64xf32>
    %c0_117 = arith.constant 0 : index
    %c0_118 = arith.constant 0 : index
    %c0_119 = arith.constant 0 : index
    %215 = vector.load %arg16[%c0_117, %c0_118, %c0_119] : memref<1x64x32xbf16, #tpu.memory_space<vmem>>, vector<1x64x32xbf16>
    %216 = vector.shape_cast %215 : vector<1x64x32xbf16> to vector<64x32xbf16>
    %217 = arith.truncf %214 : vector<8x64xf32> to vector<8x64xbf16>
    %cst_120 = arith.constant dense<0.000000e+00> : vector<8x32xf32>
    %218 = tpu.matmul %217, %216, %cst_120 {dimension_numbers = #tpu.dot_dimension_numbers<[1], [0], [0], [1], [0, 0, 1, 1], [], []>} : vector<8x64xbf16>, vector<64x32xbf16>, vector<8x32xf32> -> vector<8x32xf32>
    %c0_121 = arith.constant 0 : index
    %c0_122 = arith.constant 0 : index
    %c0_123 = arith.constant 0 : index
    %219 = vector.load %arg17[%c0_121, %c0_122, %c0_123] : memref<1x1x32xf32, #tpu.memory_space<vmem>>, vector<1x1x32xf32>
    %220 = vector.shape_cast %219 : vector<1x1x32xf32> to vector<1x32xf32>
    %221 = vector.broadcast %220 : vector<1x32xf32> to vector<8x32xf32>
    %222 = arith.addf %218, %221 : vector<8x32xf32>
    %223 = arith.addf %198, %222 : vector<8x32xf32>
    %c0_124 = arith.constant 0 : index
    %c0_125 = arith.constant 0 : index
    %c0_126 = arith.constant 0 : index
    %224 = vector.load %arg22[%c0_124, %c0_125, %c0_126] : memref<1x1x32xf32, #tpu.memory_space<vmem>>, vector<1x1x32xf32>
    %225 = vector.shape_cast %224 : vector<1x1x32xf32> to vector<1x32xf32>
    %c0_127 = arith.constant 0 : index
    %c0_128 = arith.constant 0 : index
    %c0_129 = arith.constant 0 : index
    %226 = vector.load %arg23[%c0_127, %c0_128, %c0_129] : memref<1x1x32xf32, #tpu.memory_space<vmem>>, vector<1x1x32xf32>
    %227 = vector.shape_cast %226 : vector<1x1x32xf32> to vector<1x32xf32>
    %cst_130 = arith.constant dense<0.000000e+00> : vector<8xf32>
    %228 = vector.multi_reduction <add>, %223, %cst_130 [1] : vector<8x32xf32> to vector<8xf32>
    %229 = vector.shape_cast %228 : vector<8xf32> to vector<8x1xf32>
    %cst_131 = arith.constant 3.200000e+01 : f32
    %230 = vector.broadcast %cst_131 : f32 to vector<8x1xf32>
    %231 = arith.divf %229, %230 : vector<8x1xf32>
    %232 = vector.broadcast %231 : vector<8x1xf32> to vector<8x32xf32>
    %233 = arith.subf %223, %232 : vector<8x32xf32>
    %234 = arith.mulf %233, %233 : vector<8x32xf32>
    %cst_132 = arith.constant dense<0.000000e+00> : vector<8xf32>
    %235 = vector.multi_reduction <add>, %234, %cst_132 [1] : vector<8x32xf32> to vector<8xf32>
    %236 = vector.shape_cast %235 : vector<8xf32> to vector<8x1xf32>
    %cst_133 = arith.constant 3.200000e+01 : f32
    %237 = vector.broadcast %cst_133 : f32 to vector<8x1xf32>
    %238 = arith.divf %236, %237 : vector<8x1xf32>
    %239 = vector.broadcast %231 : vector<8x1xf32> to vector<8x32xf32>
    %240 = arith.subf %223, %239 : vector<8x32xf32>
    %cst_134 = arith.constant 9.99999974E-6 : f32
    %241 = vector.broadcast %cst_134 : f32 to vector<8x1xf32>
    %242 = arith.addf %238, %241 : vector<8x1xf32>
    %243 = math.rsqrt %242 : vector<8x1xf32>
    %244 = vector.broadcast %243 : vector<8x1xf32> to vector<8x32xf32>
    %245 = arith.mulf %240, %244 : vector<8x32xf32>
    %246 = vector.broadcast %225 : vector<1x32xf32> to vector<8x32xf32>
    %247 = arith.mulf %245, %246 : vector<8x32xf32>
    %248 = vector.broadcast %227 : vector<1x32xf32> to vector<8x32xf32>
    %249 = arith.addf %247, %248 : vector<8x32xf32>
    %c0_135 = arith.constant 0 : index
    %c0_136 = arith.constant 0 : index
    %250 = vector.load %arg27[%c0_135, %c0_136] : memref<8x32xf32, #tpu.memory_space<vmem>>, vector<8x32xf32>
    tpu.vector_store %arg27[%c0_135, %c0_136], %249 {strides = array<i32>} : memref<8x32xf32, #tpu.memory_space<vmem>>, vector<8x32xf32>,
    %c1_i32_137 = arith.constant 1 : i32
    %251 = arith.cmpi eq, %arg1, %c1_i32_137 : i32
    %252 = arith.extui %251 : i1 to i32
    %c0_i32_138 = arith.constant 0 : i32
    %253 = arith.cmpi ne, %252, %c0_i32_138 : i32
    scf.if %253 {
      %c0_139 = arith.constant 0 : index
      %c0_140 = arith.constant 0 : index
      %254 = vector.load %arg24[%c0_139, %c0_140] : memref<1x32xf32, #tpu.memory_space<vmem>>, vector<1x32xf32>
      %c0_141 = arith.constant 0 : index
      %c0_142 = arith.constant 0 : index
      %255 = vector.load %arg25[%c0_141, %c0_142] : memref<1x32xf32, #tpu.memory_space<vmem>>, vector<1x32xf32>
      %cst_143 = arith.constant dense<0.000000e+00> : vector<8xf32>
      %256 = vector.multi_reduction <add>, %249, %cst_143 [1] : vector<8x32xf32> to vector<8xf32>
      %257 = vector.shape_cast %256 : vector<8xf32> to vector<8x1xf32>
      %cst_144 = arith.constant 3.200000e+01 : f32
      %258 = vector.broadcast %cst_144 : f32 to vector<8x1xf32>
      %259 = arith.divf %257, %258 : vector<8x1xf32>
      %260 = vector.broadcast %259 : vector<8x1xf32> to vector<8x32xf32>
      %261 = arith.subf %249, %260 : vector<8x32xf32>
      %262 = arith.mulf %261, %261 : vector<8x32xf32>
      %cst_145 = arith.constant dense<0.000000e+00> : vector<8xf32>
      %263 = vector.multi_reduction <add>, %262, %cst_145 [1] : vector<8x32xf32> to vector<8xf32>
      %264 = vector.shape_cast %263 : vector<8xf32> to vector<8x1xf32>
      %cst_146 = arith.constant 3.200000e+01 : f32
      %265 = vector.broadcast %cst_146 : f32 to vector<8x1xf32>
      %266 = arith.divf %264, %265 : vector<8x1xf32>
      %267 = vector.broadcast %259 : vector<8x1xf32> to vector<8x32xf32>
      %268 = arith.subf %249, %267 : vector<8x32xf32>
      %cst_147 = arith.constant 9.99999974E-6 : f32
      %269 = vector.broadcast %cst_147 : f32 to vector<8x1xf32>
      %270 = arith.addf %266, %269 : vector<8x1xf32>
      %271 = math.rsqrt %270 : vector<8x1xf32>
      %272 = vector.broadcast %271 : vector<8x1xf32> to vector<8x32xf32>
      %273 = arith.mulf %268, %272 : vector<8x32xf32>
      %274 = vector.broadcast %254 : vector<1x32xf32> to vector<8x32xf32>
      %275 = arith.mulf %273, %274 : vector<8x32xf32>
      %276 = vector.broadcast %255 : vector<1x32xf32> to vector<8x32xf32>
      %277 = arith.addf %275, %276 : vector<8x32xf32>
      %c0_148 = arith.constant 0 : index
      %c0_149 = arith.constant 0 : index
      %c0_150 = arith.constant 0 : index
      %278 = vector.load %arg26[%c0_148, %c0_149, %c0_150] : memref<1x8x32xf32, #tpu.memory_space<vmem>>, vector<1x8x32xf32>
      %279 = vector.shape_cast %278 : vector<1x8x32xf32> to vector<8x32xf32>
      %280 = vector.shape_cast %277 : vector<8x32xf32> to vector<1x8x32xf32>
      tpu.vector_store %arg26[%c0_148, %c0_149, %c0_150], %280 {strides = array<i32>} : memref<1x8x32xf32, #tpu.memory_space<vmem>>, vector<1x8x32xf32>,
    } else {
    }
    return
  }
  func.func @transform_0(%arg0: i32, %arg1: i32) -> (i32, i32, i32) {
    %c0_i32 = arith.constant 0 : i32
    %c0_i32_0 = arith.constant 0 : i32
    %c0_i32_1 = arith.constant 0 : i32
    return %arg0, %c0_i32, %c0_i32_0 : i32, i32, i32
  }
  func.func @transform_1(%arg0: i32, %arg1: i32) -> (i32, i32, i32) {
    %c0_i32 = arith.constant 0 : i32
    %c0_i32_0 = arith.constant 0 : i32
    %c0_i32_1 = arith.constant 0 : i32
    return %arg0, %c0_i32, %c0_i32_0 : i32, i32, i32
  }
  func.func @transform_2(%arg0: i32, %arg1: i32) -> (i32, i32, i32) {
    %c0_i32 = arith.constant 0 : i32
    %c0_i32_0 = arith.constant 0 : i32
    %c0_i32_1 = arith.constant 0 : i32
    return %arg1, %c0_i32, %c0_i32_0 : i32, i32, i32
  }
  func.func @transform_3(%arg0: i32, %arg1: i32) -> (i32, i32, i32) {
    %c0_i32 = arith.constant 0 : i32
    %c0_i32_0 = arith.constant 0 : i32
    %c0_i32_1 = arith.constant 0 : i32
    return %arg1, %c0_i32, %c0_i32_0 : i32, i32, i32
  }
  func.func @transform_4(%arg0: i32, %arg1: i32) -> (i32, i32, i32) {
    %c0_i32 = arith.constant 0 : i32
    %c0_i32_0 = arith.constant 0 : i32
    %c0_i32_1 = arith.constant 0 : i32
    return %arg1, %c0_i32, %c0_i32_0 : i32, i32, i32
  }
  func.func @transform_5(%arg0: i32, %arg1: i32) -> (i32, i32, i32) {
    %c0_i32 = arith.constant 0 : i32
    %c0_i32_0 = arith.constant 0 : i32
    %c0_i32_1 = arith.constant 0 : i32
    return %arg1, %c0_i32, %c0_i32_0 : i32, i32, i32
  }
  func.func @transform_6(%arg0: i32, %arg1: i32) -> (i32, i32, i32) {
    %c0_i32 = arith.constant 0 : i32
    %c0_i32_0 = arith.constant 0 : i32
    %c0_i32_1 = arith.constant 0 : i32
    return %arg1, %c0_i32, %c0_i32_0 : i32, i32, i32
  }
  func.func @transform_7(%arg0: i32, %arg1: i32) -> (i32, i32, i32) {
    %c0_i32 = arith.constant 0 : i32
    %c0_i32_0 = arith.constant 0 : i32
    %c0_i32_1 = arith.constant 0 : i32
    return %arg1, %c0_i32, %c0_i32_0 : i32, i32, i32
  }
  func.func @transform_8(%arg0: i32, %arg1: i32) -> (i32, i32, i32) {
    %c0_i32 = arith.constant 0 : i32
    %c0_i32_0 = arith.constant 0 : i32
    %c0_i32_1 = arith.constant 0 : i32
    return %arg1, %c0_i32, %c0_i32_0 : i32, i32, i32
  }
  func.func @transform_9(%arg0: i32, %arg1: i32) -> (i32, i32, i32) {
    %c0_i32 = arith.constant 0 : i32
    %c0_i32_0 = arith.constant 0 : i32
    %c0_i32_1 = arith.constant 0 : i32
    return %arg1, %c0_i32, %c0_i32_0 : i32, i32, i32
  }
  func.func @transform_10(%arg0: i32, %arg1: i32) -> (i32, i32, i32) {
    %c0_i32 = arith.constant 0 : i32
    %c0_i32_0 = arith.constant 0 : i32
    %c0_i32_1 = arith.constant 0 : i32
    return %arg1, %c0_i32, %c0_i32_0 : i32, i32, i32
  }
  func.func @transform_11(%arg0: i32, %arg1: i32) -> (i32, i32, i32) {
    %c0_i32 = arith.constant 0 : i32
    %c0_i32_0 = arith.constant 0 : i32
    %c0_i32_1 = arith.constant 0 : i32
    return %arg1, %c0_i32, %c0_i32_0 : i32, i32, i32
  }
  func.func @transform_12(%arg0: i32, %arg1: i32) -> (i32, i32, i32) {
    %c0_i32 = arith.constant 0 : i32
    %c0_i32_0 = arith.constant 0 : i32
    %c0_i32_1 = arith.constant 0 : i32
    return %arg1, %c0_i32, %c0_i32_0 : i32, i32, i32
  }
  func.func @transform_13(%arg0: i32, %arg1: i32) -> (i32, i32, i32) {
    %c0_i32 = arith.constant 0 : i32
    %c0_i32_0 = arith.constant 0 : i32
    %c0_i32_1 = arith.constant 0 : i32
    return %arg1, %c0_i32, %c0_i32_0 : i32, i32, i32
  }
  func.func @transform_14(%arg0: i32, %arg1: i32) -> (i32, i32, i32) {
    %c0_i32 = arith.constant 0 : i32
    %c0_i32_0 = arith.constant 0 : i32
    %c0_i32_1 = arith.constant 0 : i32
    return %arg1, %c0_i32, %c0_i32_0 : i32, i32, i32
  }
  func.func @transform_15(%arg0: i32, %arg1: i32) -> (i32, i32, i32) {
    %c0_i32 = arith.constant 0 : i32
    %c0_i32_0 = arith.constant 0 : i32
    %c0_i32_1 = arith.constant 0 : i32
    return %arg1, %c0_i32, %c0_i32_0 : i32, i32, i32
  }
  func.func @transform_16(%arg0: i32, %arg1: i32) -> (i32, i32, i32) {
    %c0_i32 = arith.constant 0 : i32
    %c0_i32_0 = arith.constant 0 : i32
    %c0_i32_1 = arith.constant 0 : i32
    return %arg1, %c0_i32, %c0_i32_0 : i32, i32, i32
  }
  func.func @transform_17(%arg0: i32, %arg1: i32) -> (i32, i32, i32) {
    %c0_i32 = arith.constant 0 : i32
    %c0_i32_0 = arith.constant 0 : i32
    %c0_i32_1 = arith.constant 0 : i32
    return %arg1, %c0_i32, %c0_i32_0 : i32, i32, i32
  }
  func.func @transform_18(%arg0: i32, %arg1: i32) -> (i32, i32, i32) {
    %c0_i32 = arith.constant 0 : i32
    %c0_i32_0 = arith.constant 0 : i32
    %c0_i32_1 = arith.constant 0 : i32
    return %arg1, %c0_i32, %c0_i32_0 : i32, i32, i32
  }
  func.func @transform_19(%arg0: i32, %arg1: i32) -> (i32, i32, i32) {
    %c0_i32 = arith.constant 0 : i32
    %c0_i32_0 = arith.constant 0 : i32
    %c0_i32_1 = arith.constant 0 : i32
    return %arg1, %c0_i32, %c0_i32_0 : i32, i32, i32
  }
  func.func @transform_20(%arg0: i32, %arg1: i32) -> (i32, i32, i32) {
    %c0_i32 = arith.constant 0 : i32
    %c0_i32_0 = arith.constant 0 : i32
    %c0_i32_1 = arith.constant 0 : i32
    return %arg1, %c0_i32, %c0_i32_0 : i32, i32, i32
  }
  func.func @transform_21(%arg0: i32, %arg1: i32) -> (i32, i32, i32) {
    %c0_i32 = arith.constant 0 : i32
    %c0_i32_0 = arith.constant 0 : i32
    %c0_i32_1 = arith.constant 0 : i32
    return %arg1, %c0_i32, %c0_i32_0 : i32, i32, i32
  }
  func.func @transform_22(%arg0: i32, %arg1: i32) -> (i32, i32) {
    %c0_i32 = arith.constant 0 : i32
    %c0_i32_0 = arith.constant 0 : i32
    %c0_i32_1 = arith.constant 0 : i32
    return %c0_i32, %c0_i32_0 : i32, i32
  }
  func.func @transform_23(%arg0: i32, %arg1: i32) -> (i32, i32) {
    %c0_i32 = arith.constant 0 : i32
    %c0_i32_0 = arith.constant 0 : i32
    %c0_i32_1 = arith.constant 0 : i32
    return %c0_i32, %c0_i32_0 : i32, i32
  }
  func.func @transform_24(%arg0: i32, %arg1: i32) -> (i32, i32, i32) {
    %c0_i32 = arith.constant 0 : i32
    %c0_i32_0 = arith.constant 0 : i32
    %c0_i32_1 = arith.constant 0 : i32
    return %arg0, %c0_i32, %c0_i32_0 : i32, i32, i32
  }
}

</mosaic_0001>

<bundles_post_ra>
// kernel: tpu_custom_call.1
= control target key start
LH: loop header
LB: loop body
LE: loop exit
PB: predicated region body
PF: predicated region fallthrough
CT: control target
= control target key end

     0   :  { %s8778_s0 = inlined_call_operand.hbm [shape: f32[2,8,32], index: 0, kind: input, shape index: {}]   ;;  %s8779_s1 = inlined_call_operand.hbm [shape: bf16[2,8,32], index: 1, kind: input, shape index: {}]   ;;  %s8780_s2 = inlined_call_operand.hbm [shape: bf16[2,32,96], index: 2, kind: input, shape index: {}]   ;;  %s8781_s3 = inlined_call_operand.hbm [shape: f32[2,1,96], index: 3, kind: input, shape index: {}]   ;;  %s8782_s4 = inlined_call_operand.hbm [shape: bf16[2,32,32], index: 4, kind: input, shape index: {}]   ;;  %s8783_s5 = inlined_call_operand.hbm [shape: f32[2,1,32], index: 5, kind: input, shape index: {}]   ;;  %s8784_s6 = inlined_call_operand.hbm [shape: bf16[2,32,32], index: 6, kind: input, shape index: {}]   ;;  %s8785_s7 = inlined_call_operand.hbm [shape: f32[2,1,32], index: 7, kind: input, shape index: {}]   ;;  %s8786_s8 = inlined_call_operand.hbm [shape: bf16[2,32,64], index: 8, kind: input, shape index: {}]   ;;  %s8787_s9 = inlined_call_operand.hbm [shape: f32[2,1,64], index: 9, kind: input, shape index: {}]   ;;  %s8788_s10 = inlined_call_operand.hbm [shape: bf16[2,32,32], index: 10, kind: input, shape index: {}]   ;;  %s8789_s11 = inlined_call_operand.hbm [shape: f32[2,1,32], index: 11, kind: input, shape index: {}]   ;;  %s8790_s12 = inlined_call_operand.hbm [shape: bf16[2,32,64], index: 12, kind: input, shape index: {}]   ;;  %s8791_s13 = inlined_call_operand.hbm [shape: f32[2,1,64], index: 13, kind: input, shape index: {}]   ;;  %s8792_s14 = inlined_call_operand.hbm [shape: bf16[2,64,32], index: 14, kind: input, shape index: {}]   ;;  %s8793_s15 = inlined_call_operand.hbm [shape: f32[2,1,32], index: 15, kind: input, shape index: {}]   ;;  %s8794_s16 = inlined_call_operand.hbm [shape: f32[2,1,32], index: 16, kind: input, shape index: {}]   ;;  %s8795_s17 = inlined_call_operand.hbm [shape: f32[2,1,32], index: 17, kind: input, shape index: {}]   ;;  %s8796_s18 = inlined_call_operand.hbm [shape: f32[2,1,32], index: 18, kind: input, shape index: {}]   ;;  %s8797_s19 = inlined_call_operand.hbm [shape: f32[2,1,32], index: 19, kind: input, shape index: {}]   ;;  %s8798_s20 = inlined_call_operand.hbm [shape: f32[2,1,32], index: 20, kind: input, shape index: {}]   ;;  %s8799_s21 = inlined_call_operand.hbm [shape: f32[2,1,32], index: 21, kind: input, shape index: {}]   ;;  %s8800_s22 = inlined_call_operand.hbm [shape: f32[1,32], index: 22, kind: input, shape index: {}]   ;;  %s8801_s23 = inlined_call_operand.hbm [shape: f32[1,32], index: 23, kind: input, shape index: {}]   ;;  %s8802_s24 = inlined_call_operand.hbm [shape: f32[2,8,32], index: 24, kind: output, shape index: {}]  }
   0x1   :  { %8860 = sst [smem:[#allocation77_spill]] %s8778_s0 }
   0x2   :  { %8861 = sst [smem:[#allocation78_spill]] %s8779_s1 }
   0x3   :  { %8862 = sst [smem:[#allocation79_spill]] %s8780_s2 }
   0x4   :  { %8863 = sst [smem:[#allocation80_spill]] %s8781_s3 }
   0x5   :  { %8864 = sst [smem:[#allocation81_spill]] %s8782_s4 }
   0x6   :  { %8865 = sst [smem:[#allocation82_spill]] %s8783_s5 }
   0x7   :  { %8866 = sst [smem:[#allocation83_spill]] %s8784_s6 }
   0x8   :  { %8867 = sst [smem:[#allocation84_spill]] %s8785_s7 }
   0x9   :  { %8868 = sst [smem:[#allocation85_spill]] %s8786_s8 }
   0xa   :  { %8869 = sst [smem:[#allocation86_spill]] %s8787_s9 }
   0xb   :  { %8870 = sst [smem:[#allocation87_spill]] %s8789_s11 }
   0xc   :  { %8871 = sst [smem:[#allocation88_spill]] %s8790_s12 }
   0xd   :  { %8872 = sst [smem:[#allocation89_spill]] %s8791_s13 }
   0xe   :  { %8873 = sst [smem:[#allocation90_spill]] %s8792_s14 }
   0xf   :  { %8874 = sst [smem:[#allocation91_spill]] %s8793_s15 }
  0x10   :  { %8875 = sst [smem:[#allocation92_spill]] %s8794_s16 }
  0x11   :  { %8876 = sst [smem:[#allocation93_spill]] %s8796_s18 }
  0x12   :  { %8877 = sst [smem:[#allocation94_spill]] %s8798_s20 }
  0x13   :  { %8878 = sst [smem:[#allocation95_spill]] %s8799_s21 }
  0x14   :  { %8879 = sst [smem:[#allocation96_spill]] %s8800_s22 }
  0x15   :  { %8880 = sst [smem:[#allocation97_spill]] %s8801_s23 }
  0x16   :  { %8881 = sst [smem:[#allocation98_spill]] %s8802_s24 }
  0x17   :  { %29 = vsyncpa [#allocation8], 0 }
  0x18   :  { %31 = vsyncpa [#allocation8 + $0x1], 0 }
  0x19   :  { %32 = vsyncpa [#allocation11], 0 }
  0x1a   :  { %34 = vsyncpa [#allocation11 + $0x1], 0 }
  0x1b   :  { %35 = vsyncpa [#allocation14], 0 }
  0x1c   :  { %37 = vsyncpa [#allocation14 + $0x1], 0 }
  0x1d   :  { %38 = vsyncpa [#allocation17], 0 }
  0x1e   :  { %40 = vsyncpa [#allocation17 + $0x1], 0 }
  0x1f   :  { %41 = vsyncpa [#allocation20], 0 }
  0x20   :  { %43 = vsyncpa [#allocation20 + $0x1], 0 }
  0x21   :  { %44 = vsyncpa [#allocation23], 0 }
  0x22   :  { %46 = vsyncpa [#allocation23 + $0x1], 0 }
  0x23   :  { %47 = vsyncpa [#allocation26], 0 }
  0x24   :  { %49 = vsyncpa [#allocation26 + $0x1], 0 }
  0x25   :  { %50 = vsyncpa [#allocation29], 0 }
  0x26   :  { %52 = vsyncpa [#allocation29 + $0x1], 0 }
  0x27   :  { %53 = vsyncpa [#allocation32], 0 }
  0x28   :  { %55 = vsyncpa [#allocation32 + $0x1], 0 }
  0x29   :  { %56 = vsyncpa [#allocation35], 0 }
  0x2a   :  { %58 = vsyncpa [#allocation35 + $0x1], 0 }
  0x2b   :  { %59 = vsyncpa [#allocation38], 0 }
  0x2c   :  { %61 = vsyncpa [#allocation38 + $0x1], 0 }
  0x2d   :  { %62 = vsyncpa [#allocation41], 0 }
  0x2e   :  { %64 = vsyncpa [#allocation41 + $0x1], 0 }
  0x2f   :  { %65 = vsyncpa [#allocation44], 0 }
  0x30   :  { %66 = vsyncpa [#allocation9], 0 }
  0x31   :  { %68 = vsyncpa [#allocation9 + $0x1], 0  ;;  %s7247_s5 = smov 0   ;;  %s7249_s26 = smov 0  }
  0x32   :  { %s7251_s27 = smov 0   ;;  %s7253_s28 = smov 0  }
  0x33   :  { %s7255_s6 = smov 0   ;;  %s7257_s2 = smov 0  }
  0x34   :  { %s7259_s29 = smov 0   ;;  %s7261_s0 = smov 0  }
  0x35   :  { %s7263_s7 = smov 0   ;;  %s7265_s30 = smov 0  }
  0x36   :  { %s7267_s3 = smov 0  }
  0x37 LB: > { %8882 = sst [smem:[#allocation62_spill]] %s7045_s26  ;;  %s7303_s25 = sadd.s32 4294967295, %s7081_s3   ;;  %s7081_s3 = sphi %s7267_s3, %s74_s3   ;;  %s7077_s30 = sphi %s7265_s30, %s9002_s30   ;;  %s7073_s7 = sphi %s7263_s7, %s9001_s7   ;;  %s7069_s0 = sphi %s7261_s0, %s9000_s0   ;;  %s7065_s29 = sphi %s7259_s29, %s8999_s29   ;;  %s7061_s2 = sphi %s7257_s2, %s8994_s2   ;;  %s7057_s6 = sphi %s7255_s6, %s8998_s6   ;;  %s7053_s28 = sphi %s7253_s28, %s8997_s28   ;;  %s7049_s27 = sphi %s7251_s27, %s8992_s27   ;;  %s7045_s26 = sphi %s7249_s26, %s8991_s26   ;;  %s7041_s5 = sphi %s7247_s5, %s8990_s5  }
  0x38   : > { %8883 = sst [smem:[#allocation63_spill]] %s7049_s27  ;;  %s5625_s8 = sadd.s32 4294967294, %s7081_s3  }
  0x39   : > { %8884 = sst [smem:[#allocation64_spill]] %s7053_s28  ;;  %s83_s4 = sadd.s32 1, %s7073_s7 }
  0x3a   : > { %8885 = sst [smem:[#allocation65_spill]] %s7061_s2  ;;  %s86_s1 = sadd.s32 1, %s7077_s30 }
  0x3b   : > { %8886 = sst [smem:[#allocation66_spill]] %s7065_s29  ;;  %p84_p0 = scmp.ge.s32.totalorder %s83_s4, 2 }
  0x3c   : > { %8887 = sst [smem:[#allocation67_spill]] %s7069_s0  ;;  %s93_s24 = sadd.s32 1, %s7061_s2 }
  0x3d   : > { %8888 = sst [smem:[#allocation68_spill]] %s7081_s3  ;;  %p8821_p1 = scmp.ne.s32.totalorder %s7061_s2, %s7057_s6 }
  0x3e   : > { %8889 = sst [smem:[#allocation69_spill]] %s7303_s25  ;;  %p101_p2 = scmp.eq.s32.totalorder %s7081_s3, 0 }
  0x3f   : > { %s9004_s4 = smov (%p84_p0, %s83_s4), 0  ;;  %s9006_s1 = smov (!%p84_p0, %s86_s1), %s7077_s30 }
  0x40   : > { %8890 = sst [smem:[#allocation70_spill]] %s9004_s4  ;;  %p7320_p3 = por %p101_p2, %p8821_p1 }
  0x41   : > { %p8820_p4 = scmp.ne.s32.totalorder %s7057_s6, %s7053_s28  ;;  %p88_p5 = scmp.ge.s32.totalorder %s9006_s1, 2 }
  0x42   : > { %s8891_s0 = scalar_select %p7320_p3, 1, 0 }
  0x43   : > { %p8832_p6 = scmp.eq.s32.totalorder %s7303_s25, 0  ;;  %s142_s29 = ssub.s32 %s7073_s7, %s9004_s4 }
  0x44   : > { %s145_s21 = sadd.s32 1, %s7049_s27  ;;  %s9008_s1 = smov (%p88_p5, %s9006_s1), 0 }
  0x45   : > { %8892 = sst [smem:[#allocation71_spill]] %s9008_s1  ;;  %p7337_p7 = por %p8832_p6, %p8820_p4 }
  0x46   : > { %p143_p8 = scmp.eq.s32.totalorder %s142_s29, 0  ;;  %s90_s18 = ssub.s32 %s7077_s30, %s9008_s1 }
  0x47   : > { %s8893_s20 = scalar_select %p7337_p7, 1, 0 }
  0x48   : > { %p152_p9 = scmp.ne.s32.totalorder %s7049_s27, %s7045_s26  ;;  %p91_p10 = scmp.eq.s32.totalorder %s90_s18, 0 }
  0x49   : > { %p158_p11 = scmp.ne.s32.totalorder %s7045_s26, %s7041_s5  ;;  %p718_p0 = scmp.eq.s32.totalorder %s7303_s25, 3 }
  0x4a   : > { %s7348_s4 = scalar_select %p143_p8, %s7049_s27, %s145_s21  }
  0x4b   : > { %s7351_s16 = scalar_select %p91_p10, %s7061_s2, %s93_s24  }
  0x4c   : > { %8894 = sst [smem:[#allocation72_spill]] %s7348_s4  ;;  %p7355_p12 = por %p152_p9, %p101_p2 }
  0x4d   : > { %8895 = sst [smem:[#allocation73_spill]] %s7351_s16  ;;  %p7361_p13 = por %p158_p11, %p8832_p6 }
  0x4e   : > { %s8896_s14 = scalar_select %p7355_p12, 1, 0 }
  0x4f   : > { %s8897_s12 = scalar_select %p7361_p13, 1, 0 }
  0x50   : > { %p724_p5 = scmp.eq.s32.totalorder %s5625_s8, 3  ;;  %p5626_p4 = scmp.ge.s32.totalorder %s7081_s3, 1 }
  0x51   : > { %8898 = sst [smem:[#allocation74_spill]] %s8897_s12  ;;  %p731_p1 = scmp.lt.s32.totalorder %s7081_s3, 5 }
  0x52   : > { %p8899_p7 = scmp.ne.s32.totalorder %s7061_s2, %s7057_s6  ;;  %p8902_p10 = scmp.ne.s32.totalorder %s7057_s6, %s7053_s28 }
  0x53   : > { %p7382_p2 = pnand %p5626_p4, %p731_p1  ;;  %s7083_s5 = smov [#allocation42]  }
  0x54   : > { %p7371_p8 = por %p718_p0, %p8899_p7  ;;  %p7378_p3 = por %p724_p5, %p8902_p10 }
  0x55   : > { %s8905_s24 = scalar_select %p7382_p2, 1, 0 }
  0x56   : > { %s8900_s18 = scalar_select %p7371_p8, 1, 0 }
  0x57   : > { %s8903_s21 = scalar_select %p7378_p3, 1, 0 }
  0x58   : > { %8901 = sst [smem:[#allocation75_spill]] %s8900_s18  ;;  %p6057_p9 = pneg %p7382_p2 }
  0x59   : > { %8904 = sst [smem:[#allocation76_spill]] %s8903_s21  ;;  %s744_s29 = sshll.u32 %s7083_s5, 4  ;;  %s745_s29 = int_to_ptr.vmem [resolvable:$true] %s744_s29 }
  0x5a   : > { %s7084_s8 = smov [#allocation43]   ;;  %p7390_p7 = pnand %p6057_p9, %p8832_p6 }
  0x5b   : > { %s755_s1 = sshll.u32 %s7084_s8, 4  ;;  %s8907_s22 = sld [smem:[#allocation96_spill]]  ;;  %s7394_s1 = int_to_ptr.vmem [resolvable:$true] %s755_s1 }
  0x5c   : > { %p6233_p4 = pneg %p7390_p7 }
  0x61   : > { %s6231_s28 = scalar_lea.hbm %s8907_s22, 16 }
  0x62   : > { %p6232_p1 = scmp.ne.s32.totalorder %s8907_s22, %s6231_s28  ;;  %p6238_p5 = scmp.lt.u32.totalorder %s6231_s28, %s8907_s22 }
  0x64   : > { %p6234_p11 = pnand %p6233_p4, %p6232_p1 }
  0x66   : > { %p6235_p0 = pneg %p6234_p11 }
  0x68   : > { %p6240_p10 = pnand %p6238_p5, %p6235_p0 }
  0x6a   : > { %6243 = shalt.err (!%p6240_p10)
}
  0x6b   : > { %s6244_s26 = scalar_lea.vmem %s745_s29, 16  ;;  %s6251_s12 = scalar_lea.vmem %s745_s29, 32 }
  0x6c   : > { %p6245_p9 = scmp.ne.s32.totalorder %s745_s29, %s6244_s26  ;;  %p6252_p8 = scmp.lt.s32.totalorder %s745_s29, %s745_s29 }
  0x6d   : > { %p6253_p13 = scmp.lt.s32.totalorder %s6251_s12, %s6244_s26 }
  0x6e   : > { %p6247_p6 = pnand %p6245_p9, %p6233_p4 }
  0x6f   : > { %p6254_p2 = por %p6253_p13, %p6252_p8 }
  0x70   : > { %p6248_p3 = pneg %p6247_p6 }
  0x72   : > { %p6255_p12 = pnand %p6254_p2, %p6248_p3 }
  0x74   : > { %6258 = shalt.err (!%p6255_p12)
}
  0x75   : > { %6060 = dma.hbm_to_vmem [thread:$0]  (!%p7390_p7), %s8907_s22, 16, %s745_s29, [#allocation41]  }
  0x76   : > { %s8908_s23 = sld [smem:[#allocation97_spill]] }
  0x7c   : > { %s6259_s5 = scalar_lea.hbm %s8908_s23, 16 }
  0x7d   : > { %p6260_p6 = scmp.ne.s32.totalorder %s8908_s23, %s6259_s5  ;;  %p6266_p12 = scmp.lt.u32.totalorder %s6259_s5, %s8908_s23 }
  0x7f   : > { %p6262_p13 = pnand %p6260_p6, %p6233_p4 }
  0x81   : > { %p6263_p3 = pneg %p6262_p13 }
  0x83   : > { %p6268_p8 = pnand %p6266_p12, %p6263_p3 }
  0x85   : > { %6271 = shalt.err (!%p6268_p8)
}
  0x86   : > { %s6272_s29 = scalar_lea.vmem %s7394_s1, 16  ;;  %s6279_s25 = scalar_lea.vmem %s7394_s1, 32 }
  0x87   : > { %p6273_p2 = scmp.ne.s32.totalorder %s7394_s1, %s6272_s29  ;;  %p6280_p0 = scmp.lt.s32.totalorder %s7394_s1, %s7394_s1 }
  0x88   : > { %p6281_p5 = scmp.lt.s32.totalorder %s6279_s25, %s6272_s29 }
  0x89   : > { %p6275_p1 = pnand %p6273_p2, %p6233_p4 }
  0x8a   : > { %p6282_p10 = por %p6281_p5, %p6280_p0 }
  0x8b   : > { %p6276_p11 = pneg %p6275_p1 }
  0x8d   : > { %p6283_p9 = pnand %p6282_p10, %p6276_p11 }
  0x8f   : > { %6286 = shalt.err (!%p6283_p9)
}
  0x90   : > { %6063 = dma.hbm_to_vmem [thread:$0]  (!%p7390_p7), %s8908_s23, 16, %s7394_s1, [#allocation44]  }
  0x91   : > { %p5629_p6 = scmp.ge.s32.totalorder %s7081_s3, 4 }
  0x92   : > { %s7446_s28 = sand.u32 (!%p5629_p6), 1, %s7061_s2   ;;  %s7449_s21 = sand.u32 (!%p5629_p6), 1, %s7081_s3  }
  0x93   : > { %762 = sbr.rel (%p5629_p6) target bundleno = 751 (0x2ef), region = 24  ;;  %s5632_s16 = sshll.u32 (!%p5629_p6), %s7446_s28, 2 }
  0x94   : > { %s5633_s5 = sshll.u32 (!%p5629_p6), %s7077_s30, 6  ;;  %s8909_s12 = sld [smem:[#allocation78_spill]] (!%p5629_p6) }
  0x95   : > { %s788_s29 = scalar_lea.vmem (!%p5629_p6), [#allocation10], %s5632_s16  ;;  %s7461_s4 = sand.u32 (!%p5629_p6), 1, %s7049_s27  }
  0x96   : > { %s795_s25 = sshll.u32 (!%p5629_p6), %s788_s29, 4  ;;  %s8841_s18 = scalar_lea.sflag (!%p5629_p6), [#allocation11], %s7449_s21  ;;  %s7458_s25 = int_to_ptr.vmem [resolvable:$true] %s795_s25 }
  0x97   : > { %p8910_p4 = scmp.ne.s32.totalorder (!%p5629_p6), %s8891_s0, 0 }
  0x9a   : > { %s7456_s1 = scalar_lea.hbm %s8909_s12, %s5633_s5  ;;  %s6291_s5 = scalar_lea.hbm %s8909_s12, 128 }
  0x9b   : > { %s6287_s22 = scalar_lea.hbm %s7456_s1, 64  ;;  %p6292_p12 = scmp.lt.u32.totalorder %s7456_s1, %s8909_s12 }
  0x9c   : > { %p6288_p7 = scmp.ne.s32.totalorder %s7456_s1, %s6287_s22  ;;  %p6293_p8 = scmp.lt.u32.totalorder %s6291_s5, %s6287_s22 }
  0x9d   : > { %p6295_p1 = scmp.lt.u32.totalorder %s6287_s22, %s7456_s1 }
  0x9e   : > { %p6289_p13 = pnand %p6288_p7, %p8910_p4  ;;  %p6294_p2 = por %p6293_p8, %p6292_p12 }
  0xa0   : > { %p6290_p3 = pneg %p6289_p13  ;;  %p6296_p11 = por %p6295_p1, %p6294_p2 }
  0xa2   : > { %p6297_p0 = pnand %p6296_p11, %p6290_p3 }
  0xa4   : > { %6300 = shalt.err (!%p6297_p0)
}
  0xa5   : > { %s6301_s16 = scalar_lea.vmem %s7458_s25, 64  ;;  %s7085_s23 = smov [#allocation10]  }
  0xa6   : > { %p6302_p5 = scmp.ne.s32.totalorder %s7458_s25, %s6301_s16  ;;  %s6305_s29 = sshll.u32 %s7085_s23, 4  ;;  %s6306_s29 = int_to_ptr.vmem [resolvable:$false] %s6305_s29 }
  0xa7   : > { %s6307_s2 = scalar_lea.vmem %s6306_s29, 128  ;;  %p6308_p6 = scmp.lt.s32.totalorder %s7458_s25, %s6306_s29 }
  0xa8   : > { %p6303_p10 = pnand %p6302_p5, %p8910_p4  ;;  %p6309_p7 = scmp.lt.s32.totalorder %s6307_s2, %s6301_s16 }
  0xaa   : > { %p6304_p9 = pneg %p6303_p10  ;;  %p6310_p13 = por %p6309_p7, %p6308_p6 }
  0xac   : > { %p6311_p12 = pnand %p6310_p13, %p6304_p9 }
  0xae   : > { %6314 = shalt.err (!%p6311_p12)
}
  0xaf   : > { %6008 = dma.hbm_to_vmem [thread:$0]  (%p8910_p4), %s7456_s1, 64, %s7458_s25, %s8841_s18  }
  0xb0   : > { %s7488_s22 = sshll.u32 %s7073_s7, 4  ;;  %s826_s8 = scalar_lea.vmem [#allocation13], %s7461_s4 }
  0xb1   : > { %s833_s5 = sshll.u32 %s826_s8, 4  ;;  %s8911_s23 = sld [smem:[#allocation80_spill]]  ;;  %s834_s5 = int_to_ptr.vmem [resolvable:$true] %s833_s5 }
  0xb2   : > { %p8912_p8 = scmp.ne.s32.totalorder %s8896_s14, 0 }
  0xb7   : > { %s7495_s29 = scalar_lea.hbm %s8911_s23, %s7488_s22  ;;  %s6319_s8 = scalar_lea.hbm %s8911_s23, 32 }
  0xb8   : > { %s6315_s12 = scalar_lea.hbm %s7495_s29, 16  ;;  %p6320_p11 = scmp.lt.u32.totalorder %s7495_s29, %s8911_s23 }
  0xb9   : > { %p6316_p3 = scmp.ne.s32.totalorder %s7495_s29, %s6315_s12  ;;  %p6321_p0 = scmp.lt.u32.totalorder %s6319_s8, %s6315_s12 }
  0xba   : > { %p6323_p10 = scmp.lt.u32.totalorder %s6315_s12, %s7495_s29 }
  0xbb   : > { %p6317_p2 = pnand %p6316_p3, %p8912_p8  ;;  %p6322_p5 = por %p6321_p0, %p6320_p11 }
  0xbd   : > { %p6318_p1 = pneg %p6317_p2  ;;  %p6324_p9 = por %p6323_p10, %p6322_p5 }
  0xbf   : > { %p6325_p6 = pnand %p6324_p9, %p6318_p1 }
  0xc1   : > { %6328 = shalt.err (!%p6325_p6)
}
  0xc2   : > { %s6329_s26 = scalar_lea.vmem %s834_s5, 16  ;;  %s7086_s16 = smov [#allocation13]  }
  0xc3   : > { %p6330_p7 = scmp.ne.s32.totalorder %s834_s5, %s6329_s26  ;;  %s6333_s2 = sshll.u32 %s7086_s16, 4  ;;  %s6334_s2 = int_to_ptr.vmem [resolvable:$false] %s6333_s2 }
  0xc4   : > { %s6335_s1 = scalar_lea.vmem %s6334_s2, 32  ;;  %p6336_p3 = scmp.lt.s32.totalorder %s834_s5, %s6334_s2 }
  0xc5   : > { %p6331_p13 = pnand %p6330_p7, %p8912_p8  ;;  %p6337_p2 = scmp.lt.s32.totalorder %s6335_s1, %s6329_s26 }
  0xc7   : > { %p6332_p12 = pneg %p6331_p13  ;;  %p6338_p4 = por %p6337_p2, %p6336_p3 }
  0xc9   : > { %p6339_p0 = pnand %p6338_p4, %p6332_p12 }
  0xcb   : > { %6342 = shalt.err (!%p6339_p0)
}
  0xcc   : > { %s8913_s27 = scalar_lea.sflag [#allocation14], %s7449_s21  ;;  %s8914_s25 = sld [smem:[#allocation82_spill]] }
  0xcd   : > { %6010 = dma.hbm_to_vmem [thread:$0]  (%p8912_p8), %s7495_s29, 16, %s834_s5, %s8913_s27  }
  0xce   : > { %s864_s2 = scalar_lea.vmem [#allocation16], %s7461_s4 }
  0xcf   : > { %s871_s26 = sshll.u32 %s864_s2, 4  ;;  %s872_s26 = int_to_ptr.vmem [resolvable:$true] %s871_s26 }
  0xd2   : > { %s7521_s8 = scalar_lea.hbm %s8914_s25, %s7488_s22  ;;  %s6347_s29 = scalar_lea.hbm %s8914_s25, 32 }
  0xd3   : > { %s6343_s1 = scalar_lea.hbm %s7521_s8, 16  ;;  %p6348_p5 = scmp.lt.u32.totalorder %s7521_s8, %s8914_s25 }
  0xd4   : > { %p6344_p4 = scmp.ne.s32.totalorder %s7521_s8, %s6343_s1  ;;  %p6349_p10 = scmp.lt.u32.totalorder %s6347_s29, %s6343_s1 }
  0xd5   : > { %p6351_p6 = scmp.lt.u32.totalorder %s6343_s1, %s7521_s8 }
  0xd6   : > { %p6345_p1 = pnand %p6344_p4, %p8912_p8  ;;  %p6350_p9 = por %p6349_p10, %p6348_p5 }
  0xd8   : > { %p6346_p11 = pneg %p6345_p1  ;;  %p6352_p7 = por %p6351_p6, %p6350_p9 }
  0xda   : > { %p6353_p13 = pnand %p6352_p7, %p6346_p11 }
  0xdc   : > { %6356 = shalt.err (!%p6353_p13)
}
  0xdd   : > { %s6357_s18 = scalar_lea.vmem %s872_s26, 16  ;;  %s7087_s2 = smov [#allocation16]  }
  0xde   : > { %p6358_p12 = scmp.ne.s32.totalorder %s872_s26, %s6357_s18  ;;  %s6361_s16 = sshll.u32 %s7087_s2, 4  ;;  %s6362_s16 = int_to_ptr.vmem [resolvable:$false] %s6361_s16 }
  0xdf   : > { %s6363_s23 = scalar_lea.vmem %s6362_s16, 32  ;;  %p6364_p0 = scmp.lt.s32.totalorder %s872_s26, %s6362_s16 }
  0xe0   : > { %p6359_p3 = pnand %p6358_p12, %p8912_p8  ;;  %p6365_p4 = scmp.lt.s32.totalorder %s6363_s23, %s6357_s18 }
  0xe2   : > { %p6360_p2 = pneg %p6359_p3  ;;  %p6366_p1 = por %p6365_p4, %p6364_p0 }
  0xe4   : > { %p6367_p5 = pnand %p6366_p1, %p6360_p2 }
  0xe6   : > { %6370 = shalt.err (!%p6367_p5)
}
  0xe7   : > { %s8915_s1 = scalar_lea.sflag [#allocation17], %s7449_s21  ;;  %s8916_s27 = sld [smem:[#allocation84_spill]] }
  0xe8   : > { %6012 = dma.hbm_to_vmem [thread:$0]  (%p8912_p8), %s7521_s8, 16, %s872_s26, %s8915_s1  }
  0xe9   : > { %s902_s16 = scalar_lea.vmem [#allocation19], %s7461_s4  ;;  %s8848_s23 = scalar_lea.sflag [#allocation20], %s7449_s21 }
  0xea   : > { %s909_s18 = sshll.u32 %s902_s16, 4  ;;  %s910_s18 = int_to_ptr.vmem [resolvable:$true] %s909_s18 }
  0xed   : > { %s8917_s12 = smov %s8916_s27  ;;  %s7548_s2 = scalar_lea.hbm %s8916_s27, %s7488_s22 }
  0xee   : > { %s6371_s25 = scalar_lea.hbm %s7548_s2, 16  ;;  %s6375_s26 = scalar_lea.hbm %s8917_s12, 32 }
  0xef   : > { %p6372_p11 = scmp.ne.s32.totalorder %s7548_s2, %s6371_s25  ;;  %p6376_p6 = scmp.lt.u32.totalorder %s7548_s2, %s8917_s12 }
  0xf0   : > { %p6377_p7 = scmp.lt.u32.totalorder %s6375_s26, %s6371_s25  ;;  %p6379_p12 = scmp.lt.u32.totalorder %s6371_s25, %s7548_s2 }
  0xf1   : > { %p6373_p10 = pnand %p6372_p11, %p8912_p8 }
  0xf2   : > { %p6378_p13 = por %p6377_p7, %p6376_p6 }
  0xf3   : > { %p6374_p9 = pneg %p6373_p10 }
  0xf4   : > { %p6380_p3 = por %p6379_p12, %p6378_p13 }
  0xf6   : > { %p6381_p2 = pnand %p6380_p3, %p6374_p9 }
  0xf8   : > { %6384 = shalt.err (!%p6381_p2)
}
  0xf9   : > { %s6385_s29 = scalar_lea.vmem %s910_s18, 16  ;;  %s7088_s27 = smov [#allocation19]  }
  0xfa   : > { %p6386_p0 = scmp.ne.s32.totalorder %s910_s18, %s6385_s29  ;;  %s6389_s16 = sshll.u32 %s7088_s27, 4  ;;  %s6390_s16 = int_to_ptr.vmem [resolvable:$false] %s6389_s16 }
  0xfb   : > { %s6391_s3 = scalar_lea.vmem %s6390_s16, 32  ;;  %p6392_p5 = scmp.lt.s32.totalorder %s910_s18, %s6390_s16 }
  0xfc   : > { %p6387_p4 = pnand %p6386_p0, %p8912_p8  ;;  %p6393_p11 = scmp.lt.s32.totalorder %s6391_s3, %s6385_s29 }
  0xfe   : > { %p6388_p1 = pneg %p6387_p4  ;;  %p6394_p10 = por %p6393_p11, %p6392_p5 }
 0x100   : > { %p6395_p6 = pnand %p6394_p10, %p6388_p1 }
 0x102   : > { %6398 = shalt.err (!%p6395_p6)
}
 0x103   : > { %6014 = dma.hbm_to_vmem [thread:$0]  (%p8912_p8), %s7548_s2, 16, %s910_s18, %s8848_s23  }
 0x104   : > { %s8918_s9 = sld [smem:[#allocation86_spill]]  ;;  %s940_s1 = scalar_lea.vmem [#allocation22], %s7461_s4 }
 0x105   : > { %s947_s5 = sshll.u32 %s940_s1, 4  ;;  %s8849_s29 = scalar_lea.sflag [#allocation23], %s7449_s21  ;;  %s948_s5 = int_to_ptr.vmem [resolvable:$true] %s947_s5 }
 0x10a   : > { %s7575_s26 = scalar_lea.hbm %s8918_s9, %s7488_s22  ;;  %s6403_s18 = scalar_lea.hbm %s8918_s9, 32 }
 0x10b   : > { %s6399_s27 = scalar_lea.hbm %s7575_s26, 16  ;;  %p6404_p12 = scmp.lt.u32.totalorder %s7575_s26, %s8918_s9 }
 0x10c   : > { %p6400_p9 = scmp.ne.s32.totalorder %s7575_s26, %s6399_s27  ;;  %p6405_p3 = scmp.lt.u32.totalorder %s6403_s18, %s6399_s27 }
 0x10d   : > { %p6407_p0 = scmp.lt.u32.totalorder %s6399_s27, %s7575_s26 }
 0x10e   : > { %p6401_p7 = pnand %p6400_p9, %p8912_p8  ;;  %p6406_p2 = por %p6405_p3, %p6404_p12 }
 0x110   : > { %p6402_p13 = pneg %p6401_p7  ;;  %p6408_p4 = por %p6407_p0, %p6406_p2 }
 0x112   : > { %p6409_p1 = pnand %p6408_p4, %p6402_p13 }
 0x114   : > { %6412 = shalt.err (!%p6409_p1)
}
 0x115   : > { %s6413_s8 = scalar_lea.vmem %s948_s5, 16  ;;  %s7089_s1 = smov [#allocation22]  }
 0x116   : > { %p6414_p5 = scmp.ne.s32.totalorder %s948_s5, %s6413_s8  ;;  %s6417_s23 = sshll.u32 %s7089_s1, 4  ;;  %s6418_s23 = int_to_ptr.vmem [resolvable:$false] %s6417_s23 }
 0x117   : > { %s6419_s16 = scalar_lea.vmem %s6418_s23, 32  ;;  %p6420_p6 = scmp.lt.s32.totalorder %s948_s5, %s6418_s23 }
 0x118   : > { %p6415_p11 = pnand %p6414_p5, %p8912_p8  ;;  %p6421_p9 = scmp.lt.s32.totalorder %s6419_s16, %s6413_s8 }
 0x11a   : > { %p6416_p10 = pneg %p6415_p11  ;;  %p6422_p7 = por %p6421_p9, %p6420_p6 }
 0x11c   : > { %p6423_p3 = pnand %p6422_p7, %p6416_p10 }
 0x11e   : > { %6426 = shalt.err (!%p6423_p3)
}
 0x11f   : > { %6016 = dma.hbm_to_vmem [thread:$0]  (%p8912_p8), %s7575_s26, 16, %s948_s5, %s8849_s29  }
 0x120   : > { %s8919_s11 = sld [smem:[#allocation87_spill]]  ;;  %s978_s23 = scalar_lea.vmem [#allocation25], %s7461_s4 }
 0x121   : > { %s985_s3 = sshll.u32 %s978_s23, 4  ;;  %s8850_s25 = scalar_lea.sflag [#allocation26], %s7449_s21  ;;  %s986_s3 = int_to_ptr.vmem [resolvable:$true] %s985_s3 }
 0x126   : > { %s7602_s18 = scalar_lea.hbm %s8919_s11, %s7488_s22  ;;  %s6431_s5 = scalar_lea.hbm %s8919_s11, 32 }
 0x127   : > { %s6427_s8 = scalar_lea.hbm %s7602_s18, 16  ;;  %p6432_p0 = scmp.lt.u32.totalorder %s7602_s18, %s8919_s11 }
 0x128   : > { %p6428_p13 = scmp.ne.s32.totalorder %s7602_s18, %s6427_s8  ;;  %p6433_p4 = scmp.lt.u32.totalorder %s6431_s5, %s6427_s8 }
 0x129   : > { %p6435_p5 = scmp.lt.u32.totalorder %s6427_s8, %s7602_s18 }
 0x12a   : > { %p6429_p12 = pnand %p6428_p13, %p8912_p8  ;;  %p6434_p1 = por %p6433_p4, %p6432_p0 }
 0x12c   : > { %p6430_p2 = pneg %p6429_p12  ;;  %p6436_p11 = por %p6435_p5, %p6434_p1 }
 0x12e   : > { %p6437_p10 = pnand %p6436_p11, %p6430_p2 }
 0x130   : > { %6440 = shalt.err (!%p6437_p10)
}
 0x131   : > { %s6441_s2 = scalar_lea.vmem %s986_s3, 16  ;;  %s7090_s23 = smov [#allocation25]  }
 0x132   : > { %p6442_p6 = scmp.ne.s32.totalorder %s986_s3, %s6441_s2  ;;  %s6445_s29 = sshll.u32 %s7090_s23, 4  ;;  %s6446_s29 = int_to_ptr.vmem [resolvable:$false] %s6445_s29 }
 0x133   : > { %s6447_s1 = scalar_lea.vmem %s6446_s29, 32  ;;  %p6448_p3 = scmp.lt.s32.totalorder %s986_s3, %s6446_s29 }
 0x134   : > { %p6443_p9 = pnand %p6442_p6, %p8912_p8  ;;  %p6449_p13 = scmp.lt.s32.totalorder %s6447_s1, %s6441_s2 }
 0x136   : > { %p6444_p7 = pneg %p6443_p9  ;;  %p6450_p12 = por %p6449_p13, %p6448_p3 }
 0x138   : > { %p6451_p0 = pnand %p6450_p12, %p6444_p7 }
 0x13a   : > { %6454 = shalt.err (!%p6451_p0)
}
 0x13b   : > { %6018 = dma.hbm_to_vmem [thread:$0]  (%p8912_p8), %s7602_s18, 16, %s986_s3, %s8850_s25  }
 0x13c   : > { %s8920_s13 = sld [smem:[#allocation89_spill]]  ;;  %s1016_s29 = scalar_lea.vmem [#allocation28], %s7461_s4 }
 0x13d   : > { %s1023_s16 = sshll.u32 %s1016_s29, 4  ;;  %s8851_s27 = scalar_lea.sflag [#allocation29], %s7449_s21  ;;  %s1024_s16 = int_to_ptr.vmem [resolvable:$true] %s1023_s16 }
 0x142   : > { %s7629_s5 = scalar_lea.hbm %s8920_s13, %s7488_s22  ;;  %s6459_s3 = scalar_lea.hbm %s8920_s13, 32 }
 0x143   : > { %s6455_s2 = scalar_lea.hbm %s7629_s5, 16  ;;  %p6460_p5 = scmp.lt.u32.totalorder %s7629_s5, %s8920_s13 }
 0x144   : > { %p6456_p2 = scmp.ne.s32.totalorder %s7629_s5, %s6455_s2  ;;  %p6461_p11 = scmp.lt.u32.totalorder %s6459_s3, %s6455_s2 }
 0x145   : > { %p6463_p6 = scmp.lt.u32.totalorder %s6455_s2, %s7629_s5 }
 0x146   : > { %p6457_p4 = pnand %p6456_p2, %p8912_p8  ;;  %p6462_p10 = por %p6461_p11, %p6460_p5 }
 0x148   : > { %p6458_p1 = pneg %p6457_p4  ;;  %p6464_p9 = por %p6463_p6, %p6462_p10 }
 0x14a   : > { %p6465_p7 = pnand %p6464_p9, %p6458_p1 }
 0x14c   : > { %6468 = shalt.err (!%p6465_p7)
}
 0x14d   : > { %s6469_s26 = scalar_lea.vmem %s1024_s16, 16  ;;  %s7091_s29 = smov [#allocation28]  }
 0x14e   : > { %p6470_p3 = scmp.ne.s32.totalorder %s1024_s16, %s6469_s26  ;;  %s6473_s25 = sshll.u32 %s7091_s29, 4  ;;  %s6474_s25 = int_to_ptr.vmem [resolvable:$false] %s6473_s25 }
 0x14f   : > { %s6475_s23 = scalar_lea.vmem %s6474_s25, 32  ;;  %p6476_p0 = scmp.lt.s32.totalorder %s1024_s16, %s6474_s25 }
 0x150   : > { %p6471_p13 = pnand %p6470_p3, %p8912_p8  ;;  %p6477_p2 = scmp.lt.s32.totalorder %s6475_s23, %s6469_s26 }
 0x152   : > { %p6472_p12 = pneg %p6471_p13  ;;  %p6478_p4 = por %p6477_p2, %p6476_p0 }
 0x154   : > { %p6479_p5 = pnand %p6478_p4, %p6472_p12 }
 0x156   : > { %6482 = shalt.err (!%p6479_p5)
}
 0x157   : > { %6020 = dma.hbm_to_vmem [thread:$0]  (%p8912_p8), %s7629_s5, 16, %s1024_s16, %s8851_s27  }
 0x158   : > { %s8921_s15 = sld [smem:[#allocation91_spill]]  ;;  %s1054_s25 = scalar_lea.vmem [#allocation31], %s7461_s4 }
 0x159   : > { %s1061_s1 = sshll.u32 %s1054_s25, 4  ;;  %s8852_s8 = scalar_lea.sflag [#allocation32], %s7449_s21  ;;  %s1062_s1 = int_to_ptr.vmem [resolvable:$true] %s1061_s1 }
 0x15e   : > { %s7656_s3 = scalar_lea.hbm %s8921_s15, %s7488_s22  ;;  %s6487_s16 = scalar_lea.hbm %s8921_s15, 32 }
 0x15f   : > { %s6483_s26 = scalar_lea.hbm %s7656_s3, 16  ;;  %p6488_p6 = scmp.lt.u32.totalorder %s7656_s3, %s8921_s15 }
 0x160   : > { %p6484_p1 = scmp.ne.s32.totalorder %s7656_s3, %s6483_s26  ;;  %p6489_p9 = scmp.lt.u32.totalorder %s6487_s16, %s6483_s26 }
 0x161   : > { %p6491_p3 = scmp.lt.u32.totalorder %s6483_s26, %s7656_s3 }
 0x162   : > { %p6485_p11 = pnand %p6484_p1, %p8912_p8  ;;  %p6490_p7 = por %p6489_p9, %p6488_p6 }
 0x164   : > { %p6486_p10 = pneg %p6485_p11  ;;  %p6492_p13 = por %p6491_p3, %p6490_p7 }
 0x166   : > { %p6493_p12 = pnand %p6492_p13, %p6486_p10 }
 0x168   : > { %6496 = shalt.err (!%p6493_p12)
}
 0x169   : > { %s6497_s18 = scalar_lea.vmem %s1062_s1, 16  ;;  %s7092_s25 = smov [#allocation31]  }
 0x16a   : > { %p6498_p0 = scmp.ne.s32.totalorder %s1062_s1, %s6497_s18  ;;  %s6501_s27 = sshll.u32 %s7092_s25, 4  ;;  %s6502_s27 = int_to_ptr.vmem [resolvable:$false] %s6501_s27 }
 0x16b   : > { %s6503_s29 = scalar_lea.vmem %s6502_s27, 32  ;;  %p6504_p5 = scmp.lt.s32.totalorder %s1062_s1, %s6502_s27 }
 0x16c   : > { %p6499_p2 = pnand %p6498_p0, %p8912_p8  ;;  %p6505_p1 = scmp.lt.s32.totalorder %s6503_s29, %s6497_s18 }
 0x16e   : > { %p6500_p4 = pneg %p6499_p2  ;;  %p6506_p11 = por %p6505_p1, %p6504_p5 }
 0x170   : > { %p6507_p6 = pnand %p6506_p11, %p6500_p4 }
 0x172   : > { %6510 = shalt.err (!%p6507_p6)
}
 0x173   : > { %6022 = dma.hbm_to_vmem [thread:$0]  (%p8912_p8), %s7656_s3, 16, %s1062_s1, %s8852_s8  }
 0x174   : > { %s7683_s16 = scalar_lea.hbm %s8795_s17, %s7488_s22  ;;  %s1088_s27 = scalar_lea.vmem [#allocation34], %s7461_s4 }
 0x175   : > { %s1095_s23 = sshll.u32 %s1088_s27, 4  ;;  %s8853_s2 = scalar_lea.sflag [#allocation35], %s7449_s21  ;;  %s1096_s23 = int_to_ptr.vmem [resolvable:$true] %s1095_s23 }
 0x176   : > { %s6511_s18 = scalar_lea.hbm %s7683_s16, 16  ;;  %s6515_s1 = scalar_lea.hbm %s8795_s17, 32 }
 0x177   : > { %p6512_p10 = scmp.ne.s32.totalorder %s7683_s16, %s6511_s18  ;;  %p6516_p3 = scmp.lt.u32.totalorder %s7683_s16, %s8795_s17 }
 0x178   : > { %p6517_p13 = scmp.lt.u32.totalorder %s6515_s1, %s6511_s18  ;;  %p6519_p0 = scmp.lt.u32.totalorder %s6511_s18, %s7683_s16 }
 0x179   : > { %p6513_p9 = pnand %p6512_p10, %p8912_p8 }
 0x17a   : > { %p6518_p12 = por %p6517_p13, %p6516_p3 }
 0x17b   : > { %p6514_p7 = pneg %p6513_p9 }
 0x17c   : > { %p6520_p2 = por %p6519_p0, %p6518_p12 }
 0x17e   : > { %p6521_p4 = pnand %p6520_p2, %p6514_p7 }
 0x180   : > { %6524 = shalt.err (!%p6521_p4)
}
 0x181   : > { %s6525_s5 = scalar_lea.vmem %s1096_s23, 16  ;;  %s7093_s27 = smov [#allocation34]  }
 0x182   : > { %p6526_p5 = scmp.ne.s32.totalorder %s1096_s23, %s6525_s5  ;;  %s6529_s8 = sshll.u32 %s7093_s27, 4  ;;  %s6530_s8 = int_to_ptr.vmem [resolvable:$false] %s6529_s8 }
 0x183   : > { %s6531_s25 = scalar_lea.vmem %s6530_s8, 32  ;;  %p6532_p6 = scmp.lt.s32.totalorder %s1096_s23, %s6530_s8 }
 0x184   : > { %p6527_p1 = pnand %p6526_p5, %p8912_p8  ;;  %p6533_p10 = scmp.lt.s32.totalorder %s6531_s25, %s6525_s5 }
 0x186   : > { %p6528_p11 = pneg %p6527_p1  ;;  %p6534_p9 = por %p6533_p10, %p6532_p6 }
 0x188   : > { %p6535_p3 = pnand %p6534_p9, %p6528_p11 }
 0x18a   : > { %6538 = shalt.err (!%p6535_p3)
}
 0x18b   : > { %6024 = dma.hbm_to_vmem [thread:$0]  (%p8912_p8), %s7683_s16, 16, %s1096_s23, %s8853_s2  }
 0x18c   : > { %s7710_s1 = scalar_lea.hbm %s8797_s19, %s7488_s22  ;;  %s1122_s8 = scalar_lea.vmem [#allocation37], %s7461_s4 }
 0x18d   : > { %s1129_s29 = sshll.u32 %s1122_s8, 4  ;;  %s5630_s26 = sshll.u32 %s7446_s28, 3  ;;  %s7713_s29 = int_to_ptr.vmem [resolvable:$true] %s1129_s29 }
 0x18e   : > { %s8854_s5 = scalar_lea.sflag [#allocation38], %s7449_s21  ;;  %s6539_s27 = scalar_lea.hbm %s7710_s1, 16 }
 0x18f   : > { %p6540_p7 = scmp.ne.s32.totalorder %s7710_s1, %s6539_s27  ;;  %s6543_s25 = scalar_lea.hbm %s8797_s19, 32 }
 0x190   : > { %p6544_p0 = scmp.lt.u32.totalorder %s7710_s1, %s8797_s19  ;;  %p6545_p2 = scmp.lt.u32.totalorder %s6543_s25, %s6539_s27 }
 0x191   : > { %p6541_p13 = pnand %p6540_p7, %p8912_p8  ;;  %p6547_p5 = scmp.lt.u32.totalorder %s6539_s27, %s7710_s1 }
 0x192   : > { %p6546_p4 = por %p6545_p2, %p6544_p0 }
 0x193   : > { %p6542_p12 = pneg %p6541_p13 }
 0x194   : > { %p6548_p1 = por %p6547_p5, %p6546_p4 }
 0x196   : > { %p6549_p11 = pnand %p6548_p1, %p6542_p12 }
 0x198   : > { %6552 = shalt.err (!%p6549_p11)
}
 0x199   : > { %s6553_s8 = scalar_lea.vmem %s7713_s29, 16  ;;  %s7094_s16 = smov [#allocation37]  }
 0x19a   : > { %p6554_p6 = scmp.ne.s32.totalorder %s7713_s29, %s6553_s8  ;;  %s6557_s23 = sshll.u32 %s7094_s16, 4  ;;  %s6558_s23 = int_to_ptr.vmem [resolvable:$false] %s6557_s23 }
 0x19b   : > { %s6559_s18 = scalar_lea.vmem %s6558_s23, 32  ;;  %p6560_p3 = scmp.lt.s32.totalorder %s7713_s29, %s6558_s23 }
 0x19c   : > { %p6555_p10 = pnand %p6554_p6, %p8912_p8  ;;  %p6561_p7 = scmp.lt.s32.totalorder %s6559_s18, %s6553_s8 }
 0x19e   : > { %p6556_p9 = pneg %p6555_p10  ;;  %p6562_p13 = por %p6561_p7, %p6560_p3 }
 0x1a0   : > { %p6563_p0 = pnand %p6562_p13, %p6556_p9 }
 0x1a2   : > { %6566 = shalt.err (!%p6563_p0)
}
 0x1a3   : > { %6026 = dma.hbm_to_vmem [thread:$0]  (%p8912_p8), %s7710_s1, 16, %s7713_s29, %s8854_s5  }
 0x1a4   : > { %s5631_s27 = sshll.u32 %s7077_s30, 7  ;;  %s8922_s16 = sld [smem:[#allocation77_spill]] }
 0x1a5   : > { %s770_s23 = scalar_lea.vmem [#allocation7], %s5630_s26  ;;  %s7751_s2 = sshll.u32 %s7461_s4, 4 }
 0x1a6   : > { %s777_s18 = sshll.u32 %s770_s23, 4  ;;  %s767_s9 = scalar_lea.sflag [#allocation8], %s7446_s28  ;;  %s7748_s18 = int_to_ptr.vmem [resolvable:$true] %s777_s18 }
 0x1a7   : > { %p8923_p2 = scmp.ne.s32.totalorder %s8891_s0, 0 }
 0x1aa   : > { %s7744_s8 = scalar_lea.hbm %s8922_s16, %s5631_s27  ;;  %s6571_s27 = scalar_lea.hbm %s8922_s16, 256 }
 0x1ab   : > { %s6567_s11 = scalar_lea.hbm %s7744_s8, 128  ;;  %p6572_p1 = scmp.lt.u32.totalorder %s7744_s8, %s8922_s16 }
 0x1ac   : > { %p6568_p12 = scmp.ne.s32.totalorder %s7744_s8, %s6567_s11  ;;  %p6573_p11 = scmp.lt.u32.totalorder %s6571_s27, %s6567_s11 }
 0x1ad   : > { %p6575_p10 = scmp.lt.u32.totalorder %s6567_s11, %s7744_s8 }
 0x1ae   : > { %p6569_p4 = pnand %p6568_p12, %p8923_p2  ;;  %p6574_p6 = por %p6573_p11, %p6572_p1 }
 0x1b0   : > { %p6570_p5 = pneg %p6569_p4  ;;  %p6576_p9 = por %p6575_p10, %p6574_p6 }
 0x1b2   : > { %p6577_p3 = pnand %p6576_p9, %p6570_p5 }
 0x1b4   : > { %6580 = shalt.err (!%p6577_p3)
}
 0x1b5   : > { %s6581_s28 = scalar_lea.vmem %s7748_s18, 128  ;;  %s7095_s26 = smov [#allocation7]  }
 0x1b6   : > { %p6582_p7 = scmp.ne.s32.totalorder %s7748_s18, %s6581_s28  ;;  %s6585_s23 = sshll.u32 %s7095_s26, 4  ;;  %s6586_s23 = int_to_ptr.vmem [resolvable:$false] %s6585_s23 }
 0x1b7   : > { %s6587_s1 = scalar_lea.vmem %s6586_s23, 256  ;;  %p6588_p12 = scmp.lt.s32.totalorder %s7748_s18, %s6586_s23 }
 0x1b8   : > { %p6583_p13 = pnand %p6582_p7, %p8923_p2  ;;  %p6589_p4 = scmp.lt.s32.totalorder %s6587_s1, %s6581_s28 }
 0x1ba   : > { %p6584_p0 = pneg %p6583_p13  ;;  %p6590_p1 = por %p6589_p4, %p6588_p12 }
 0x1bc   : > { %p6591_p11 = pnand %p6590_p1, %p6584_p0 }
 0x1be   : > { %6594 = shalt.err (!%p6591_p11)
}
 0x1bf   : > { %6007 = dma.hbm_to_vmem [thread:$0]  (%p8923_p2), %s7744_s8, 128, %s7748_s18, %s767_s9  }
 0x1c0   : > { %s7776_s11 = sshll.u32 %s7073_s7, 8  ;;  %s8924_s25 = sld [smem:[#allocation79_spill]] }
 0x1c1   : > { %s806_s28 = scalar_lea.vmem [#allocation12], %s7751_s2 }
 0x1c2   : > { %s813_s0 = sshll.u32 %s806_s28, 4  ;;  %s7785_s0 = int_to_ptr.vmem [resolvable:$true] %s813_s0 }
 0x1c6   : > { %s7782_s3 = scalar_lea.hbm %s8924_s25, %s7776_s11  ;;  %s6599_s18 = scalar_lea.hbm %s8924_s25, 512 }
 0x1c7   : > { %s6595_s26 = scalar_lea.hbm %s7782_s3, 256  ;;  %p6600_p10 = scmp.lt.u32.totalorder %s7782_s3, %s8924_s25 }
 0x1c8   : > { %p6596_p5 = scmp.ne.s32.totalorder %s7782_s3, %s6595_s26  ;;  %p6601_p9 = scmp.lt.u32.totalorder %s6599_s18, %s6595_s26 }
 0x1c9   : > { %p6603_p7 = scmp.lt.u32.totalorder %s6595_s26, %s7782_s3 }
 0x1ca   : > { %p6597_p2 = pnand %p6596_p5, %p8912_p8  ;;  %p6602_p3 = por %p6601_p9, %p6600_p10 }
 0x1cc   : > { %p6598_p6 = pneg %p6597_p2  ;;  %p6604_p13 = por %p6603_p7, %p6602_p3 }
 0x1ce   : > { %p6605_p0 = pnand %p6604_p13, %p6598_p6 }
 0x1d0   : > { %6608 = shalt.err (!%p6605_p0)
}
 0x1d1   : > { %s6609_s29 = scalar_lea.vmem %s7785_s0, 256  ;;  %s7096_s27 = smov [#allocation12]  }
 0x1d2   : > { %p6610_p12 = scmp.ne.s32.totalorder %s7785_s0, %s6609_s29  ;;  %s6613_s28 = sshll.u32 %s7096_s27, 4  ;;  %s6614_s28 = int_to_ptr.vmem [resolvable:$false] %s6613_s28 }
 0x1d3   : > { %s6615_s9 = scalar_lea.vmem %s6614_s28, 512  ;;  %p6616_p11 = scmp.lt.s32.totalorder %s7785_s0, %s6614_s28 }
 0x1d4   : > { %p6611_p4 = pnand %p6610_p12, %p8912_p8  ;;  %p6617_p5 = scmp.lt.s32.totalorder %s6615_s9, %s6609_s29 }
 0x1d6   : > { %p6612_p1 = pneg %p6611_p4  ;;  %p6618_p2 = por %p6617_p5, %p6616_p11 }
 0x1d8   : > { %p6619_p10 = pnand %p6618_p2, %p6612_p1 }
 0x1da   : > { %6622 = shalt.err (!%p6619_p10)
}
 0x1db   : > { %s7097_s26 = smov 64   ;;  %s7098_s8 = smov 4  }
 0x1dc   : > { %s8925_s18 = scalar_lea.sflag [#allocation11], %s7449_s21  ;;  %s8926_s29 = sld [smem:[#allocation81_spill]] }
 0x1dd   : > { %6009 = dma.hbm_to_vmem [thread:$0]  (%p8912_p8), %s7782_s3, 256, %s7785_s0, %s8925_s18, %s7097_s26, %s7097_s26, %s7098_s8  }
 0x1de   : > { %s844_s28 = scalar_lea.vmem [#allocation15], %s7751_s2 }
 0x1df   : > { %s851_s5 = sshll.u32 %s844_s28, 4  ;;  %s7820_s5 = int_to_ptr.vmem [resolvable:$true] %s851_s5 }
 0x1e2   : > { %s8927_s9 = smov %s8926_s29  ;;  %s7817_s27 = scalar_lea.hbm %s8926_s29, %s7776_s11 }
 0x1e3   : > { %s6623_s12 = scalar_lea.hbm %s7817_s27, 256  ;;  %s6627_s0 = scalar_lea.hbm %s8927_s9, 512 }
 0x1e4   : > { %p6624_p6 = scmp.ne.s32.totalorder %s7817_s27, %s6623_s12  ;;  %p6628_p7 = scmp.lt.u32.totalorder %s7817_s27, %s8927_s9 }
 0x1e5   : > { %p6629_p13 = scmp.lt.u32.totalorder %s6627_s0, %s6623_s12  ;;  %p6631_p12 = scmp.lt.u32.totalorder %s6623_s12, %s7817_s27 }
 0x1e6   : > { %p6625_p9 = pnand %p6624_p6, %p8912_p8 }
 0x1e7   : > { %p6630_p0 = por %p6629_p13, %p6628_p7 }
 0x1e8   : > { %p6626_p3 = pneg %p6625_p9 }
 0x1e9   : > { %p6632_p4 = por %p6631_p12, %p6630_p0 }
 0x1eb   : > { %p6633_p1 = pnand %p6632_p4, %p6626_p3 }
 0x1ed   : > { %6636 = shalt.err (!%p6633_p1)
}
 0x1ee   : > { %s6637_s1 = scalar_lea.vmem %s7820_s5, 256  ;;  %s7099_s13 = smov [#allocation15]  }
 0x1ef   : > { %p6638_p11 = scmp.ne.s32.totalorder %s7820_s5, %s6637_s1  ;;  %s6641_s29 = sshll.u32 %s7099_s13, 4  ;;  %s6642_s29 = int_to_ptr.vmem [resolvable:$false] %s6641_s29 }
 0x1f0   : > { %s6643_s28 = scalar_lea.vmem %s6642_s29, 512  ;;  %p6644_p10 = scmp.lt.s32.totalorder %s7820_s5, %s6642_s29 }
 0x1f1   : > { %p6639_p5 = pnand %p6638_p11, %p8912_p8  ;;  %p6645_p6 = scmp.lt.s32.totalorder %s6643_s28, %s6637_s1 }
 0x1f3   : > { %p6640_p2 = pneg %p6639_p5  ;;  %p6646_p9 = por %p6645_p6, %p6644_p10 }
 0x1f5   : > { %p6647_p7 = pnand %p6646_p9, %p6640_p2 }
 0x1f7   : > { %6650 = shalt.err (!%p6647_p7)
}
 0x1f8   : > { %s8928_s12 = scalar_lea.sflag [#allocation14], %s7449_s21  ;;  %s8929_s18 = sld [smem:[#allocation83_spill]] }
 0x1f9   : > { %6011 = dma.hbm_to_vmem [thread:$0]  (%p8912_p8), %s7817_s27, 256, %s7820_s5, %s8928_s12, %s7097_s26, %s7097_s26, %s7098_s8  }
 0x1fa   : > { %s882_s1 = scalar_lea.vmem [#allocation18], %s7751_s2 }
 0x1fb   : > { %s889_s13 = sshll.u32 %s882_s1, 4  ;;  %s7855_s13 = int_to_ptr.vmem [resolvable:$true] %s889_s13 }
 0x1fe   : > { %s7852_s23 = scalar_lea.hbm %s8929_s18, %s7776_s11  ;;  %s6655_s27 = scalar_lea.hbm %s8929_s18, 512 }
 0x1ff   : > { %s6651_s29 = scalar_lea.hbm %s7852_s23, 256  ;;  %p6656_p12 = scmp.lt.u32.totalorder %s7852_s23, %s8929_s18 }
 0x200   : > { %p6652_p3 = scmp.ne.s32.totalorder %s7852_s23, %s6651_s29  ;;  %p6657_p4 = scmp.lt.u32.totalorder %s6655_s27, %s6651_s29 }
 0x201   : > { %p6659_p11 = scmp.lt.u32.totalorder %s6651_s29, %s7852_s23 }
 0x202   : > { %p6653_p13 = pnand %p6652_p3, %p8912_p8  ;;  %p6658_p1 = por %p6657_p4, %p6656_p12 }
 0x204   : > { %p6654_p0 = pneg %p6653_p13  ;;  %p6660_p5 = por %p6659_p11, %p6658_p1 }
 0x206   : > { %p6661_p2 = pnand %p6660_p5, %p6654_p0 }
 0x208   : > { %6664 = shalt.err (!%p6661_p2)
}
 0x209   : > { %s6665_s0 = scalar_lea.vmem %s7855_s13, 256  ;;  %s7100_s1 = smov [#allocation18]  }
 0x20a   : > { %p6666_p10 = scmp.ne.s32.totalorder %s7855_s13, %s6665_s0  ;;  %s6669_s28 = sshll.u32 %s7100_s1, 4  ;;  %s6670_s28 = int_to_ptr.vmem [resolvable:$false] %s6669_s28 }
 0x20b   : > { %s6671_s5 = scalar_lea.vmem %s6670_s28, 512  ;;  %p6672_p7 = scmp.lt.s32.totalorder %s7855_s13, %s6670_s28 }
 0x20c   : > { %p6667_p6 = pnand %p6666_p10, %p8912_p8  ;;  %p6673_p3 = scmp.lt.s32.totalorder %s6671_s5, %s6665_s0 }
 0x20e   : > { %p6668_p9 = pneg %p6667_p6  ;;  %p6674_p13 = por %p6673_p3, %p6672_p7 }
 0x210   : > { %p6675_p12 = pnand %p6674_p13, %p6668_p9 }
 0x212   : > { %6678 = shalt.err (!%p6675_p12)
}
 0x213   : > { %s8930_s29 = scalar_lea.sflag [#allocation17], %s7449_s21  ;;  %s8931_s3 = sld [smem:[#allocation85_spill]] }
 0x214   : > { %6013 = dma.hbm_to_vmem [thread:$0]  (%p8912_p8), %s7852_s23, 256, %s7855_s13, %s8930_s29, %s7097_s26, %s7097_s26, %s7098_s8  }
 0x215   : > { %s920_s28 = scalar_lea.vmem [#allocation21], %s7751_s2 }
 0x216   : > { %s927_s5 = sshll.u32 %s920_s28, 4  ;;  %s7890_s5 = int_to_ptr.vmem [resolvable:$true] %s927_s5 }
 0x219   : > { %s8932_s1 = smov %s8931_s3  ;;  %s7887_s0 = scalar_lea.hbm %s8931_s3, %s7776_s11 }
 0x21a   : > { %s6679_s9 = scalar_lea.hbm %s7887_s0, 256  ;;  %s6683_s13 = scalar_lea.hbm %s8932_s1, 512 }
 0x21b   : > { %p6680_p0 = scmp.ne.s32.totalorder %s7887_s0, %s6679_s9  ;;  %p6684_p11 = scmp.lt.u32.totalorder %s7887_s0, %s8932_s1 }
 0x21c   : > { %p6685_p5 = scmp.lt.u32.totalorder %s6683_s13, %s6679_s9  ;;  %p6687_p10 = scmp.lt.u32.totalorder %s6679_s9, %s7887_s0 }
 0x21d   : > { %p6681_p4 = pnand %p6680_p0, %p8912_p8 }
 0x21e   : > { %p6686_p2 = por %p6685_p5, %p6684_p11 }
 0x21f   : > { %p6682_p1 = pneg %p6681_p4 }
 0x220   : > { %p6688_p6 = por %p6687_p10, %p6686_p2 }
 0x222   : > { %p6689_p9 = pnand %p6688_p6, %p6682_p1 }
 0x224   : > { %6692 = shalt.err (!%p6689_p9)
}
 0x225   : > { %s6693_s12 = scalar_lea.vmem %s7890_s5, 256  ;;  %s7101_s15 = smov [#allocation21]  }
 0x226   : > { %p6694_p7 = scmp.ne.s32.totalorder %s7890_s5, %s6693_s12  ;;  %s6697_s3 = sshll.u32 %s7101_s15, 4  ;;  %s6698_s3 = int_to_ptr.vmem [resolvable:$false] %s6697_s3 }
 0x227   : > { %s6699_s28 = scalar_lea.vmem %s6698_s3, 512  ;;  %p6700_p12 = scmp.lt.s32.totalorder %s7890_s5, %s6698_s3 }
 0x228   : > { %p6695_p3 = pnand %p6694_p7, %p8912_p8  ;;  %p6701_p0 = scmp.lt.s32.totalorder %s6699_s28, %s6693_s12 }
 0x22a   : > { %p6696_p13 = pneg %p6695_p3  ;;  %p6702_p4 = por %p6701_p0, %p6700_p12 }
 0x22c   : > { %p6703_p11 = pnand %p6702_p4, %p6696_p13 }
 0x22e   : > { %6706 = shalt.err (!%p6703_p11)
}
 0x22f   : > { %s8933_s9 = scalar_lea.sflag [#allocation20], %s7449_s21  ;;  %s7922_s29 = scalar_lea.hbm %s8788_s10, %s7776_s11 }
 0x230   : > { %6015 = dma.hbm_to_vmem [thread:$0]  (%p8912_p8), %s7887_s0, 256, %s7890_s5, %s8933_s9, %s7097_s26, %s7097_s26, %s7098_s8  }
 0x231   : > { %s958_s27 = scalar_lea.vmem [#allocation24], %s7751_s2  ;;  %s6707_s15 = scalar_lea.hbm %s7922_s29, 256 }
 0x232   : > { %s965_s12 = sshll.u32 %s958_s27, 4  ;;  %p6708_p1 = scmp.ne.s32.totalorder %s7922_s29, %s6707_s15  ;;  %s7925_s12 = int_to_ptr.vmem [resolvable:$true] %s965_s12 }
 0x233   : > { %s6711_s5 = scalar_lea.hbm %s8788_s10, 512  ;;  %p6712_p10 = scmp.lt.u32.totalorder %s7922_s29, %s8788_s10 }
 0x234   : > { %p6709_p5 = pnand %p6708_p1, %p8912_p8  ;;  %p6713_p6 = scmp.lt.u32.totalorder %s6711_s5, %s6707_s15 }
 0x235   : > { %p6715_p7 = scmp.lt.u32.totalorder %s6707_s15, %s7922_s29 }
 0x236   : > { %p6710_p2 = pneg %p6709_p5  ;;  %p6714_p9 = por %p6713_p6, %p6712_p10 }
 0x238   : > { %p6716_p3 = por %p6715_p7, %p6714_p9 }
 0x23a   : > { %p6717_p13 = pnand %p6716_p3, %p6710_p2 }
 0x23c   : > { %6720 = shalt.err (!%p6717_p13)
}
 0x23d   : > { %s6721_s23 = scalar_lea.vmem %s7925_s12, 256  ;;  %s7102_s13 = smov [#allocation24]  }
 0x23e   : > { %p6722_p12 = scmp.ne.s32.totalorder %s7925_s12, %s6721_s23  ;;  %s6725_s27 = sshll.u32 %s7102_s13, 4  ;;  %s6726_s27 = int_to_ptr.vmem [resolvable:$false] %s6725_s27 }
 0x23f   : > { %s6727_s3 = scalar_lea.vmem %s6726_s27, 512  ;;  %p6728_p11 = scmp.lt.s32.totalorder %s7925_s12, %s6726_s27 }
 0x240   : > { %p6723_p0 = pnand %p6722_p12, %p8912_p8  ;;  %p6729_p1 = scmp.lt.s32.totalorder %s6727_s3, %s6721_s23 }
 0x242   : > { %p6724_p4 = pneg %p6723_p0  ;;  %p6730_p5 = por %p6729_p1, %p6728_p11 }
 0x244   : > { %p6731_p10 = pnand %p6730_p5, %p6724_p4 }
 0x246   : > { %6734 = shalt.err (!%p6731_p10)
}
 0x247   : > { %s8934_s15 = scalar_lea.sflag [#allocation23], %s7449_s21  ;;  %s8935_s28 = sld [smem:[#allocation88_spill]] }
 0x248   : > { %6017 = dma.hbm_to_vmem [thread:$0]  (%p8912_p8), %s7922_s29, 256, %s7925_s12, %s8934_s15, %s7097_s26, %s7097_s26, %s7098_s8  }
 0x249   : > { %s996_s13 = scalar_lea.vmem [#allocation27], %s7751_s2  ;;  %s5658_s3 = sshll.u32 %s7461_s4, 5 }
 0x24a   : > { %s1003_s27 = sshll.u32 %s996_s13, 4  ;;  %s7960_s27 = int_to_ptr.vmem [resolvable:$true] %s1003_s27 }
 0x24d   : > { %s8936_s9 = smov %s8935_s28  ;;  %s7957_s23 = scalar_lea.hbm %s8935_s28, %s7776_s11 }
 0x24e   : > { %s6735_s1 = scalar_lea.hbm %s7957_s23, 256  ;;  %s6739_s15 = scalar_lea.hbm %s8936_s9, 512 }
 0x24f   : > { %p6736_p2 = scmp.ne.s32.totalorder %s7957_s23, %s6735_s1  ;;  %p6740_p7 = scmp.lt.u32.totalorder %s7957_s23, %s8936_s9 }
 0x250   : > { %p6741_p3 = scmp.lt.u32.totalorder %s6739_s15, %s6735_s1  ;;  %p6743_p12 = scmp.lt.u32.totalorder %s6735_s1, %s7957_s23 }
 0x251   : > { %p6737_p6 = pnand %p6736_p2, %p8912_p8 }
 0x252   : > { %p6742_p13 = por %p6741_p3, %p6740_p7 }
 0x253   : > { %p6738_p9 = pneg %p6737_p6 }
 0x254   : > { %p6744_p0 = por %p6743_p12, %p6742_p13 }
 0x256   : > { %p6745_p4 = pnand %p6744_p0, %p6738_p9 }
 0x258   : > { %6748 = shalt.err (!%p6745_p4)
}
 0x259   : > { %s6749_s2 = scalar_lea.vmem %s7960_s27, 256  ;;  %s7103_s5 = smov [#allocation27]  }
 0x25a   : > { %p6750_p11 = scmp.ne.s32.totalorder %s7960_s27, %s6749_s2  ;;  %s6753_s28 = sshll.u32 %s7103_s5, 4  ;;  %s6754_s28 = int_to_ptr.vmem [resolvable:$false] %s6753_s28 }
 0x25b   : > { %s6755_s13 = scalar_lea.vmem %s6754_s28, 512  ;;  %p6756_p10 = scmp.lt.s32.totalorder %s7960_s27, %s6754_s28 }
 0x25c   : > { %p6751_p1 = pnand %p6750_p11, %p8912_p8  ;;  %p6757_p2 = scmp.lt.s32.totalorder %s6755_s13, %s6749_s2 }
 0x25e   : > { %p6752_p5 = pneg %p6751_p1  ;;  %p6758_p6 = por %p6757_p2, %p6756_p10 }
 0x260   : > { %p6759_p7 = pnand %p6758_p6, %p6752_p5 }
 0x262   : > { %6762 = shalt.err (!%p6759_p7)
}
 0x263   : > { %s8937_s1 = scalar_lea.sflag [#allocation26], %s7449_s21  ;;  %s5771_s29 = sshll.u32 %s7073_s7, 9 }
 0x264   : > { %6019 = dma.hbm_to_vmem [thread:$0]  (%p8912_p8), %s7957_s23, 256, %s7960_s27, %s8937_s1, %s7097_s26, %s7097_s26, %s7098_s8  }
 0x265   : > { %s8938_s11 = sld [smem:[#allocation90_spill]]  ;;  %s1034_s2 = scalar_lea.vmem [#allocation30], %s5658_s3 }
 0x266   : > { %s1041_s5 = sshll.u32 %s1034_s2, 4  ;;  %s7997_s5 = int_to_ptr.vmem [resolvable:$true] %s1041_s5 }
 0x26b   : > { %s7993_s0 = scalar_lea.hbm %s8938_s11, %s5771_s29  ;;  %s6767_s13 = scalar_lea.hbm %s8938_s11, 1024 }
 0x26c   : > { %s6763_s28 = scalar_lea.hbm %s7993_s0, 512  ;;  %p6768_p12 = scmp.lt.u32.totalorder %s7993_s0, %s8938_s11 }
 0x26d   : > { %p6764_p9 = scmp.ne.s32.totalorder %s7993_s0, %s6763_s28  ;;  %p6769_p0 = scmp.lt.u32.totalorder %s6767_s13, %s6763_s28 }
 0x26e   : > { %p6771_p11 = scmp.lt.u32.totalorder %s6763_s28, %s7993_s0 }
 0x26f   : > { %p6765_p3 = pnand %p6764_p9, %p8912_p8  ;;  %p6770_p4 = por %p6769_p0, %p6768_p12 }
 0x271   : > { %p6766_p13 = pneg %p6765_p3  ;;  %p6772_p1 = por %p6771_p11, %p6770_p4 }
 0x273   : > { %p6773_p5 = pnand %p6772_p1, %p6766_p13 }
 0x275   : > { %6776 = shalt.err (!%p6773_p5)
}
 0x276   : > { %s6777_s3 = scalar_lea.vmem %s7997_s5, 512  ;;  %s7104_s12 = smov [#allocation30]  }
 0x277   : > { %p6778_p10 = scmp.ne.s32.totalorder %s7997_s5, %s6777_s3  ;;  %s6781_s15 = sshll.u32 %s7104_s12, 4  ;;  %s6782_s15 = int_to_ptr.vmem [resolvable:$false] %s6781_s15 }
 0x278   : > { %s6783_s2 = scalar_lea.vmem %s6782_s15, 1024  ;;  %p6784_p7 = scmp.lt.s32.totalorder %s7997_s5, %s6782_s15 }
 0x279   : > { %p6779_p2 = pnand %p6778_p10, %p8912_p8  ;;  %p6785_p9 = scmp.lt.s32.totalorder %s6783_s2, %s6777_s3 }
 0x27b   : > { %p6780_p6 = pneg %p6779_p2  ;;  %p6786_p3 = por %p6785_p9, %p6784_p7 }
 0x27d   : > { %p6787_p12 = pnand %p6786_p3, %p6780_p6 }
 0x27f   : > { %6790 = shalt.err (!%p6787_p12)
}
 0x280   : > { %s8939_s28 = scalar_lea.sflag [#allocation29], %s7449_s21  ;;  %s8940_s13 = sld [smem:[#allocation92_spill]] }
 0x281   : > { %6021 = dma.hbm_to_vmem [thread:$0]  (%p8912_p8), %s7993_s0, 512, %s7997_s5, %s8939_s28, %s7097_s26, %s7097_s26, %s7098_s8  }
 0x282   : > { %s1071_s29 = scalar_lea.vmem [#allocation33], %s7461_s4 }
 0x283   : > { %s1078_s3 = sshll.u32 %s1071_s29, 4  ;;  %s1079_s3 = int_to_ptr.vmem [resolvable:$true] %s1078_s3 }
 0x286   : > { %s8029_s1 = scalar_lea.hbm %s8940_s13, %s7488_s22  ;;  %s6795_s26 = scalar_lea.hbm %s8940_s13, 32 }
 0x287   : > { %s6791_s12 = scalar_lea.hbm %s8029_s1, 16  ;;  %p6796_p11 = scmp.lt.u32.totalorder %s8029_s1, %s8940_s13 }
 0x288   : > { %p6792_p13 = scmp.ne.s32.totalorder %s8029_s1, %s6791_s12  ;;  %p6797_p1 = scmp.lt.u32.totalorder %s6795_s26, %s6791_s12 }
 0x289   : > { %p6799_p10 = scmp.lt.u32.totalorder %s6791_s12, %s8029_s1 }
 0x28a   : > { %p6793_p0 = pnand %p6792_p13, %p8912_p8  ;;  %p6798_p5 = por %p6797_p1, %p6796_p11 }
 0x28c   : > { %p6794_p4 = pneg %p6793_p0  ;;  %p6800_p2 = por %p6799_p10, %p6798_p5 }
 0x28e   : > { %p6801_p6 = pnand %p6800_p2, %p6794_p4 }
 0x290   : > { %6804 = shalt.err (!%p6801_p6)
}
 0x291   : > { %s6805_s5 = scalar_lea.vmem %s1079_s3, 16  ;;  %s7105_s28 = smov [#allocation33]  }
 0x292   : > { %p6806_p7 = scmp.ne.s32.totalorder %s1079_s3, %s6805_s5  ;;  %s6809_s23 = sshll.u32 %s7105_s28, 4  ;;  %s6810_s23 = int_to_ptr.vmem [resolvable:$false] %s6809_s23 }
 0x293   : > { %s6811_s27 = scalar_lea.vmem %s6810_s23, 32  ;;  %p6812_p12 = scmp.lt.s32.totalorder %s1079_s3, %s6810_s23 }
 0x294   : > { %p6807_p9 = pnand %p6806_p7, %p8912_p8  ;;  %p6813_p13 = scmp.lt.s32.totalorder %s6811_s27, %s6805_s5 }
 0x296   : > { %p6808_p3 = pneg %p6807_p9  ;;  %p6814_p0 = por %p6813_p13, %p6812_p12 }
 0x298   : > { %p6815_p1 = pnand %p6814_p0, %p6808_p3 }
 0x29a   : > { %6818 = shalt.err (!%p6815_p1)
}
 0x29b   : > { %s8941_s29 = scalar_lea.sflag [#allocation32], %s7449_s21  ;;  %s8942_s2 = sld [smem:[#allocation93_spill]] }
 0x29c   : > { %6023 = dma.hbm_to_vmem [thread:$0]  (%p8912_p8), %s8029_s1, 16, %s1079_s3, %s8941_s29  }
 0x29d   : > { %s1105_s0 = scalar_lea.vmem [#allocation36], %s7461_s4 }
 0x29e   : > { %s1112_s5 = sshll.u32 %s1105_s0, 4  ;;  %s1113_s5 = int_to_ptr.vmem [resolvable:$true] %s1112_s5 }
 0x2a1   : > { %s8943_s8 = smov %s8942_s2  ;;  %s8055_s26 = scalar_lea.hbm %s8942_s2, %s7488_s22 }
 0x2a2   : > { %s6819_s28 = scalar_lea.hbm %s8055_s26, 16  ;;  %s6823_s1 = scalar_lea.hbm %s8943_s8, 32 }
 0x2a3   : > { %p6820_p4 = scmp.ne.s32.totalorder %s8055_s26, %s6819_s28  ;;  %p6824_p10 = scmp.lt.u32.totalorder %s8055_s26, %s8943_s8 }
 0x2a4   : > { %p6825_p2 = scmp.lt.u32.totalorder %s6823_s1, %s6819_s28  ;;  %p6827_p7 = scmp.lt.u32.totalorder %s6819_s28, %s8055_s26 }
 0x2a5   : > { %p6821_p11 = pnand %p6820_p4, %p8912_p8 }
 0x2a6   : > { %p6826_p6 = por %p6825_p2, %p6824_p10 }
 0x2a7   : > { %p6822_p5 = pneg %p6821_p11 }
 0x2a8   : > { %p6828_p9 = por %p6827_p7, %p6826_p6 }
 0x2aa   : > { %p6829_p3 = pnand %p6828_p9, %p6822_p5 }
 0x2ac   : > { %6832 = shalt.err (!%p6829_p3)
}
 0x2ad   : > { %s6833_s12 = scalar_lea.vmem %s1113_s5, 16  ;;  %s7106_s15 = smov [#allocation36]  }
 0x2ae   : > { %p6834_p12 = scmp.ne.s32.totalorder %s1113_s5, %s6833_s12  ;;  %s6837_s2 = sshll.u32 %s7106_s15, 4  ;;  %s6838_s2 = int_to_ptr.vmem [resolvable:$false] %s6837_s2 }
 0x2af   : > { %s6839_s0 = scalar_lea.vmem %s6838_s2, 32  ;;  %p6840_p1 = scmp.lt.s32.totalorder %s1113_s5, %s6838_s2 }
 0x2b0   : > { %p6835_p13 = pnand %p6834_p12, %p8912_p8  ;;  %p6841_p4 = scmp.lt.s32.totalorder %s6839_s0, %s6833_s12 }
 0x2b2   : > { %p6836_p0 = pneg %p6835_p13  ;;  %p6842_p11 = por %p6841_p4, %p6840_p1 }
 0x2b4   : > { %p6843_p2 = pnand %p6842_p11, %p6836_p0 }
 0x2b6   : > { %6846 = shalt.err (!%p6843_p2)
}
 0x2b7   : > { %s8944_s28 = scalar_lea.sflag [#allocation35], %s7449_s21  ;;  %s8945_s1 = sld [smem:[#allocation94_spill]] }
 0x2b8   : > { %6025 = dma.hbm_to_vmem [thread:$0]  (%p8912_p8), %s8055_s26, 16, %s1113_s5, %s8944_s28  }
 0x2b9   : > { %s1139_s29 = scalar_lea.vmem [#allocation39], %s7461_s4 }
 0x2ba   : > { %s1146_s12 = sshll.u32 %s1139_s29, 4  ;;  %s1147_s12 = int_to_ptr.vmem [resolvable:$true] %s1146_s12 }
 0x2bd   : > { %s8081_s3 = scalar_lea.hbm %s8945_s1, %s7488_s22  ;;  %s6851_s26 = scalar_lea.hbm %s8945_s1, 32 }
 0x2be   : > { %s6847_s15 = scalar_lea.hbm %s8081_s3, 16  ;;  %p6852_p7 = scmp.lt.u32.totalorder %s8081_s3, %s8945_s1 }
 0x2bf   : > { %p6848_p5 = scmp.ne.s32.totalorder %s8081_s3, %s6847_s15  ;;  %p6853_p9 = scmp.lt.u32.totalorder %s6851_s26, %s6847_s15 }
 0x2c0   : > { %p6855_p12 = scmp.lt.u32.totalorder %s6847_s15, %s8081_s3 }
 0x2c1   : > { %p6849_p10 = pnand %p6848_p5, %p8912_p8  ;;  %p6854_p3 = por %p6853_p9, %p6852_p7 }
 0x2c3   : > { %p6850_p6 = pneg %p6849_p10  ;;  %p6856_p13 = por %p6855_p12, %p6854_p3 }
 0x2c5   : > { %p6857_p0 = pnand %p6856_p13, %p6850_p6 }
 0x2c7   : > { %6860 = shalt.err (!%p6857_p0)
}
 0x2c8   : > { %s6861_s23 = scalar_lea.vmem %s1147_s12, 16  ;;  %s7107_s27 = smov [#allocation39]  }
 0x2c9   : > { %p6862_p1 = scmp.ne.s32.totalorder %s1147_s12, %s6861_s23  ;;  %s6865_s29 = sshll.u32 %s7107_s27, 4  ;;  %s6866_s29 = int_to_ptr.vmem [resolvable:$false] %s6865_s29 }
 0x2ca   : > { %s6867_s2 = scalar_lea.vmem %s6866_s29, 32  ;;  %p6868_p2 = scmp.lt.s32.totalorder %s1147_s12, %s6866_s29 }
 0x2cb   : > { %p6863_p4 = pnand %p6862_p1, %p8912_p8  ;;  %p6869_p5 = scmp.lt.s32.totalorder %s6867_s2, %s6861_s23 }
 0x2cd   : > { %p6864_p11 = pneg %p6863_p4  ;;  %p6870_p10 = por %p6869_p5, %p6868_p2 }
 0x2cf   : > { %p6871_p7 = pnand %p6870_p10, %p6864_p11 }
 0x2d1   : > { %6874 = shalt.err (!%p6871_p7)
}
 0x2d2   : > { %s8946_s15 = scalar_lea.sflag [#allocation38], %s7449_s21  ;;  %s8947_s5 = sld [smem:[#allocation95_spill]] }
 0x2d3   : > { %6027 = dma.hbm_to_vmem [thread:$0]  (%p8912_p8), %s8081_s3, 16, %s1147_s12, %s8946_s15  }
 0x2d4   : > { %s1156_s23 = scalar_lea.vmem [#allocation40], %s7461_s4  ;;  %s1154_s29 = scalar_lea.sflag [#allocation41], %s7449_s21 }
 0x2d5   : > { %s1163_s27 = sshll.u32 %s1156_s23, 4  ;;  %s1164_s27 = int_to_ptr.vmem [resolvable:$true] %s1163_s27 }
 0x2d8   : > { %s8948_s1 = smov %s8947_s5  ;;  %s8107_s28 = scalar_lea.hbm %s8947_s5, %s7488_s22 }
 0x2d9   : > { %s6875_s2 = scalar_lea.hbm %s8107_s28, 16  ;;  %s6879_s12 = scalar_lea.hbm %s8948_s1, 32 }
 0x2da   : > { %p6876_p6 = scmp.ne.s32.totalorder %s8107_s28, %s6875_s2  ;;  %p6880_p12 = scmp.lt.u32.totalorder %s8107_s28, %s8948_s1 }
 0x2db   : > { %p6881_p13 = scmp.lt.u32.totalorder %s6879_s12, %s6875_s2  ;;  %p6883_p1 = scmp.lt.u32.totalorder %s6875_s2, %s8107_s28 }
 0x2dc   : > { %p6877_p9 = pnand %p6876_p6, %p8912_p8 }
 0x2dd   : > { %p6882_p0 = por %p6881_p13, %p6880_p12 }
 0x2de   : > { %p6878_p3 = pneg %p6877_p9 }
 0x2df   : > { %p6884_p4 = por %p6883_p1, %p6882_p0 }
 0x2e1   : > { %p6885_p11 = pnand %p6884_p4, %p6878_p3 }
 0x2e3   : > { %6888 = shalt.err (!%p6885_p11)
}
 0x2e4   : > { %s6889_s21 = scalar_lea.vmem %s1164_s27, 16  ;;  %s7108_s4 = smov [#allocation40]  }
 0x2e5   : > { %p6890_p2 = scmp.ne.s32.totalorder %s1164_s27, %s6889_s21  ;;  %s6893_s0 = sshll.u32 %s7108_s4, 4  ;;  %s6894_s0 = int_to_ptr.vmem [resolvable:$false] %s6893_s0 }
 0x2e6   : > { %s6895_s8 = scalar_lea.vmem %s6894_s0, 32  ;;  %p6896_p7 = scmp.lt.s32.totalorder %s1164_s27, %s6894_s0 }
 0x2e7   : > { %p6891_p5 = pnand %p6890_p2, %p8912_p8  ;;  %p6897_p6 = scmp.lt.s32.totalorder %s6895_s8, %s6889_s21 }
 0x2e9   : > { %p6892_p10 = pneg %p6891_p5  ;;  %p6898_p9 = por %p6897_p6, %p6896_p7 }
 0x2eb   : > { %p6899_p12 = pnand %p6898_p9, %p6892_p10 }
 0x2ed   : > { %6902 = shalt.err (!%p6899_p12)
}
 0x2ee   : > { %6028 = dma.hbm_to_vmem [thread:$0]  (%p8912_p8), %s8107_s28, 16, %s1164_s27, %s1154_s29  }
 0x2ef PF: > { %p8949_p3 = scmp.ne.s32.totalorder %s8905_s24, 0 }
 0x2f0   : > { %s8131_s26 = sand.u32 (!%p8949_p3), 1, %s7057_s6   ;;  %p8950_p13 = scmp.ne.s32.totalorder (!%p8949_p3), %s8893_s20, 0 }
 0x2f1   : > { %1172 = sbr.rel (%p8949_p3) target bundleno = 4834 (0x12e2), region = 116  ;;  %s5669_s5 = sshll.u32 (!%p8949_p3), %s8131_s26, 3 }
 0x2f2   : > { %s1175_s23 = scalar_lea.sflag (!%p8949_p3), [#allocation8], %s8131_s26  ;;  %s8137_s2 = scalar_lea.vmem (!%p8949_p3), [#allocation7], %s5669_s5 }
 0x2f8   : > { %6976 = dma.done.wait (%p8950_p13), %s1175_s23, 128  }
 0x2f9   : > { %6978 = vsyncadd (%p8950_p13), %s1175_s23, 4294967168  ;;  %s8951_s14 = sld [smem:[#allocation69_spill]]  ;;  %s5670_s28 = sshll.u32 %s8131_s26, 2 }
 0x2fa   : > { %s8148_s29 = scalar_lea.vmem [#allocation10], %s5670_s28 }
 0x2ff   : > { %s8144_s24 = sand.u32 1, %s8951_s14  }
 0x300   : > { %s1184_s27 = scalar_lea.sflag [#allocation11], %s8144_s24 }
 0x301   : > { %6980 = dma.done.wait (%p8950_p13), %s1184_s27, 64  }
 0x302   : > { %6982 = vsyncadd (%p8950_p13), %s1184_s27, 4294967232  ;;  %s8952_s3 = sld [smem:[#allocation62_spill]]  ;;  %s8953_s12 = sld [smem:[#allocation74_spill]] }
 0x308   : > { %s8155_s15 = sand.u32 1, %s8952_s3   ;;  %p8954_p8 = scmp.ne.s32.totalorder %s8953_s12, 0 }
 0x309   : > { %s8158_s22 = sshll.u32 %s8155_s15, 4 }
 0x30a   : > { %s1196_s21 = scalar_lea.vmem [#allocation12], %s8158_s22 }
 0x30b   : > { %6984 = dma.done.wait (%p8954_p8), %s1184_s27, 256  }
 0x30c   : > { %6986 = vsyncadd (%p8954_p8), %s1184_s27, 4294967040  ;;  %s1202_s4 = scalar_lea.sflag [#allocation14], %s8144_s24 }
 0x30d   : > { %6988 = dma.done.wait (%p8954_p8), %s1202_s4, 272  }
 0x30e   : > { %6990 = vsyncadd (%p8954_p8), %s1202_s4, 4294967024  ;;  %s1219_s8 = scalar_lea.sflag [#allocation17], %s8144_s24 }
 0x30f   : > { %6992 = dma.done.wait (%p8954_p8), %s1219_s8, 272  }
 0x310   : > { %6994 = vsyncadd (%p8954_p8), %s1219_s8, 4294967024  ;;  %s1236_s27 = scalar_lea.sflag [#allocation20], %s8144_s24 }
 0x311   : > { %6996 = dma.done.wait (%p8954_p8), %s1236_s27, 272  }
 0x312   : > { %6998 = vsyncadd (%p8954_p8), %s1236_s27, 4294967024  ;;  %s1253_s23 = scalar_lea.sflag [#allocation23], %s8144_s24 }
 0x313   : > { %7000 = dma.done.wait (%p8954_p8), %s1253_s23, 272  }
 0x314   : > { %7002 = vsyncadd (%p8954_p8), %s1253_s23, 4294967024  ;;  %s1270_s3 = scalar_lea.sflag [#allocation26], %s8144_s24 }
 0x315   : > { %7004 = dma.done.wait (%p8954_p8), %s1270_s3, 272  }
 0x316   : > { %7006 = vsyncadd (%p8954_p8), %s1270_s3, 4294967024  ;;  %s1287_s0 = scalar_lea.sflag [#allocation29], %s8144_s24 }
 0x317   : > { %7008 = dma.done.wait (%p8954_p8), %s1287_s0, 528  }
 0x318   : > { %7010 = vsyncadd (%p8954_p8), %s1287_s0, 4294966768  ;;  %s5677_s23 = sshll.u32 %s8155_s15, 5  ;;  %s1304_s3 = scalar_lea.sflag [#allocation32], %s8144_s24 }
 0x319   : > { %s8207_s28 = scalar_lea.vmem [#allocation30], %s5677_s23 }
 0x31a   : > { %7012 = dma.done.wait (%p8954_p8), %s1304_s3, 32  }
 0x31b   : > { %7014 = vsyncadd (%p8954_p8), %s1304_s3, 4294967264  ;;  %s1320_s0 = scalar_lea.sflag [#allocation35], %s8144_s24 }
 0x31c   : > { %7016 = dma.done.wait (%p8954_p8), %s1320_s0, 32  }
 0x31d   : > { %7018 = vsyncadd (%p8954_p8), %s1320_s0, 4294967264  ;;  %s1330_s23 = scalar_lea.vmem [#allocation36], %s8155_s15  ;;  %s1336_s8 = scalar_lea.sflag [#allocation38], %s8144_s24 }
 0x31e   : > { %s1338_s20 = scalar_lea.vmem [#allocation37], %s8155_s15 }
 0x31f   : > { %7020 = dma.done.wait (%p8954_p8), %s1336_s8, 32  }
 0x320   : > { %7022 = vsyncadd (%p8954_p8), %s1336_s8, 4294967264  ;;  %s1346_s3 = scalar_lea.vmem [#allocation39], %s8155_s15  ;;  %s1352_s27 = scalar_lea.sflag [#allocation41], %s8144_s24 }
 0x321   : > { %7024 = dma.done.wait (%p8954_p8), %s1352_s27, 16  }
 0x322   : > { %7026 = vsyncadd (%p8954_p8), %s1352_s27, 4294967280  ;;  %p8955_p0 = scmp.eq.s32.totalorder %s8951_s14, 0 }
 0x324   : > { %7028 = dma.done.wait (%p8955_p0), [#allocation41], 16   ;;  %p8956_p1 = pmov %p8955_p0 }
 0x325   : > { %p8957_p4 = pmov %p8955_p0 }
 0x326   : > { %7030 = vsyncadd (%p8956_p1), [#allocation41], 4294967280 }
 0x327   : > { %7032 = dma.done.wait (%p8957_p4), [#allocation44], 16   ;;  %p8958_p11 = pmov %p8955_p0 }
 0x328   : > { %s8246_s24 = scalar_lea.vmem [#allocation45], %s5669_s5  ;;  %s8959_s8 = sld [smem:[#allocation66_spill]] }
 0x329   : > { %7034 = vsyncadd (%p8958_p11), [#allocation44], 4294967280 }
 0x32e   : > { %p5681_p2 = scmp.ne.s32.totalorder %s8959_s8, 0 }
 0x32f   : > { %v1524_v0 = vld [vmem:[%s8137_s2] sm:$0xff] (!%p5681_p2)  ;;  %vm1525_vm0 = vcmask (!%p5681_p2), 261120  }
 0x330   : > { %1523 = sbr.rel (%p5681_p2) target bundleno = 823 (0x337), region = 216  ;;  %1526 = vst.msk [vmem:[#allocation2] sm:$0xff] (!%p5681_p2), %vm1525_vm0, %v1524_v0 }
 0x337 PF: > { %v6177_v1 = vld [vmem:[%s1196_s21] sm:$0xff]   ;;  %v7109_v2 = vmov 0.0   ;;  %v6178_v3 = vld [vmem:[%s1196_s21 + $0x8] sm:$0xff]   ;;  %vm7110_vm1 = vmmov 0   ;;  %vm1552_vm2 = vcmask 261120   ;;  %s8960_s5 = scalar_lea.vmem [#allocation13], %s8155_s15  ;;  %v1617_v19 = vlaneseq }
 0x338   : > { %5835 = vmatprep.subr.bf16.mxu0 %v7109_v2  ;;  %5843 = vmatprep.subr.mxu1 %v7109_v2  ;;  %v8258_v4 = vld [vmem:[#allocation2] sm:$0xff]  ;;  %s7111_s2 = smov 104   ;;  %s7112_s14 = smov 120   ;;  %v7115_v17 = vmov 1983009808   ;;  %vm1748_vm4 = vcmask 64512  }
 0x339   : > { %5836 = vmatpush3.bf16.msra.mxu0 %v6177_v1  ;;  %5839 = vmatprep.mubr.msk.bf16.mxu0 %vm7110_vm1, %v7109_v2  ;;  %v1532_v5 = vpack.c.bf16 %v8258_v4, %v8258_v4  ;;  %v5682_v6 = vld [vmem:[%s8960_s5] ss:$0 sm:$0xff]  ;;  %s7113_s12 = smov 96   ;;  %s7114_s21 = smov 112   ;;  %v1615_v18 = vunpack.c.l.s4 %v7115_v17  ;;  %v7116_v20 = vmov 1934713408  }
 0x33a   : > { %5837 = vmatprep.subr.bf16.mxu0 %v7109_v2  ;;  %5845 = vmatprep.mubr.msk.f32.mxu1 %vm7110_vm1, %v7109_v2  ;;  %v1647_v21 = vunpack.c.l.s4 %v7116_v20  ;;  %v8276_v23 = vshrl.u32 %v1617_v19, 7  ;;  %s7117_s27 = smov 64   ;;  %s8961_s0 = scalar_lea.vmem [#allocation15], %s8158_s22  ;;  %vm3164_vm6 = vcmask 130048   ;;  %vm3166_vm7 = vcmask 195584  }
 0x33b   : > { %v1616_v22 = vunpack.c.0.s8 %v1615_v18  ;;  %s8962_s8 = smov %s8961_s0  ;;  %s7118_s5 = smov 16   ;;  %vm4987_vm10 = vcmask 523264  }
 0x33c   : > { %v1648_v26 = vunpack.c.0.s8 %v1647_v21 }
 0x33d   : > { %5838 = vmatpush3.bf16.msra.mxu0 %v6178_v3  ;;  %v8280_v27 = vsub.s32 %v1616_v22, %v8276_v23 }
 0x33e   : > { %5858 = vmatprep.subr.mxu0 %v7109_v2  ;;  %v8285_v33 = vsub.s32 %v1648_v26, %v8276_v23 }
 0x340   : > { %5840 = vmatmul.mubr.msk.bf16.vlgmr.msra.gmra.mrb[0].mxu0 %vm1552_vm2, %v1532_v5 }
 0x341   : > { %5860 = vmatprep.mubr.msk.f32.mxu0 %vm7110_vm1, %v7109_v2 }
 0x413   : > { %v1590_v7 = vpop.f32.mrb[0].mxu0 }
 0x414   : > { %v1591_v8 = vadd.f32 %v5682_v6, %v1590_v7  ;;  %v5841_v9 = vpop.f32.mrb[1].mxu0 }
 0x415   : > { %v1593_v10 = vpop.f32.mrb[2].mxu0 }
 0x416   : > { %v1598_v11 = vmin.f32 %v1591_v8, 0.0  ;;  %v5842_v12 = vpop.f32.mrb[3].mxu0  ;;  %v1597_v14 = vadd.f32 1.0, %v1591_v8  ;;  %vm1596_vm3 = vcmp.gt.f32.partialorder %v1591_v8, 0.0 }
 0x418   : > { %v1599_v13 = vmul.f32 1.442695, %v1598_v11 }
 0x41a   : > { %6199 = vpow2.f32 %v1599_v13 }
 0x424   : > { %v6200_v15 = vpop.eup %6199 }
 0x425   : > { %v1601_v16 = vsel %vm1596_vm3, %v1597_v14, %v6200_v15 }
 0x426   : > { %1609 = vrot.lane.b32.xlu1 %v1601_v16, %s7111_s2  ;;  %1603 = vrot.lane.b32.xlu0 %v1601_v16, %s7112_s14 }
 0x42a   : > { %1753 = vrot.lane.b32.xlu1 %v1601_v16, %s7113_s12  ;;  %1606 = vrot.lane.b32.xlu0 %v1601_v16, %s7114_s21 }
 0x498   : > { %v1610_v24 = vpop.permute.xlu1 %1609  ;;  %v1604_v25 = vpop.permute.xlu0 %1603 }
 0x499   : > { %1755 = vrot.lane.b32.xlu0 %v1604_v25, %s7113_s12  ;;  %v1628_v28 = vcombine.low %v1604_v25, %v1610_v24  ;;  %v1629_v29 = vcombine.high %v1604_v25, %v1610_v24 }
 0x49b   : > { %v1636_v34 = vrot.slane %v1628_v28, %v8280_v27  ;;  %v1643_v35 = vrot.slane %v1629_v29, %v8280_v27 }
 0x49c   : > { %v1607_v30 = vpop.permute.xlu0 %1606  ;;  %v1754_v3 = vpop.permute.xlu1 %1753 }
 0x49d   : > { %v1612_v31 = vcombine.low %v1601_v16, %v1607_v30  ;;  %v1613_v32 = vcombine.high %v1601_v16, %v1607_v30  ;;  %1759 = vrot.lane.b32.xlu0 %v1610_v24, %s7113_s12  ;;  %1757 = vrot.lane.b32.xlu1 %v1607_v30, %s7113_s12 }
 0x49f   : > { %v1620_v36 = vrot.slane %v1612_v31, %v8280_v27  ;;  %v1627_v37 = vrot.slane %v1613_v32, %v8280_v27 }
 0x4a1   : > { %v1644_v38 = vcombine.low %v1620_v36, %v1636_v34  ;;  %v1645_v39 = vcombine.high %v1620_v36, %v1636_v34  ;;  %v1660_v40 = vcombine.low %v1627_v37, %v1643_v35  ;;  %v1661_v41 = vcombine.high %v1627_v37, %v1643_v35  ;;  %1908 = vrot.lane.b32.xlu0 %v1591_v8, %s7114_s21 }
 0x4a2   : > { %1906 = vrot.lane.b32.xlu1 %v1591_v8, %s7112_s14 }
 0x4a3   : > { %v1652_v42 = vrot.slane %v1644_v38, %v8285_v33  ;;  %v1659_v43 = vrot.slane %v1645_v39, %v8285_v33  ;;  %v1668_v44 = vrot.slane %v1660_v40, %v8285_v33  ;;  %v1675_v45 = vrot.slane %v1661_v41, %v8285_v33 }
 0x4a5   : > { %v1680_v46 = vcombine.low %v1652_v42, %v1659_v43  ;;  %v5686_v47 = vcombine.high %v1652_v42, %v1659_v43  ;;  %v1696_v48 = vcombine.low %v1668_v44, %v1675_v45  ;;  %v5687_v49 = vcombine.high %v1668_v44, %v1675_v45  ;;  %1912 = vrot.lane.b32.xlu0 %v1591_v8, %s7117_s27 }
 0x4a6   : > { %1910 = vrot.lane.b32.xlu1 %v1591_v8, %s7111_s2 }
 0x4a7   : > { %v1687_v50 = vrot.slane %v1680_v46, %v8280_v27  ;;  %v1695_v51 = vrot.slane %v5686_v47, %v8280_v27  ;;  %v1703_v52 = vrot.slane %v1696_v48, %v8280_v27  ;;  %v1711_v53 = vrot.slane %v5687_v49, %v8280_v27 }
 0x4a9   : > { %v1712_v54 = vcombine.low %v1687_v50, %v1695_v51  ;;  %v1713_v55 = vcombine.high %v1687_v50, %v1695_v51  ;;  %v1728_v56 = vcombine.low %v1703_v52, %v1711_v53  ;;  %v1729_v57 = vcombine.high %v1703_v52, %v1711_v53 }
 0x4ab   : > { %v1720_v58 = vrot.slane %v1712_v54, %v8285_v33  ;;  %v1727_v59 = vrot.slane %v1713_v55, %v8285_v33  ;;  %v1736_v60 = vrot.slane %v1728_v56, %v8285_v33  ;;  %v1743_v61 = vrot.slane %v1729_v57, %v8285_v33 }
 0x4ad   : > { %v1744_v62 = vcombine.low %v1720_v58, %v1736_v60  ;;  %v1745_v63 = vcombine.high %v1720_v58, %v1736_v60  ;;  %v1746_v0 = vcombine.low %v1727_v59, %v1743_v61  ;;  %v1747_v1 = vcombine.high %v1727_v59, %v1743_v61 }
 0x4af   : > { %1749 = vst.msk [vmem:[#allocation3] sm:$0xff] %vm1748_vm4, %v1744_v62  ;;  %1750 = vst.msk [vmem:[#allocation3 + $0x8] sm:$0xff] %vm1748_vm4, %v1745_v63 }
 0x4b0   : > { %1751 = vst.msk [vmem:[#allocation3 + $0x10] sm:$0xff] %vm1748_vm4, %v1746_v0  ;;  %1752 = vst.msk [vmem:[#allocation3 + $0x18] sm:$0xff] %vm1748_vm4, %v1747_v1 }
 0x4b6   : > { %v8336_v53 = vld [vmem:[#allocation3] sm:$0xff]  ;;  %v8355_v58 = vld [vmem:[#allocation3 + $0x8] sm:$0xff] }
 0x4b7   : > { %v8340_v54 = vld [vmem:[#allocation3 + $0x18] sm:$0xff]  ;;  %v2081_v56 = vmul.f32 0.0, %v8336_v53  ;;  %v8351_v57 = vld [vmem:[#allocation3 + $0x10] sm:$0xff]  ;;  %v2082_v0 = vmul.f32 0.0, %v8355_v58 }
 0x4b8   : > { %v2083_v61 = vmul.f32 0.0, %v8351_v57  ;;  %v2084_v63 = vmul.f32 0.0, %v8340_v54 }
 0x4b9   : > { %v2085_v60 = vsel %vm1748_vm4, %v2081_v56, 0.0 }
 0x4ba   : > { %v2091_v62 = vsel %vm1748_vm4, %v2083_v61, 0.0  ;;  %v2094_v1 = vsel %vm1748_vm4, %v2084_v63, 0.0 }
 0x50b   : > { %v1756_v5 = vpop.permute.xlu0 %1755 }
 0x50f   : > { %v1758_v6 = vpop.permute.xlu1 %1757  ;;  %v1760_v7 = vpop.permute.xlu0 %1759 }
 0x510   : > { %v1765_v8 = vcombine.low %v1754_v3, %v1758_v6  ;;  %v1766_v9 = vcombine.high %v1754_v3, %v1758_v6  ;;  %v1781_v10 = vcombine.low %v1756_v5, %v1760_v7  ;;  %v1782_v11 = vcombine.high %v1756_v5, %v1760_v7 }
 0x511   : > { %v2088_v3 = vsel %vm1748_vm4, %v2082_v0, 0.0 }
 0x512   : > { %v1773_v12 = vrot.slane %v1765_v8, %v8280_v27  ;;  %v1780_v13 = vrot.slane %v1766_v9, %v8280_v27  ;;  %v1789_v14 = vrot.slane %v1781_v10, %v8280_v27  ;;  %v1796_v15 = vrot.slane %v1782_v11, %v8280_v27 }
 0x513   : > { %v1909_v16 = vpop.permute.xlu0 %1908 }
 0x514   : > { %v1797_v17 = vcombine.low %v1773_v12, %v1789_v14  ;;  %v1798_v18 = vcombine.high %v1773_v12, %v1789_v14  ;;  %v1813_v20 = vcombine.low %v1780_v13, %v1796_v15  ;;  %v1814_v21 = vcombine.high %v1780_v13, %v1796_v15  ;;  %v1907_v22 = vpop.permute.xlu1 %1906  ;;  %1916 = vrot.lane.b32.xlu0 %v1909_v16, %s7117_s27 }
 0x515   : > { %1914 = vrot.lane.b32.xlu1 %v1907_v22, %s7117_s27 }
 0x516   : > { %v1805_v24 = vrot.slane %v1797_v17, %v8285_v33  ;;  %v1812_v25 = vrot.slane %v1798_v18, %v8285_v33  ;;  %v1821_v26 = vrot.slane %v1813_v20, %v8285_v33  ;;  %v1828_v28 = vrot.slane %v1814_v21, %v8285_v33 }
 0x517   : > { %v1913_v5 = vpop.permute.xlu0 %1912 }
 0x518   : > { %v1833_v29 = vcombine.low %v1805_v24, %v1812_v25  ;;  %v5688_v30 = vcombine.high %v1805_v24, %v1812_v25  ;;  %v1849_v31 = vcombine.low %v1821_v26, %v1828_v28  ;;  %v5689_v32 = vcombine.high %v1821_v26, %v1828_v28  ;;  %v1911_v34 = vpop.permute.xlu1 %1910 }
 0x519   : > { %1918 = vrot.lane.b32.xlu1 %v1911_v34, %s7117_s27  ;;  %s7119_s27 = smov 8  }
 0x51a   : > { %v1840_v35 = vrot.slane %v1833_v29, %v8280_v27  ;;  %v1848_v36 = vrot.slane %v5688_v30, %v8280_v27  ;;  %v1856_v37 = vrot.slane %v1849_v31, %v8280_v27  ;;  %v1864_v38 = vrot.slane %v5689_v32, %v8280_v27 }
 0x51c   : > { %v1865_v39 = vcombine.low %v1840_v35, %v1848_v36  ;;  %v1866_v40 = vcombine.high %v1840_v35, %v1848_v36  ;;  %v1881_v41 = vcombine.low %v1856_v37, %v1864_v38  ;;  %v1882_v42 = vcombine.high %v1856_v37, %v1864_v38 }
 0x51e   : > { %v1873_v43 = vrot.slane %v1865_v39, %v8285_v33  ;;  %v1880_v44 = vrot.slane %v1866_v40, %v8285_v33  ;;  %v1889_v45 = vrot.slane %v1881_v41, %v8285_v33  ;;  %v1896_v46 = vrot.slane %v1882_v42, %v8285_v33 }
 0x520   : > { %v1897_v47 = vcombine.low %v1873_v43, %v1889_v45  ;;  %v1898_v48 = vcombine.high %v1873_v43, %v1889_v45  ;;  %v1899_v49 = vcombine.low %v1880_v44, %v1896_v46  ;;  %v1900_v50 = vcombine.high %v1880_v44, %v1896_v46 }
 0x522   : > { %1901 = vst.msk [vmem:[#allocation4] sm:$0xff] %vm1748_vm4, %v1897_v47  ;;  %1902 = vst.msk [vmem:[#allocation4 + $0x8] sm:$0xff] %vm1748_vm4, %v1898_v48 }
 0x523   : > { %1903 = vst.msk [vmem:[#allocation4 + $0x10] sm:$0xff] %vm1748_vm4, %v1899_v49  ;;  %1904 = vst.msk [vmem:[#allocation4 + $0x18] sm:$0xff] %vm1748_vm4, %v1900_v50 }
 0x529   : > { %v2073_v51 = vld [vmem:[#allocation4] sm:$0xff]  ;;  %v2074_v55 = vld [vmem:[#allocation4 + $0x8] sm:$0xff] }
 0x52a   : > { %v2076_v52 = vld [vmem:[#allocation4 + $0x18] sm:$0xff]  ;;  %5844 = vmatpush3.xpose.msk.msra.mxu1 %vm1748_vm4, %v2073_v51  ;;  %v2075_v59 = vld [vmem:[#allocation4 + $0x10] sm:$0xff]  ;;  %v2067_v51 = vand.u32 127, %v1617_v19 }
 0x52b   : > { %5859 = vmatpush3.xpose.msk.msra.mxu0 %vm1748_vm4, %v2076_v52  ;;  %5848 = vmatprep.subr.mxu1 %v7109_v2 }
 0x52c   : > { %5868 = vmatprep.subr.mxu0 %v7109_v2  ;;  %vm2068_vm5 = vcmp.ge.s32.totalorder %v8276_v23, %v2067_v51 }
 0x52d   : > { %5846 = vmatmul.mubr.msk.f32.vlgmr.msra.gmra.mrb[0].mxu1 %vm1748_vm4, %v8336_v53 }
 0x52e   : > { %5861 = vmatmul.mubr.msk.f32.vlgmr.msra.gmra.mrb[4].mxu0 %vm1748_vm4, %v8340_v54  ;;  %5849 = vmatpush3.xpose.msk.msra.mxu1 %vm1748_vm4, %v2074_v55 }
 0x52f   : > { %5850 = vmatprep.mubr.msk.f32.mxu1 %vm7110_vm1, %v7109_v2  ;;  %5853 = vmatprep.subr.mxu1 %v7109_v2 }
 0x530   : > { %5870 = vmatprep.mubr.msk.f32.mxu0 %vm7110_vm1, %v7109_v2 }
 0x531   : > { %5851 = vmatmul.mubr.msk.f32.vlgmr.msra.gmra.mrb[2].mxu1 %vm1748_vm4, %v8355_v58 }
 0x532   : > { %5854 = vmatpush3.xpose.msk.msra.mxu1 %vm1748_vm4, %v2075_v59  ;;  %5855 = vmatprep.mubr.msk.f32.mxu1 %vm7110_vm1, %v7109_v2 }
 0x533   : > { %2086 = vadd.xlane.f32.xlu0 %v2085_v60  ;;  %5863 = vmatprep.subr.mxu1 %v7109_v2 }
 0x535   : > { %5856 = vmatmul.mubr.msk.f32.vlgmr.msra.gmra.mrb[4].mxu1 %vm1748_vm4, %v8351_v57 }
 0x536   : > { %5865 = vmatprep.mubr.msk.f32.mxu1 %vm7110_vm1, %v7109_v2 }
 0x537   : > { %2092 = vadd.xlane.f32.xlu0 %v2091_v62 }
 0x53b   : > { %2095 = vadd.xlane.f32.xlu0 %v2094_v1 }
 0x53d   : > { %2089 = vadd.xlane.f32.xlu1 %v2088_v3 }
 0x586   : > { %v1917_v7 = vpop.permute.xlu0 %1916 }
 0x587   : > { %v1915_v6 = vpop.permute.xlu1 %1914  ;;  %v1924_v8 = vcombine.low %v1913_v5, %v1917_v7  ;;  %v1925_v9 = vcombine.high %v1913_v5, %v1917_v7 }
 0x589   : > { %v1932_v13 = vrot.slane %v1924_v8, %v8280_v27  ;;  %v1939_v14 = vrot.slane %v1925_v9, %v8280_v27 }
 0x58b   : > { %v1919_v10 = vpop.permute.xlu1 %1918 }
 0x58c   : > { %v1940_v11 = vcombine.low %v1915_v6, %v1919_v10  ;;  %v1941_v12 = vcombine.high %v1915_v6, %v1919_v10 }
 0x58e   : > { %v1948_v15 = vrot.slane %v1940_v11, %v8280_v27  ;;  %v1955_v16 = vrot.slane %v1941_v12, %v8280_v27 }
 0x590   : > { %v1956_v17 = vcombine.low %v1932_v13, %v1948_v15  ;;  %v1957_v18 = vcombine.high %v1932_v13, %v1948_v15  ;;  %v1972_v20 = vcombine.low %v1939_v14, %v1955_v16  ;;  %v1973_v21 = vcombine.high %v1939_v14, %v1955_v16 }
 0x592   : > { %v1964_v22 = vrot.slane %v1956_v17, %v8285_v33  ;;  %v1971_v24 = vrot.slane %v1957_v18, %v8285_v33  ;;  %v1980_v25 = vrot.slane %v1972_v20, %v8285_v33  ;;  %v1987_v26 = vrot.slane %v1973_v21, %v8285_v33 }
 0x594   : > { %v1992_v28 = vcombine.low %v1964_v22, %v1971_v24  ;;  %v5690_v29 = vcombine.high %v1964_v22, %v1971_v24  ;;  %v2008_v30 = vcombine.low %v1980_v25, %v1987_v26  ;;  %v5691_v31 = vcombine.high %v1980_v25, %v1987_v26 }
 0x596   : > { %v1999_v32 = vrot.slane %v1992_v28, %v8280_v27  ;;  %v2007_v34 = vrot.slane %v5690_v29, %v8280_v27  ;;  %v2015_v35 = vrot.slane %v2008_v30, %v8280_v27  ;;  %v2023_v36 = vrot.slane %v5691_v31, %v8280_v27 }
 0x598   : > { %v2024_v37 = vcombine.low %v1999_v32, %v2007_v34  ;;  %v2025_v38 = vcombine.high %v1999_v32, %v2007_v34  ;;  %v2040_v39 = vcombine.low %v2015_v35, %v2023_v36  ;;  %v2041_v40 = vcombine.high %v2015_v35, %v2023_v36 }
 0x59a   : > { %v2032_v41 = vrot.slane %v2024_v37, %v8285_v33  ;;  %v2039_v42 = vrot.slane %v2025_v38, %v8285_v33  ;;  %v2048_v43 = vrot.slane %v2040_v39, %v8285_v33  ;;  %v2055_v44 = vrot.slane %v2041_v40, %v8285_v33 }
 0x59c   : > { %v2056_v45 = vcombine.low %v2032_v41, %v2048_v43  ;;  %v2057_v46 = vcombine.high %v2032_v41, %v2048_v43  ;;  %v2058_v47 = vcombine.low %v2039_v42, %v2055_v44  ;;  %v2059_v48 = vcombine.high %v2039_v42, %v2055_v44 }
 0x59e   : > { %2060 = vst.msk [vmem:[#allocation5] sm:$0xff] %vm1748_vm4, %v2056_v45  ;;  %2061 = vst.msk [vmem:[#allocation5 + $0x8] sm:$0xff] %vm1748_vm4, %v2057_v46 }
 0x59f   : > { %2062 = vst.msk [vmem:[#allocation5 + $0x10] sm:$0xff] %vm1748_vm4, %v2058_v47  ;;  %2063 = vst.msk [vmem:[#allocation5 + $0x18] sm:$0xff] %vm1748_vm4, %v2059_v48 }
 0x5a5   : > { %v2077_v49 = vld [vmem:[#allocation5] sm:$0xff]  ;;  %v2078_v50 = vld [vmem:[#allocation5 + $0x8] sm:$0xff] }
 0x5a6   : > { %5864 = vmatpush3.msra.mxu1 %v2077_v49  ;;  %5869 = vmatpush3.msra.mxu0 %v2078_v50  ;;  %v2079_v61 = vld [vmem:[#allocation5 + $0x10] sm:$0xff]  ;;  %v2080_v1 = vld [vmem:[#allocation5 + $0x18] sm:$0xff] }
 0x5a7   : > { %5873 = vmatprep.subr.mxu1 %v7109_v2  ;;  %5878 = vmatprep.subr.mxu0 %v7109_v2 }
 0x5c0   : > { %v2087_v23 = vpop.xlane.xlu0 %2086 }
 0x5ca   : > { %v2090_v11 = vpop.xlane.xlu1 %2089 }
 0x600   : > { %v2169_v52 = vpop.f32.mrb[0].mxu1 }
 0x601   : > { %v2397_v55 = vpop.f32.mrb[4].mxu0  ;;  %v2403_v56 = vsel %vm2068_vm5, %v2169_v52, 0.0  ;;  %v5847_v59 = vpop.f32.mrb[1].mxu1 }
 0x602   : > { %v5862_v60 = vpop.f32.mrb[5].mxu0  ;;  %5866 = vmatmul.mubr.msk.f32.vlgmr.msra.gmra.mrb[6].mxu1 %vm1748_vm4, %v2403_v56  ;;  %v2979_v62 = vsel %vm1748_vm4, %v2403_v56, 0.0  ;;  %v2406_v5 = vsel %vm2068_vm5, %v2397_v55, 0.0  ;;  %v6185_v56 = vld [vmem:[%s8961_s0] sm:$0xff]   ;;  %s7120_s0 = smov 24  }
 0x603   : > { %5874 = vmatpush3.msra.mxu1 %v2079_v61  ;;  %2980 = vadd.xlane.f32.xlu1 %v2979_v62  ;;  %v2988_v10 = vsel %vm1748_vm4, %v2406_v5, 0.0 }
 0x604   : > { %v2245_v63 = vpop.f32.mrb[2].mxu1  ;;  %5875 = vmatprep.mubr.msk.f32.mxu1 %vm7110_vm1, %v7109_v2  ;;  %5883 = vmatprep.subr.mxu1 %v7109_v2 }
 0x605   : > { %v2404_v19 = vsel %vm2068_vm5, %v2245_v63, 0.0  ;;  %v5852_v0 = vpop.f32.mrb[3].mxu1 }
 0x606   : > { %5871 = vmatmul.mubr.msk.f32.vlgmr.msra.gmra.mrb[6].mxu0 %vm1748_vm4, %v2404_v19  ;;  %v2982_v3 = vsel %vm1748_vm4, %v2404_v19, 0.0 }
 0x607   : > { %5879 = vmatpush3.msra.mxu0 %v2080_v1  ;;  %2983 = vadd.xlane.f32.xlu0 %v2982_v3  ;;  %v6186_v3 = vld [vmem:[%s8962_s8 + $0x8] sm:$0xff]   ;;  %s8963_s8 = scalar_lea.vmem [#allocation21], %s8158_s22 }
 0x608   : > { %v2321_v6 = vpop.f32.mrb[4].mxu1  ;;  %5880 = vmatprep.mubr.msk.f32.mxu0 %vm7110_vm1, %v7109_v2  ;;  %5888 = vmatprep.subr.mxu0 %v7109_v2  ;;  %s8964_s4 = smov %s8963_s8 }
 0x609   : > { %v2405_v7 = vsel %vm2068_vm5, %v2321_v6, 0.0  ;;  %v5857_v8 = vpop.f32.mrb[5].mxu1 }
 0x60a   : > { %5876 = vmatmul.mubr.msk.f32.vlgmr.msra.gmra.mrb[8].mxu1 %vm1748_vm4, %v2405_v7  ;;  %5881 = vmatmul.mubr.msk.f32.vlgmr.msra.gmra.mrb[8].mxu0 %vm1748_vm4, %v2406_v5  ;;  %v2985_v9 = vsel %vm1748_vm4, %v2405_v7, 0.0 }
 0x60b   : > { %2986 = vadd.xlane.f32.xlu1 %v2985_v9  ;;  %5884 = vmatpush3.msra.mxu1 %v7109_v2 }
 0x60c   : > { %2989 = vadd.xlane.f32.xlu0 %v2988_v10  ;;  %5889 = vmatpush3.msra.mxu0 %v7109_v2 }
 0x60d   : > { %5885 = vmatprep.mubr.msk.f32.mxu1 %vm7110_vm1, %v7109_v2  ;;  %5890 = vmatprep.mubr.msk.f32.mxu0 %vm7110_vm1, %v7109_v2 }
 0x60e   : > { %5886 = vmatmul.mubr.msk.f32.vlgmr.msra.gmra.mrb[6].mxu1 %vm1748_vm4, %v8336_v53  ;;  %5891 = vmatmul.mubr.msk.f32.vlgmr.msra.gmra.mrb[6].mxu0 %vm1748_vm4, %v8355_v58  ;;  %v2093_v53 = vpop.xlane.xlu0 %2092 }
 0x60f   : > { %5893 = vmatprep.subr.mxu1 %v7109_v2  ;;  %5898 = vmatprep.subr.mxu0 %v7109_v2 }
 0x610   : > { %5894 = vmatpush3.msra.mxu1 %v7109_v2  ;;  %5899 = vmatpush3.msra.mxu0 %v7109_v2 }
 0x611   : > { %5895 = vmatprep.mubr.msk.f32.mxu1 %vm7110_vm1, %v7109_v2  ;;  %5900 = vmatprep.mubr.msk.f32.mxu0 %vm7110_vm1, %v7109_v2 }
 0x612   : > { %5896 = vmatmul.mubr.msk.f32.vlgmr.msra.gmra.mrb[8].mxu1 %vm1748_vm4, %v8351_v57  ;;  %5901 = vmatmul.mubr.msk.f32.vlgmr.msra.gmra.mrb[8].mxu0 %vm1748_vm4, %v8340_v54  ;;  %v2096_v58 = vpop.xlane.xlu0 %2095 }
 0x613   : > { %5903 = vmatprep.subr.bf16.mxu1 %v7109_v2  ;;  %5907 = vmatprep.mubr.msk.bf16.mxu1 %vm7110_vm1, %v7109_v2 }
 0x614   : > { %5924 = vmatprep.subr.mxu0 %v7109_v2  ;;  %5926 = vmatprep.mubr.msk.f32.mxu0 %vm7110_vm1, %v7109_v2 }
 0x615   : > { %5904 = vmatpush3.bf16.msra.mxu1 %v6185_v56 }
 0x616   : > { %5905 = vmatprep.subr.bf16.mxu1 %v7109_v2 }
 0x619   : > { %5906 = vmatpush3.bf16.msra.mxu1 %v6186_v3 }
 0x61a   : > { %5911 = vmatprep.subr.bf16.mxu1 %v7109_v2 }
 0x690   : > { %v2981_v13 = vpop.xlane.xlu1 %2980 }
 0x691   : > { %v2991_v57 = vadd.f32 %v2981_v13, %v2087_v23 }
 0x693   : > { %v2995_v16 = vadd.f32 1e-06, %v2991_v57 }
 0x694   : > { %v2984_v12 = vpop.xlane.xlu0 %2983 }
 0x695   : > { %v2992_v14 = vadd.f32 %v2984_v12, %v2090_v11  ;;  %6201 = vrcp.f32 %v2995_v16 }
 0x697   : > { %v2996_v18 = vadd.f32 1e-06, %v2992_v14 }
 0x698   : > { %v2987_v15 = vpop.xlane.xlu1 %2986 }
 0x699   : > { %v2990_v54 = vpop.xlane.xlu0 %2989  ;;  %v2993_v17 = vadd.f32 %v2987_v15, %v2093_v53  ;;  %6203 = vrcp.f32 %v2996_v18 }
 0x69a   : > { %v2994_v20 = vadd.f32 %v2990_v54, %v2096_v58 }
 0x69b   : > { %v2997_v21 = vadd.f32 1e-06, %v2993_v17 }
 0x69c   : > { %v2998_v22 = vadd.f32 1e-06, %v2994_v20 }
 0x69d   : > { %6205 = vrcp.f32 %v2997_v21 }
 0x69e   : > { %6207 = vrcp.f32 %v2998_v22 }
 0x69f   : > { %v6202_v24 = vpop.eup %6201 }
 0x6a3   : > { %v6204_v25 = vpop.eup %6203 }
 0x6a7   : > { %v6206_v34 = vpop.eup %6205 }
 0x6a8   : > { %v6208_v35 = vpop.eup %6207 }
 0x6e1   : > { %v2765_v26 = vpop.f32.mrb[6].mxu1  ;;  %v2835_v28 = vpop.f32.mrb[6].mxu0 }
 0x6e2   : > { %v3000_v29 = vmul.f32 %v6202_v24, %v2765_v26  ;;  %v3002_v30 = vmul.f32 %v6204_v25, %v2835_v28  ;;  %v5887_v31 = vpop.f32.mrb[7].mxu1  ;;  %v5892_v32 = vpop.f32.mrb[7].mxu0  ;;  %v6187_v24 = vld [vmem:[%s8963_s8] sm:$0xff]   ;;  %s8965_s8 = scalar_lea.vmem [#allocation16], %s8155_s15 }
 0x6e3   : > { %v6188_v26 = vld [vmem:[%s8964_s4 + $0x8] sm:$0xff]   ;;  %v3266_v28 = vld [vmem:[%s8148_s29] sm:$0xf]  ;;  %s8966_s29 = scalar_lea.vmem [#allocation22], %s8155_s15  ;;  %s8967_s4 = scalar_lea.vmem [#allocation33], %s8155_s15 }
 0x6e4   : > { %3007 = vst.msk [vmem:[#allocation6] sm:$0xff] %vm1748_vm4, %v3000_v29  ;;  %3008 = vst.msk [vmem:[#allocation6 + $0x8] sm:$0xff] %vm1748_vm4, %v3002_v30  ;;  %v5710_v29 = vld [vmem:[%s8965_s8] ss:$0 sm:$0xff]  ;;  %s8969_s8 = scalar_lea.vmem [#allocation34], %s8155_s15 }
 0x6e5   : > { %v2905_v36 = vpop.f32.mrb[8].mxu1  ;;  %v2975_v37 = vpop.f32.mrb[8].mxu0 }
 0x6e6   : > { %v3004_v38 = vmul.f32 %v6206_v34, %v2905_v36  ;;  %v3006_v39 = vmul.f32 %v6208_v35, %v2975_v37  ;;  %v5897_v40 = vpop.f32.mrb[9].mxu1  ;;  %v5902_v41 = vpop.f32.mrb[9].mxu0 }
 0x6e8   : > { %3009 = vst.msk [vmem:[#allocation6 + $0x10] sm:$0xff] %vm1748_vm4, %v3004_v38  ;;  %3010 = vst.msk [vmem:[#allocation6 + $0x18] sm:$0xff] %vm1748_vm4, %v3006_v39  ;;  %v5716_v38 = vld [vmem:[%s8966_s29] ss:$0 sm:$0xff] }
 0x6ef   : > { %v6179_v42 = vld [vmem:[#allocation6] ss:$16 sps:$4 sm:$0xff]   ;;  %v6181_v43 = vld [vmem:[#allocation6 + $0x4] ss:$16 sps:$4 sm:$0xff]   ;;  %v6182_v44 = vld [vmem:[#allocation6 + $0x8] ss:$16 sps:$4 sm:$0xff]  }
 0x6f0   : > { %v6184_v45 = vld [vmem:[#allocation6 + $0xc] ss:$16 sps:$4 sm:$0xff]   ;;  %v3023_v46 = vrot.slane %v6179_v42, %v8280_v27  ;;  %v3030_v47 = vrot.slane %v6181_v43, %v8280_v27  ;;  %v3039_v48 = vrot.slane %v6182_v44, %v8280_v27 }
 0x6f1   : > { %v3046_v49 = vrot.slane %v6184_v45, %v8280_v27 }
 0x6f2   : > { %v3047_v50 = vcombine.low %v3023_v46, %v3039_v48  ;;  %v3048_v51 = vcombine.high %v3023_v46, %v3039_v48 }
 0x6f3   : > { %v3063_v52 = vcombine.low %v3030_v47, %v3046_v49  ;;  %v3064_v55 = vcombine.high %v3030_v47, %v3046_v49 }
 0x6f4   : > { %v3055_v59 = vrot.slane %v3047_v50, %v8285_v33  ;;  %v3062_v60 = vrot.slane %v3048_v51, %v8285_v33 }
 0x6f5   : > { %v3071_v61 = vrot.slane %v3063_v52, %v8285_v33  ;;  %v3078_v62 = vrot.slane %v3064_v55, %v8285_v33 }
 0x6f6   : > { %v3083_v63 = vcombine.low %v3055_v59, %v3062_v60  ;;  %v5708_v19 = vcombine.high %v3055_v59, %v3062_v60 }
 0x6f7   : > { %v3099_v0 = vcombine.low %v3071_v61, %v3078_v62  ;;  %v5709_v1 = vcombine.high %v3071_v61, %v3078_v62 }
 0x6f8   : > { %v3090_v5 = vrot.slane %v3083_v63, %v8280_v27  ;;  %v3098_v6 = vrot.slane %v5708_v19, %v8280_v27 }
 0x6f9   : > { %v3106_v7 = vrot.slane %v3099_v0, %v8280_v27  ;;  %v3114_v8 = vrot.slane %v5709_v1, %v8280_v27 }
 0x6fa   : > { %v3116_v9 = vcombine.high %v3090_v5, %v3098_v6  ;;  %v3115_v23 = vcombine.low %v3090_v5, %v3098_v6 }
 0x6fb   : > { %v3132_v10 = vcombine.high %v3106_v7, %v3114_v8  ;;  %v3131_v53 = vcombine.low %v3106_v7, %v3114_v8 }
 0x6fc   : > { %v3130_v58 = vrot.slane %v3116_v9, %v8285_v33  ;;  %v3123_v12 = vrot.slane %v3115_v23, %v8285_v33 }
 0x6fd   : > { %v3146_v11 = vrot.slane %v3132_v10, %v8285_v33  ;;  %v3139_v13 = vrot.slane %v3131_v53, %v8285_v33 }
 0x6ff   : > { %v3149_v57 = vcombine.low %v3130_v58, %v3146_v11  ;;  %v3148_v14 = vcombine.high %v3123_v12, %v3139_v13  ;;  %v3147_v15 = vcombine.low %v3123_v12, %v3139_v13  ;;  %v3150_v54 = vcombine.high %v3130_v58, %v3146_v11 }
 0x701   : > { %3156 = vrot.lane.b32.xlu0 %v3149_v57, %s7118_s5  ;;  %3152 = vrot.lane.b32.xlu1 %v3148_v14, %s7119_s27 }
 0x705   : > { %3160 = vrot.lane.b32.xlu1 %v3150_v54, %s7120_s0 }
 0x773   : > { %v3153_v16 = vpop.permute.xlu1 %3152  ;;  %v3157_v17 = vpop.permute.xlu0 %3156 }
 0x774   : > { %v3163_v18 = vsel %vm1748_vm4, %v3147_v15, %v3153_v16 }
 0x775   : > { %v3165_v21 = vsel %vm3164_vm6, %v3163_v18, %v3157_v17 }
 0x777   : > { %v3161_v20 = vpop.permute.xlu1 %3160 }
 0x778   : > { %v3167_v22 = vsel %vm3166_vm7, %v3165_v21, %v3161_v20 }
 0x779   : > { %v3172_v25 = vpack.c.bf16 %v3167_v22, %v3167_v22 }
 0x77b   : > { %5908 = vmatmul.mubr.msk.bf16.vlgmr.msra.gmra.mrb[12].mxu1 %vm1552_vm2, %v3172_v25 }
 0x77c   : > { %5912 = vmatpush3.bf16.msra.mxu1 %v6187_v24  ;;  %5915 = vmatprep.mubr.msk.bf16.mxu1 %vm7110_vm1, %v7109_v2 }
 0x77d   : > { %5913 = vmatprep.subr.bf16.mxu1 %v7109_v2 }
 0x780   : > { %5914 = vmatpush3.bf16.msra.mxu1 %v6188_v26 }
 0x781   : > { %5919 = vmatprep.subr.mxu1 %v7109_v2 }
 0x783   : > { %5916 = vmatmul.mubr.msk.bf16.vlgmr.msra.gmra.mrb[16].mxu1 %vm1552_vm2, %v3266_v28 }
 0x784   : > { %5921 = vmatprep.mubr.msk.f32.mxu1 %vm7110_vm1, %v7109_v2 }
 0x84e   : > { %v3229_v30 = vpop.f32.mrb[12].mxu1 }
 0x84f   : > { %v3230_v31 = vadd.f32 %v5710_v29, %v3229_v30  ;;  %v5909_v32 = vpop.f32.mrb[13].mxu1 }
 0x850   : > { %v3232_v34 = vpop.f32.mrb[14].mxu1 }
 0x851   : > { %v5910_v35 = vpop.f32.mrb[15].mxu1  ;;  %v3235_v36 = vadd.f32 %v3230_v31, %v8258_v4 }
 0x853   : > { %v3238_v37 = vsel %vm1552_vm2, %v3235_v36, 0.0 }
 0x854   : > { %3239 = vadd.xlane.f32.xlu1 %v3238_v37 }
 0x856   : > { %v3327_v39 = vpop.f32.mrb[16].mxu1 }
 0x857   : > { %v3328_v40 = vadd.f32 %v5716_v38, %v3327_v39  ;;  %v5917_v41 = vpop.f32.mrb[17].mxu1 }
 0x858   : > { %v3330_v42 = vpop.f32.mrb[18].mxu1 }
 0x859   : > { %v3335_v43 = vmin.f32 %v3328_v40, 0.0  ;;  %3486 = vrot.lane.b32.xlu0 %v3328_v40, %s7112_s14  ;;  %v5918_v44 = vpop.f32.mrb[19].mxu1  ;;  %v3334_v4 = vadd.f32 1.0, %v3328_v40  ;;  %vm3333_vm8 = vcmp.gt.f32.partialorder %v3328_v40, 0.0 }
 0x85b   : > { %v3336_v45 = vmul.f32 1.442695, %v3335_v43 }
 0x85d   : > { %6209 = vpow2.f32 %v3336_v45  ;;  %3488 = vrot.lane.b32.xlu0 %v3328_v40, %s7114_s21 }
 0x861   : > { %3490 = vrot.lane.b32.xlu0 %v3328_v40, %s7111_s2 }
 0x865   : > { %3492 = vrot.lane.b32.xlu1 %v3328_v40, %s7113_s12 }
 0x867   : > { %v6210_v46 = vpop.eup %6209 }
 0x868   : > { %v3338_v47 = vsel %vm3333_vm8, %v3334_v4, %v6210_v46 }
 0x869   : > { %3340 = vrot.lane.b32.xlu0 %v3338_v47, %s7112_s14 }
 0x86d   : > { %3343 = vrot.lane.b32.xlu0 %v3338_v47, %s7114_s21 }
 0x871   : > { %3346 = vrot.lane.b32.xlu0 %v3338_v47, %s7111_s2 }
 0x8cb   : > { %v3487_v48 = vpop.permute.xlu0 %3486 }
 0x8cc   : > { %3494 = vrot.lane.b32.xlu1 %v3487_v48, %s7113_s12 }
 0x8cf   : > { %v3489_v49 = vpop.permute.xlu0 %3488 }
 0x8d0   : > { %3496 = vrot.lane.b32.xlu1 %v3489_v49, %s7113_s12 }
 0x8d3   : > { %v3491_v50 = vpop.permute.xlu0 %3490 }
 0x8db   : > { %v3341_v51 = vpop.permute.xlu0 %3340 }
 0x8df   : > { %v3344_v52 = vpop.permute.xlu0 %3343 }
 0x8e0   : > { %v3349_v55 = vcombine.low %v3338_v47, %v3344_v52  ;;  %v3350_v59 = vcombine.high %v3338_v47, %v3344_v52 }
 0x8e1   : > { %v3240_v56 = vpop.xlane.xlu1 %3239 }
 0x8e2   : > { %v3242_v60 = vmul.f32 0.03125, %v3240_v56  ;;  %v3357_v0 = vrot.slane %v3349_v55, %v8280_v27  ;;  %v3364_v1 = vrot.slane %v3350_v59, %v8280_v27 }
 0x8e3   : > { %v3347_v61 = vpop.permute.xlu0 %3346 }
 0x8e4   : > { %v8508_v62 = vsub.f32 %v3235_v36, %v3242_v60  ;;  %v3365_v63 = vcombine.low %v3341_v51, %v3347_v61  ;;  %v3366_v19 = vcombine.high %v3341_v51, %v3347_v61 }
 0x8e5   : > { %v3493_v35 = vpop.permute.xlu1 %3492 }
 0x8e6   : > { %v3373_v3 = vrot.slane %v3365_v63, %v8280_v27  ;;  %v3380_v5 = vrot.slane %v3366_v19, %v8280_v27  ;;  %v3244_v6 = vmul.f32 %v8508_v62, %v8508_v62 }
 0x8e8   : > { %v3381_v7 = vcombine.low %v3357_v0, %v3373_v3  ;;  %v3382_v8 = vcombine.high %v3357_v0, %v3373_v3  ;;  %v3397_v9 = vcombine.low %v3364_v1, %v3380_v5  ;;  %v3398_v10 = vcombine.high %v3364_v1, %v3380_v5 }
 0x8e9   : > { %v3245_v23 = vsel %vm1552_vm2, %v3244_v6, 0.0 }
 0x8ea   : > { %v3389_v53 = vrot.slane %v3381_v7, %v8285_v33  ;;  %v3396_v58 = vrot.slane %v3382_v8, %v8285_v33  ;;  %v3405_v11 = vrot.slane %v3397_v9, %v8285_v33  ;;  %v3412_v12 = vrot.slane %v3398_v10, %v8285_v33  ;;  %3246 = vadd.xlane.f32.xlu0 %v3245_v23 }
 0x8ec   : > { %v3417_v13 = vcombine.low %v3389_v53, %v3396_v58  ;;  %v5720_v57 = vcombine.high %v3389_v53, %v3396_v58  ;;  %v3433_v14 = vcombine.low %v3405_v11, %v3412_v12  ;;  %v5721_v15 = vcombine.high %v3405_v11, %v3412_v12 }
 0x8ee   : > { %v3424_v54 = vrot.slane %v3417_v13, %v8280_v27  ;;  %v3432_v16 = vrot.slane %v5720_v57, %v8280_v27  ;;  %v3440_v17 = vrot.slane %v3433_v14, %v8280_v27  ;;  %v3448_v18 = vrot.slane %v5721_v15, %v8280_v27 }
 0x8f0   : > { %v3449_v20 = vcombine.low %v3424_v54, %v3432_v16  ;;  %v3465_v21 = vcombine.low %v3440_v17, %v3448_v18  ;;  %v3450_v26 = vcombine.high %v3424_v54, %v3432_v16  ;;  %v3466_v28 = vcombine.high %v3440_v17, %v3448_v18 }
 0x8f2   : > { %v3457_v22 = vrot.slane %v3449_v20, %v8285_v33  ;;  %v3473_v24 = vrot.slane %v3465_v21, %v8285_v33  ;;  %v3464_v30 = vrot.slane %v3450_v26, %v8285_v33  ;;  %v3480_v31 = vrot.slane %v3466_v28, %v8285_v33  ;;  %v5714_v20 = vld [vmem:[%s8967_s4] ss:$0 sm:$0xff]  ;;  %s8971_s4 = scalar_lea.vmem [#allocation19], %s8155_s15 }
 0x8f3   : > { %v5715_v26 = vld [vmem:[%s8969_s8] ss:$0 sm:$0xff] }
 0x8f4   : > { %v8527_v25 = vcombine.low %v3457_v22, %v3473_v24  ;;  %v8530_v29 = vcombine.high %v3457_v22, %v3473_v24  ;;  %v8535_v32 = vcombine.high %v3464_v30, %v3480_v31  ;;  %v8539_v34 = vcombine.low %v3464_v30, %v3480_v31 }
 0x8f9   : > { %3640 = vxpose.xlu1.b32.start.end [1/1] (short) (narrow) %v8527_v25, 8 }
 0x8fd   : > { %3745 = vxpose.xlu1.b32.start.end [1/1] (short) (narrow) %v8530_v29, 8 }
 0x900   : > { %3498 = vrot.lane.b32.xlu0 %v3491_v50, %s7113_s12  ;;  %s8968_s12 = scalar_lea.vmem [#allocation18], %s8158_s22 }
 0x901   : > { %3955 = vxpose.xlu1.b32.start.end [1/1] (short) (narrow) %v8535_v32, 8  ;;  %v6189_v21 = vld [vmem:[%s8968_s12] sm:$0xff]   ;;  %s8970_s29 = smov %s8968_s12 }
 0x902   : > { %v6190_v28 = vld [vmem:[%s8970_s29 + $0x8] sm:$0xff]  }
 0x91e   : > { %3850 = vxpose.xlu0.b32.start.end [1/1] (short) (narrow) %v8539_v34, 8 }
 0x93e   : > { %v3495_v36 = vpop.permute.xlu1 %3494 }
 0x942   : > { %v3497_v37 = vpop.permute.xlu1 %3496 }
 0x943   : > { %v3504_v39 = vcombine.low %v3493_v35, %v3497_v37  ;;  %v3505_v40 = vcombine.high %v3493_v35, %v3497_v37 }
 0x945   : > { %v3512_v44 = vrot.slane %v3504_v39, %v8280_v27  ;;  %v3519_v45 = vrot.slane %v3505_v40, %v8280_v27 }
 0x977   : > { %v3247_v38 = vpop.xlane.xlu0 %3246 }
 0x978   : > { %v3248_v59 = vmul.f32 0.03125, %v3247_v38  ;;  %v5728_v38 = vld [vmem:[%s8971_s4] ss:$0 sm:$0xff] }
 0x979   : > { %v3656_v7 = vpop.trf.xlu1 }
 0x97a   : > { %v3249_v6 = vadd.f32 1e-05, %v3248_v59  ;;  %v4074_v59 = vsel %vm1748_vm4, %v8539_v34, 0.0 }
 0x97b   : > { %v3499_v41 = vpop.permute.xlu0 %3498 }
 0x97c   : > { %v3520_v42 = vcombine.low %v3495_v36, %v3499_v41  ;;  %v3521_v43 = vcombine.high %v3495_v36, %v3499_v41  ;;  %6211 = vrsqrt.f32 %v3249_v6 }
 0x97d   : > { %v3761_v14 = vpop.trf.xlu1 }
 0x97e   : > { %v3528_v4 = vrot.slane %v3520_v42, %v8280_v27  ;;  %v3535_v46 = vrot.slane %v3521_v43, %v8280_v27 }
 0x980   : > { %v3536_v47 = vcombine.low %v3512_v44, %v3528_v4  ;;  %v3537_v48 = vcombine.high %v3512_v44, %v3528_v4  ;;  %v3552_v49 = vcombine.low %v3519_v45, %v3535_v46  ;;  %v3553_v50 = vcombine.high %v3519_v45, %v3535_v46 }
 0x981   : > { %v3971_v16 = vpop.trf.xlu1 }
 0x982   : > { %v3544_v51 = vrot.slane %v3536_v47, %v8285_v33  ;;  %v3551_v52 = vrot.slane %v3537_v48, %v8285_v33  ;;  %v3560_v55 = vrot.slane %v3552_v49, %v8285_v33  ;;  %v3567_v56 = vrot.slane %v3553_v50, %v8285_v33 }
 0x984   : > { %v3572_v60 = vcombine.low %v3544_v51, %v3551_v52  ;;  %v5722_v61 = vcombine.high %v3544_v51, %v3551_v52  ;;  %v3588_v63 = vcombine.low %v3560_v55, %v3567_v56  ;;  %v5723_v19 = vcombine.high %v3560_v55, %v3567_v56 }
 0x985   : > { %v4060_v52 = vsel %vm1748_vm4, %v8527_v25, 0.0  ;;  %v4067_v55 = vsel %vm1748_vm4, %v8530_v29, 0.0  ;;  %v4081_v56 = vsel %vm1748_vm4, %v8535_v32, 0.0 }
 0x986   : > { %v3579_v0 = vrot.slane %v3572_v60, %v8280_v27  ;;  %v3587_v1 = vrot.slane %v5722_v61, %v8280_v27  ;;  %v3595_v3 = vrot.slane %v3588_v63, %v8280_v27  ;;  %v3603_v5 = vrot.slane %v5723_v19, %v8280_v27  ;;  %v6212_v17 = vpop.eup %6211 }
 0x987   : > { %v3251_v18 = vmul.f32 %v6212_v17, %v8508_v62  ;;  %v4061_v60 = vrot.slane %v4060_v52, 4  ;;  %v4068_v61 = vrot.slane %v4067_v55, 4 }
 0x988   : > { %v3604_v8 = vcombine.low %v3579_v0, %v3587_v1  ;;  %v3620_v9 = vcombine.low %v3595_v3, %v3603_v5  ;;  %v3605_v10 = vcombine.high %v3579_v0, %v3587_v1  ;;  %v3621_v23 = vcombine.high %v3595_v3, %v3603_v5 }
 0x989   : > { %v3258_v22 = vmul.f32 %v5714_v20, %v3251_v18  ;;  %v4082_v0 = vrot.slane %v4081_v56, 4  ;;  %v4075_v1 = vrot.slane %v4074_v59, 4  ;;  %v4062_v6 = vadd.f32 %v4061_v60, %v4060_v52 }
 0x98a   : > { %v3612_v53 = vrot.slane %v3604_v8, %v8285_v33  ;;  %v3628_v58 = vrot.slane %v3620_v9, %v8285_v33  ;;  %v3619_v11 = vrot.slane %v3605_v10, %v8285_v33  ;;  %v3635_v12 = vrot.slane %v3621_v23, %v8285_v33 }
 0x98b   : > { %v8584_v62 = vadd.f32 %v5715_v26, %v3258_v22  ;;  %v4083_v29 = vadd.f32 %v4082_v0, %v4081_v56  ;;  %v4076_v10 = vadd.f32 %v4075_v1, %v4074_v59 }
 0x98c   : > { %v3636_v13 = vcombine.low %v3612_v53, %v3628_v58  ;;  %v3637_v57 = vcombine.high %v3612_v53, %v3628_v58  ;;  %v3638_v15 = vcombine.low %v3619_v11, %v3635_v12  ;;  %v3639_v54 = vcombine.high %v3619_v11, %v3635_v12 }
 0x98d   : > { %v4092_v30 = vpack.c.bf16 %v8584_v62, %v8584_v62  ;;  %v4063_v58 = vrot.slane %v4062_v6, 2 }
 0x98e   : > { %5920 = vmatpush3.msra.mxu1 %v3636_v13  ;;  %5925 = vmatpush3.msra.mxu0 %v3637_v57 }
 0x98f   : > { %5929 = vmatprep.subr.mxu1 %v7109_v2  ;;  %5934 = vmatprep.subr.mxu0 %v7109_v2  ;;  %v4064_v22 = vadd.f32 %v4063_v58, %v4062_v6 }
 0x990   : > { %5922 = vmatmul.mubr.msk.f32.vlgmr.msra.gmra.mrb[10].mxu1 %vm1748_vm4, %v3656_v7  ;;  %5927 = vmatmul.mubr.msk.f32.vlgmr.msra.gmra.mrb[10].mxu0 %vm1748_vm4, %v3761_v14  ;;  %v4069_v7 = vadd.f32 %v4068_v61, %v4067_v55 }
 0x991   : > { %5930 = vmatpush3.msra.mxu1 %v3638_v15  ;;  %5935 = vmatpush3.msra.mxu0 %v3639_v54  ;;  %v4084_v15 = vrot.slane %v4083_v29, 2  ;;  %v4077_v54 = vrot.slane %v4076_v10, 2 }
 0x992   : > { %5931 = vmatprep.mubr.msk.f32.mxu1 %vm7110_vm1, %v7109_v2  ;;  %5939 = vmatprep.subr.bf16.mxu1 %v7109_v2  ;;  %v4070_v11 = vrot.slane %v4069_v7, 2 }
 0x993   : > { %5936 = vmatprep.mubr.msk.f32.mxu0 %vm7110_vm1, %v7109_v2  ;;  %5947 = vmatprep.subr.mxu0 %v7109_v2 }
 0x994   : > { %5937 = vmatmul.mubr.msk.f32.vlgmr.msra.gmra.mrb[12].mxu0 %vm1748_vm4, %v3971_v16 }
 0x995   : > { %5949 = vmatprep.mubr.msk.f32.mxu0 %vm7110_vm1, %v7109_v2 }
 0x99e   : > { %v3866_v24 = vpop.trf.xlu0 }
 0x99f   : > { %5932 = vmatmul.mubr.msk.f32.vlgmr.msra.gmra.mrb[20].mxu1 %vm1748_vm4, %v3866_v24 }
 0x9a0   : > { %5940 = vmatpush3.bf16.msra.mxu1 %v6189_v21  ;;  %5943 = vmatprep.mubr.msk.bf16.mxu1 %vm7110_vm1, %v7109_v2  ;;  %v4071_v21 = vadd.f32 %v4070_v11, %v4069_v7 }
 0x9a1   : > { %5941 = vmatprep.subr.bf16.mxu1 %v7109_v2 }
 0x9a4   : > { %5942 = vmatpush3.bf16.msra.mxu1 %v6190_v28 }
 0x9a5   : > { %5962 = vmatprep.subr.mxu1 %v7109_v2 }
 0x9a7   : > { %5944 = vmatmul.mubr.msk.bf16.vlgmr.msra.gmra.mrb[24].mxu1 %vm1552_vm2, %v4092_v30 }
 0x9a8   : > { %5964 = vmatprep.mubr.msk.f32.mxu1 %vm7110_vm1, %v7109_v2 }
 0xa63   : > { %v3741_v31 = vpop.f32.mrb[10].mxu1  ;;  %v8599_v48 = vpop.f32.mrb[10].mxu0 }
 0xa64   : > { %v5923_v35 = vpop.f32.mrb[11].mxu1  ;;  %5948 = vmatpush3.msra.mxu0 %v3741_v31  ;;  %v5928_v49 = vpop.f32.mrb[11].mxu0  ;;  %v4085_v31 = vadd.f32 %v4084_v15, %v4083_v29 }
 0xa65   : > { %5952 = vmatprep.subr.mxu0 %v7109_v2  ;;  %v4078_v35 = vadd.f32 %v4077_v54, %v4076_v10 }
 0xa67   : > { %v4056_v50 = vpop.f32.mrb[12].mxu0 }
 0xa68   : > { %5963 = vmatpush3.msra.mxu1 %v4056_v50  ;;  %v5938_v51 = vpop.f32.mrb[13].mxu0 }
 0xa69   : > { %5975 = vmatprep.subr.bf16.mxu1 %v7109_v2 }
 0xa72   : > { %v8593_v36 = vpop.f32.mrb[20].mxu1 }
 0xa73   : > { %v5933_v37 = vpop.f32.mrb[21].mxu1 }
 0xa7a   : > { %v4149_v39 = vpop.f32.mrb[24].mxu1 }
 0xa7b   : > { %v4150_v40 = vadd.f32 %v5728_v38, %v4149_v39  ;;  %v5945_v41 = vpop.f32.mrb[25].mxu1 }
 0xa7c   : > { %v4152_v42 = vpop.f32.mrb[26].mxu1  ;;  %v4072_v41 = vrot.slane %v4071_v21, 1 }
 0xa7d   : > { %v4157_v43 = vmin.f32 %v4150_v40, 0.0  ;;  %v5946_v44 = vpop.f32.mrb[27].mxu1  ;;  %v4156_v4 = vadd.f32 1.0, %v4150_v40  ;;  %vm4155_vm9 = vcmp.gt.f32.partialorder %v4150_v40, 0.0  ;;  %v4065_v42 = vrot.slane %v4064_v22, 1 }
 0xa7e   : > { %v4073_v55 = vadd.f32 %v4072_v41, %v4071_v21 }
 0xa7f   : > { %v4158_v45 = vmul.f32 1.442695, %v4157_v43  ;;  %v4066_v56 = vadd.f32 %v4065_v42, %v4064_v22 }
 0xa81   : > { %6213 = vpow2.f32 %v4158_v45 }
 0xa8b   : > { %v6214_v46 = vpop.eup %6213 }
 0xa8c   : > { %v4160_v47 = vsel %vm4155_vm9, %v4156_v4, %v6214_v46  ;;  %v4086_v46 = vrot.slane %v4085_v31, 1 }
 0xa8d   : > { %4165 = vrot.lane.b32.xlu0 %v4160_v47, %s7114_s21  ;;  %4162 = vrot.lane.b32.xlu1 %v4160_v47, %s7112_s14  ;;  %s8974_s21 = scalar_lea.vmem [#allocation25], %s8155_s15 }
 0xa91   : > { %4168 = vrot.lane.b32.xlu1 %v4160_v47, %s7111_s2  ;;  %s8972_s2 = scalar_lea.vmem [#allocation24], %s8158_s22 }
 0xa92   : > { %s8973_s14 = smov %s8972_s2 }
 0xaff   : > { %v4166_v63 = vpop.permute.xlu0 %4165  ;;  %v4163_v19 = vpop.permute.xlu1 %4162 }
 0xb00   : > { %v4171_v3 = vcombine.low %v4160_v47, %v4166_v63  ;;  %v4172_v5 = vcombine.high %v4160_v47, %v4166_v63  ;;  %v4079_v47 = vrot.slane %v4078_v35, 1 }
 0xb02   : > { %v4179_v32 = vrot.slane %v4171_v3, %v8280_v27  ;;  %v4186_v23 = vrot.slane %v4172_v5, %v8280_v27  ;;  %v4080_v3 = vadd.f32 %v4079_v47, %v4078_v35 }
 0xb03   : > { %v4169_v25 = vpop.permute.xlu1 %4168 }
 0xb04   : > { %v4187_v8 = vcombine.low %v4163_v19, %v4169_v25  ;;  %v4188_v9 = vcombine.high %v4163_v19, %v4169_v25  ;;  %v4087_v19 = vadd.f32 %v4086_v46, %v4085_v31 }
 0xb06   : > { %v4195_v34 = vrot.slane %v4187_v8, %v8280_v27  ;;  %v4202_v53 = vrot.slane %v4188_v9, %v8280_v27 }
 0xb08   : > { %v4203_v12 = vcombine.low %v4179_v32, %v4195_v34  ;;  %v4204_v13 = vcombine.high %v4179_v32, %v4195_v34  ;;  %v4219_v57 = vcombine.low %v4186_v23, %v4202_v53  ;;  %v4220_v14 = vcombine.high %v4186_v23, %v4202_v53 }
 0xb0a   : > { %v4211_v16 = vrot.slane %v4203_v12, %v8285_v33  ;;  %v4218_v17 = vrot.slane %v4204_v13, %v8285_v33  ;;  %v4227_v18 = vrot.slane %v4219_v57, %v8285_v33  ;;  %v4234_v20 = vrot.slane %v4220_v14, %v8285_v33 }
 0xb0c   : > { %v4239_v24 = vcombine.low %v4211_v16, %v4218_v17  ;;  %v5732_v26 = vcombine.high %v4211_v16, %v4218_v17  ;;  %v4255_v28 = vcombine.low %v4227_v18, %v4234_v20  ;;  %v5733_v30 = vcombine.high %v4227_v18, %v4234_v20 }
 0xb0e   : > { %v4246_v37 = vrot.slane %v4239_v24, %v8280_v27  ;;  %v4254_v38 = vrot.slane %v5732_v26, %v8280_v27  ;;  %v4262_v39 = vrot.slane %v4255_v28, %v8280_v27  ;;  %v4270_v40 = vrot.slane %v5733_v30, %v8280_v27 }
 0xb10   : > { %v4271_v43 = vcombine.low %v4246_v37, %v4254_v38  ;;  %v4272_v44 = vcombine.high %v4246_v37, %v4254_v38  ;;  %v4287_v45 = vcombine.low %v4262_v39, %v4270_v40  ;;  %v4288_v4 = vcombine.high %v4262_v39, %v4270_v40 }
 0xb12   : > { %v4279_v49 = vrot.slane %v4271_v43, %v8285_v33  ;;  %v4295_v50 = vrot.slane %v4287_v45, %v8285_v33  ;;  %v4286_v51 = vrot.slane %v4272_v44, %v8285_v33  ;;  %v4302_v52 = vrot.slane %v4288_v4, %v8285_v33  ;;  %v6191_v45 = vld [vmem:[%s8972_s2] sm:$0xff]  }
 0xb14   : > { %v4303_v59 = vcombine.low %v4279_v49, %v4295_v50  ;;  %v4306_v60 = vcombine.high %v4286_v51, %v4302_v52  ;;  %v4304_v61 = vcombine.high %v4279_v49, %v4295_v50  ;;  %v4305_v63 = vcombine.low %v4286_v51, %v4302_v52 }
 0xb16   : > { %5950 = vmatmul.mubr.msk.f32.vlgmr.msra.gmra.mrb[14].mxu0 %vm1748_vm4, %v4303_v59  ;;  %5965 = vmatmul.mubr.msk.f32.vlgmr.msra.gmra.mrb[22].mxu1 %vm1748_vm4, %v4306_v60  ;;  %v4600_v0 = vmul.f32 %v4304_v61, %v4073_v55  ;;  %v4599_v1 = vmul.f32 %v4303_v59, %v4066_v56  ;;  %v4602_v7 = vmul.f32 %v4306_v60, %v4087_v19  ;;  %v6192_v56 = vld [vmem:[%s8973_s14 + $0x8] sm:$0xff]  }
 0xb17   : > { %5953 = vmatpush3.msra.mxu0 %v8599_v48  ;;  %5954 = vmatprep.mubr.msk.f32.mxu0 %vm7110_vm1, %v7109_v2  ;;  %v4601_v25 = vmul.f32 %v4305_v63, %v4080_v3 }
 0xb18   : > { %v4606_v5 = vsel %vm1748_vm4, %v4600_v0, 0.0  ;;  %v4603_v6 = vsel %vm1748_vm4, %v4599_v1, 0.0  ;;  %5957 = vmatprep.subr.mxu0 %v7109_v2  ;;  %5979 = vmatprep.mubr.msk.bf16.mxu1 %vm7110_vm1, %v7109_v2  ;;  %v4612_v48 = vsel %vm1748_vm4, %v4602_v7, 0.0 }
 0xb19   : > { %4607 = vadd.xlane.f32.xlu0 %v4606_v5  ;;  %4604 = vadd.xlane.f32.xlu1 %v4603_v6  ;;  %v4609_v8 = vsel %vm1748_vm4, %v4601_v25, 0.0 }
 0xb1a   : > { %5955 = vmatmul.mubr.msk.f32.vlgmr.msra.gmra.mrb[16].mxu0 %vm1748_vm4, %v4304_v61 }
 0xb1b   : > { %5958 = vmatpush3.msra.mxu0 %v8593_v36  ;;  %5959 = vmatprep.mubr.msk.f32.mxu0 %vm7110_vm1, %v7109_v2 }
 0xb1c   : > { %5967 = vmatprep.subr.bf16.mxu0 %v7109_v2 }
 0xb1d   : > { %4613 = vadd.xlane.f32.xlu0 %v4612_v48  ;;  %4610 = vadd.xlane.f32.xlu1 %v4609_v8 }
 0xb1e   : > { %5960 = vmatmul.mubr.msk.f32.vlgmr.msra.gmra.mrb[18].mxu0 %vm1748_vm4, %v4305_v63 }
 0xb1f   : > { %5971 = vmatprep.mubr.msk.bf16.mxu0 %vm7110_vm1, %v7109_v2  ;;  %5968 = vmatpush3.bf16.msra.mxu0 %v6191_v45 }
 0xb20   : > { %5969 = vmatprep.subr.bf16.mxu0 %v7109_v2 }
 0xb23   : > { %5970 = vmatpush3.bf16.msra.mxu0 %v6192_v56 }
 0xb24   : > { %5983 = vmatprep.subr.bf16.mxu0 %v7109_v2 }
 0xba6   : > { %v4608_v9 = vpop.xlane.xlu0 %4607  ;;  %v4605_v29 = vpop.xlane.xlu1 %4604 }
 0xba7   : > { %v4616_v36 = vadd.f32 1e-06, %v4608_v9  ;;  %v4615_v34 = vadd.f32 1e-06, %v4605_v29 }
 0xba9   : > { %6215 = vrcp.f32 %v4616_v36 }
 0xbaa   : > { %v4614_v10 = vpop.xlane.xlu0 %4613  ;;  %v4611_v23 = vpop.xlane.xlu1 %4610 }
 0xbab   : > { %v4618_v32 = vadd.f32 1e-06, %v4614_v10  ;;  %v4617_v53 = vadd.f32 1e-06, %v4611_v23 }
 0xbad   : > { %6217 = vrcp.f32 %v4618_v32 }
 0xbae   : > { %6219 = vrcp.f32 %v4615_v34 }
 0xbaf   : > { %6221 = vrcp.f32 %v4617_v53  ;;  %v5740_v53 = vld [vmem:[%s8974_s21] ss:$0 sm:$0xff] }
 0xbb3   : > { %v6216_v57 = vpop.eup %6215 }
 0xbb7   : > { %v6218_v14 = vpop.eup %6217 }
 0xbb8   : > { %v6220_v18 = vpop.eup %6219 }
 0xbb9   : > { %v6222_v22 = vpop.eup %6221 }
 0xbe9   : > { %v4376_v58 = vpop.f32.mrb[14].mxu0  ;;  %v4595_v11 = vpop.f32.mrb[22].mxu1 }
 0xbea   : > { %v5951_v12 = vpop.f32.mrb[15].mxu0  ;;  %v5966_v13 = vpop.f32.mrb[23].mxu1  ;;  %v4626_v54 = vmul.f32 %v6218_v14, %v4595_v11  ;;  %v4620_v26 = vmul.f32 %v6220_v18, %v4376_v58 }
 0xbed   : > { %v4449_v15 = vpop.f32.mrb[16].mxu0 }
 0xbee   : > { %v4622_v16 = vmul.f32 %v6216_v57, %v4449_v15  ;;  %v5956_v17 = vpop.f32.mrb[17].mxu0 }
 0xbf0   : > { %v4643_v20 = vcombine.low %v4622_v16, %v4626_v54  ;;  %v4644_v21 = vcombine.high %v4622_v16, %v4626_v54 }
 0xbf1   : > { %v4522_v24 = vpop.f32.mrb[18].mxu0 }
 0xbf2   : > { %v4624_v28 = vmul.f32 %v6222_v22, %v4522_v24  ;;  %v5961_v30 = vpop.f32.mrb[19].mxu0  ;;  %v4651_v37 = vrot.slane %v4643_v20, %v8280_v27  ;;  %v4658_v38 = vrot.slane %v4644_v21, %v8280_v27 }
 0xbf3   : > { %v5744_v30 = vld [vmem:[%s1330_s23] ss:$0 sm:$0xff]  ;;  %s8980_s23 = sld [smem:[#allocation66_spill]] }
 0xbf4   : > { %v4627_v31 = vcombine.low %v4620_v26, %v4624_v28  ;;  %v4628_v35 = vcombine.high %v4620_v26, %v4624_v28 }
 0xbf6   : > { %v4635_v39 = vrot.slane %v4627_v31, %v8280_v27  ;;  %v4642_v40 = vrot.slane %v4628_v35, %v8280_v27  ;;  %v5745_v35 = vld [vmem:[%s1338_s20] ss:$0 sm:$0xff]  ;;  %s8978_s20 = scalar_lea.vmem [#allocation31], %s8155_s15 }
 0xbf8   : > { %v4659_v41 = vcombine.low %v4635_v39, %v4651_v37  ;;  %v4660_v42 = vcombine.high %v4635_v39, %v4651_v37  ;;  %v4675_v43 = vcombine.low %v4642_v40, %v4658_v38  ;;  %v4676_v44 = vcombine.high %v4642_v40, %v4658_v38  ;;  %v6195_v40 = vld [vmem:[%s8207_s28] sm:$0xff]  }
 0xbf9   : > { %p5758_p5 = scmp.ne.s32.totalorder %s8980_s23, 1 }
 0xbfa   : > { %v4667_v4 = vrot.slane %v4659_v41, %v8285_v33  ;;  %v4674_v46 = vrot.slane %v4660_v42, %v8285_v33  ;;  %v4683_v47 = vrot.slane %v4675_v43, %v8285_v33  ;;  %v4690_v49 = vrot.slane %v4676_v44, %v8285_v33  ;;  %v6196_v41 = vld [vmem:[%s8207_s28 + $0x8] sm:$0xff]   ;;  %v6197_v42 = vld [vmem:[%s8207_s28 + $0x10] sm:$0xff]   ;;  %v6198_v43 = vld [vmem:[%s8207_s28 + $0x18] sm:$0xff]   ;;  %s8979_s28 = scalar_lea.vmem [#allocation40], %s8155_s15 }
 0xbfc   : > { %v4695_v50 = vcombine.low %v4667_v4, %v4674_v46  ;;  %v5738_v51 = vcombine.high %v4667_v4, %v4674_v46  ;;  %v4711_v52 = vcombine.low %v4683_v47, %v4690_v49  ;;  %v5739_v55 = vcombine.high %v4683_v47, %v4690_v49 }
 0xbfe   : > { %v4702_v59 = vrot.slane %v4695_v50, %v8280_v27  ;;  %v4710_v60 = vrot.slane %v5738_v51, %v8280_v27  ;;  %v4718_v61 = vrot.slane %v4711_v52, %v8280_v27  ;;  %v4726_v63 = vrot.slane %v5739_v55, %v8280_v27 }
 0xc00   : > { %v4728_v19 = vcombine.high %v4702_v59, %v4710_v60  ;;  %v4744_v0 = vcombine.high %v4718_v61, %v4726_v63  ;;  %v4727_v1 = vcombine.low %v4702_v59, %v4710_v60  ;;  %v4743_v3 = vcombine.low %v4718_v61, %v4726_v63 }
 0xc02   : > { %v4742_v5 = vrot.slane %v4728_v19, %v8285_v33  ;;  %v4758_v6 = vrot.slane %v4744_v0, %v8285_v33  ;;  %v4735_v7 = vrot.slane %v4727_v1, %v8285_v33  ;;  %v4751_v25 = vrot.slane %v4743_v3, %v8285_v33 }
 0xc04   : > { %v4761_v48 = vcombine.low %v4742_v5, %v4758_v6  ;;  %v4760_v8 = vcombine.high %v4735_v7, %v4751_v25  ;;  %v4762_v9 = vcombine.high %v4742_v5, %v4758_v6  ;;  %v4759_v27 = vcombine.low %v4735_v7, %v4751_v25 }
 0xc06   : > { %4768 = vrot.lane.b32.xlu0 %v4761_v48, %s7118_s5  ;;  %4764 = vrot.lane.b32.xlu1 %v4760_v8, %s7119_s27  ;;  %s8975_s5 = scalar_lea.vmem [#allocation27], %s8158_s22  ;;  %s8977_s22 = scalar_lea.vmem [#allocation28], %s8155_s15 }
 0xc07   : > { %v6193_v21 = vld [vmem:[%s8975_s5] sm:$0xff]   ;;  %s8976_s27 = smov %s8975_s5 }
 0xc08   : > { %5976 = vmatpush3.bf16.msra.mxu1 %v6193_v21  ;;  %v6194_v22 = vld [vmem:[%s8976_s27 + $0x8] sm:$0xff]   ;;  %v5746_v44 = vld [vmem:[%s8977_s22] ss:$0 sm:$0xff] }
 0xc09   : > { %5977 = vmatprep.subr.bf16.mxu1 %v7109_v2 }
 0xc0a   : > { %4772 = vrot.lane.b32.xlu1 %v4762_v9, %s7120_s0 }
 0xc0c   : > { %5978 = vmatpush3.bf16.msra.mxu1 %v6194_v22 }
 0xc78   : > { %v4765_v29 = vpop.permute.xlu1 %4764  ;;  %v4769_v10 = vpop.permute.xlu0 %4768 }
 0xc79   : > { %v4775_v36 = vsel %vm1748_vm4, %v4759_v27, %v4765_v29 }
 0xc7a   : > { %v4776_v23 = vsel %vm3164_vm6, %v4775_v36, %v4769_v10  ;;  %v5756_v10 = vld [vmem:[%s1346_s3] ss:$0 sm:$0xff] }
 0xc7c   : > { %v4773_v32 = vpop.permute.xlu1 %4772 }
 0xc7d   : > { %v4777_v33 = vsel %vm3166_vm7, %v4776_v23, %v4773_v32  ;;  %v5757_v32 = vld [vmem:[%s8979_s28] ss:$0 sm:$0xff] }
 0xc7e   : > { %v4782_v34 = vpack.c.bf16 %v4777_v33, %v4777_v33 }
 0xc80   : > { %5972 = vmatmul.mubr.msk.bf16.vlgmr.msra.gmra.mrb[20].mxu0 %vm1552_vm2, %v4782_v34 }
 0xc81   : > { %5991 = vmatprep.mubr.msk.bf16.mxu0 %vm7110_vm1, %v7109_v2  ;;  %5984 = vmatpush3.bf16.msra.mxu0 %v6195_v40 }
 0xc82   : > { %5985 = vmatprep.subr.bf16.mxu0 %v7109_v2 }
 0xc85   : > { %5986 = vmatpush3.bf16.msra.mxu0 %v6196_v41 }
 0xc86   : > { %5987 = vmatprep.subr.bf16.mxu0 %v7109_v2 }
 0xc89   : > { %5988 = vmatpush3.bf16.msra.mxu0 %v6197_v42 }
 0xc8a   : > { %5989 = vmatprep.subr.bf16.mxu0 %v7109_v2  ;;  %v5750_v2 = vld [vmem:[%s8978_s20] ss:$0 sm:$0xff] }
 0xc8d   : > { %5990 = vmatpush3.bf16.msra.mxu0 %v6198_v43 }
 0xd53   : > { %v4839_v58 = vpop.f32.mrb[20].mxu0 }
 0xd54   : > { %v4840_v11 = vadd.f32 %v5740_v53, %v4839_v58  ;;  %v5973_v12 = vpop.f32.mrb[21].mxu0 }
 0xd55   : > { %v4842_v13 = vpop.f32.mrb[22].mxu0 }
 0xd56   : > { %v5974_v57 = vpop.f32.mrb[23].mxu0  ;;  %v4845_v14 = vadd.f32 %v4840_v11, %v8584_v62 }
 0xd58   : > { %v4848_v15 = vsel %vm1552_vm2, %v4845_v14, 0.0 }
 0xd59   : > { %4849 = vadd.xlane.f32.xlu1 %v4848_v15 }
 0xde6   : > { %v4850_v54 = vpop.xlane.xlu1 %4849 }
 0xde7   : > { %v4851_v16 = vmul.f32 0.03125, %v4850_v54 }
 0xde9   : > { %v4852_v17 = vsub.f32 %v4845_v14, %v4851_v16  ;;  %v5759_v16 = vld [vmem:[#allocation42] ss:$0 sm:$0xff] (!%p5758_p5) }
 0xdeb   : > { %v4853_v18 = vmul.f32 %v4852_v17, %v4852_v17 }
 0xded   : > { %v4854_v20 = vsel %vm1552_vm2, %v4853_v18, 0.0  ;;  %v5760_v18 = vld [vmem:[#allocation43] ss:$0 sm:$0xff] (!%p5758_p5) }
 0xdee   : > { %4855 = vadd.xlane.f32.xlu0 %v4854_v20 }
 0xe7b   : > { %v4856_v62 = vpop.xlane.xlu0 %4855 }
 0xe7c   : > { %v4857_v24 = vmul.f32 0.03125, %v4856_v62 }
 0xe7e   : > { %v4858_v26 = vadd.f32 1e-05, %v4857_v24 }
 0xe80   : > { %6223 = vrsqrt.f32 %v4858_v26 }
 0xe8a   : > { %v6224_v28 = vpop.eup %6223 }
 0xe8b   : > { %v4860_v31 = vmul.f32 %v6224_v28, %v4852_v17 }
 0xe8d   : > { %v4867_v37 = vmul.f32 %v5744_v30, %v4860_v31 }
 0xe8f   : > { %v4874_v38 = vadd.f32 %v5745_v35, %v4867_v37 }
 0xe91   : > { %v4879_v39 = vpack.c.bf16 %v4874_v38, %v4874_v38 }
 0xe93   : > { %5980 = vmatmul.mubr.msk.bf16.vlgmr.msra.gmra.mrb[28].mxu1 %vm1552_vm2, %v4879_v39 }
 0xf66   : > { %v4936_v45 = vpop.f32.mrb[28].mxu1 }
 0xf67   : > { %v4937_v4 = vadd.f32 %v5746_v44, %v4936_v45  ;;  %v5981_v46 = vpop.f32.mrb[29].mxu1 }
 0xf68   : > { %v4939_v47 = vpop.f32.mrb[30].mxu1 }
 0xf69   : > { %v4943_v49 = vmul.f32 0.70710677, %v4937_v4  ;;  %v5982_v50 = vpop.f32.mrb[31].mxu1  ;;  %v4942_v52 = vmul.f32 0.5, %v4937_v4 }
 0xf6b   : > { %6225 = verf.f32 %v4943_v49 }
 0xf75   : > { %v6226_v51 = vpop.eup %6225 }
 0xf76   : > { %v4945_v55 = vadd.f32 1.0, %v6226_v51 }
 0xf78   : > { %v4946_v56 = vmul.f32 %v4945_v55, %v4942_v52 }
 0xf7a   : > { %v4955_v59 = vpack.c.bf16 %v4946_v56, %v4946_v56 }
 0xf7c   : > { %5992 = vmatmul.mubr.msk.bf16.vlgmr.msra.gmra.mrb[24].mxu0 %vm4987_vm10, %v4955_v59 }
0x104f   : > { %v5025_v60 = vpop.f32.mrb[24].mxu0 }
0x1050   : > { %v5026_v61 = vadd.f32 %v5750_v2, %v5025_v60  ;;  %v5993_v63 = vpop.f32.mrb[25].mxu0 }
0x1051   : > { %v5028_v19 = vpop.f32.mrb[26].mxu0 }
0x1052   : > { %v5994_v0 = vpop.f32.mrb[27].mxu0  ;;  %v5031_v1 = vadd.f32 %v5026_v61, %v4874_v38 }
0x1054   : > { %v5034_v3 = vsel %vm1552_vm2, %v5031_v1, 0.0 }
0x1055   : > { %5035 = vadd.xlane.f32.xlu0 %v5034_v3 }
0x10e2   : > { %v5036_v5 = vpop.xlane.xlu0 %5035 }
0x10e3   : > { %v5037_v6 = vmul.f32 0.03125, %v5036_v5 }
0x10e5   : > { %v5038_v7 = vsub.f32 %v5031_v1, %v5037_v6 }
0x10e7   : > { %v5039_v25 = vmul.f32 %v5038_v7, %v5038_v7 }
0x10e9   : > { %v5040_v48 = vsel %vm1552_vm2, %v5039_v25, 0.0 }
0x10ea   : > { %5041 = vadd.xlane.f32.xlu1 %v5040_v48 }
0x1177   : > { %v5042_v8 = vpop.xlane.xlu1 %5041 }
0x1178   : > { %v5043_v9 = vmul.f32 0.03125, %v5042_v8 }
0x117a   : > { %v5044_v27 = vadd.f32 1e-05, %v5043_v9 }
0x117c   : > { %6227 = vrsqrt.f32 %v5044_v27 }
0x1186   : > { %v6228_v29 = vpop.eup %6227 }
0x1187   : > { %v5046_v36 = vmul.f32 %v6228_v29, %v5038_v7  ;;  %5065 = sbr.rel (%p5758_p5) target bundleno = 4807 (0x12c7), region = 220 }
0x1189   : > { %v5053_v23 = vmul.f32 %v5756_v10, %v5046_v36 }
0x118b   : > { %v5060_v33 = vadd.f32 %v5757_v32, %v5053_v23 }
0x118d   : > { %5061 = vst.msk [vmem:[#allocation2] sm:$0xff] %vm1552_vm2, %v5060_v33  ;;  %v5068_v34 = vsel (!%p5758_p5), %vm1552_vm2, %v5060_v33, 0.0 }
0x118e   : > { %5069 = vadd.xlane.f32.xlu0 %v5068_v34 }
0x121b   : > { %v5070_v53 = vpop.xlane.xlu0 %5069 }
0x121c   : > { %v5071_v58 = vmul.f32 0.03125, %v5070_v53 }
0x121e   : > { %v5072_v11 = vsub.f32 %v5060_v33, %v5071_v58 }
0x1220   : > { %v5073_v12 = vmul.f32 %v5072_v11, %v5072_v11 }
0x1222   : > { %v5074_v13 = vsel %vm1552_vm2, %v5073_v12, 0.0 }
0x1223   : > { %5075 = vadd.xlane.f32.xlu0 %v5074_v13 }
0x12b0   : > { %v5076_v57 = vpop.xlane.xlu0 %5075 }
0x12b1   : > { %v5077_v14 = vmul.f32 0.03125, %v5076_v57 }
0x12b3   : > { %v5078_v15 = vadd.f32 1e-05, %v5077_v14 }
0x12b5   : > { %6229 = vrsqrt.f32 %v5078_v15 }
0x12bf   : > { %v6230_v54 = vpop.eup %6229 }
0x12c0   : > { %v5080_v17 = vmul.f32 %v6230_v54, %v5072_v11 }
0x12c2   : > { %v5087_v20 = vmul.f32 %v5759_v16, %v5080_v17 }
0x12c4   : > { %v5094_v21 = vadd.f32 %v5760_v18, %v5087_v20 }
0x12c6   : > { %5095 = vst.msk [vmem:[%s8246_s24] sm:$0xff] %vm1552_vm2, %v5094_v21 }
0x12c7 PF: > { %s8981_s15 = sld [smem:[#allocation67_spill]]  ;;  %s8982_s3 = sld [smem:[#allocation75_spill]] }
0x12c8   : > { %s8983_s29 = sld [smem:[#allocation98_spill]]  ;;  %s5110_s14 = sshll.u32 %s8246_s24, 4  ;;  %s5111_s14 = int_to_ptr.vmem [resolvable:$true] %s5110_s14 }
0x12c9   : > { %s5097_s21 = scalar_lea.sflag [#allocation9], %s8131_s26  ;;  %s6903_s5 = scalar_lea.vmem %s5111_s14, 128 }
0x12ca   : > { %p6904_p10 = scmp.ne.s32.totalorder %s5111_s14, %s6903_s5  ;;  %s7121_s27 = smov [#allocation45]  }
0x12cb   : > { %s6907_s22 = sshll.u32 %s7121_s27, 4  ;;  %s6908_s22 = int_to_ptr.vmem [resolvable:$false] %s6907_s22 }
0x12cc   : > { %s6909_s20 = scalar_lea.vmem %s6908_s22, 256  ;;  %p6910_p12 = scmp.lt.s32.totalorder %s5111_s14, %s6908_s22 }
0x12cd   : > { %s5762_s0 = sshll.u32 %s8981_s15, 7  ;;  %p8985_p7 = scmp.ne.s32.totalorder %s8982_s3, 0 }
0x12ce   : > { %s8984_s4 = smov %s8983_s29  ;;  %s8720_s2 = scalar_lea.hbm %s8983_s29, %s5762_s0 }
0x12cf   : > { %p6905_p6 = pnand %p6904_p10, %p8985_p7  ;;  %p6911_p3 = scmp.lt.s32.totalorder %s6909_s20, %s6903_s5 }
0x12d1   : > { %p6906_p9 = pneg %p6905_p6  ;;  %p6912_p13 = por %p6911_p3, %p6910_p12 }
0x12d3   : > { %p6913_p8 = pnand %p6912_p13, %p6906_p9 }
0x12d5   : > { %6916 = shalt.err (!%p6913_p8)
}
0x12d6   : > { %s6917_s26 = scalar_lea.hbm %s8720_s2, 128  ;;  %s6921_s23 = scalar_lea.hbm %s8984_s4, 256 }
0x12d7   : > { %p6918_p0 = scmp.ne.s32.totalorder %s8720_s2, %s6917_s26  ;;  %p6922_p11 = scmp.lt.u32.totalorder %s8720_s2, %s8984_s4 }
0x12d8   : > { %p6923_p2 = scmp.lt.u32.totalorder %s6921_s23, %s6917_s26  ;;  %p6925_p10 = scmp.lt.u32.totalorder %s6917_s26, %s8720_s2 }
0x12d9   : > { %p6919_p1 = pnand %p6918_p0, %p8985_p7 }
0x12da   : > { %p6924_p5 = por %p6923_p2, %p6922_p11 }
0x12db   : > { %p6920_p4 = pneg %p6919_p1 }
0x12dc   : > { %p6926_p6 = por %p6925_p10, %p6924_p5 }
0x12de   : > { %p6927_p9 = pnand %p6926_p6, %p6920_p4 }
0x12e0   : > { %6930 = shalt.err (!%p6927_p9)
}
0x12e1   : > { %6055 = dma.vmem_to_hbm [thread:$0]  (%p8985_p7), %s5111_s14, 128, %s8720_s2, %s5097_s21  }
0x12e2 PF: > { %s8986_s12 = sld [smem:[#allocation68_spill]]  ;;  %s8987_s8 = sld [smem:[#allocation64_spill]] }
0x12e3   : > { %s8988_s29 = sld [smem:[#allocation76_spill]] }
0x12e8   : > { %p6072_p12 = scmp.ge.s32.totalorder %s8986_s12, 2  ;;  %s5122_s5 = sand.u32 1, %s8987_s8  }
0x12e9   : > { %p8989_p3 = scmp.ne.s32.totalorder %s8988_s29, 0  ;;  %s5123_s27 = scalar_lea.sflag [#allocation9], %s5122_s5 }
0x12eb   : > { %p6065_p13 = pnand %p6072_p12, %p8989_p3 }
0x12ed   : > { %7036 = dma.done.wait (!%p6065_p13), %s5123_s27, 128  }
0x12ee   : > { %7038 = vsyncadd (!%p6065_p13), %s5123_s27, 4294967168  ;;  %s74_s3 = sadd.s32 1, %s8986_s12   ;;  %s8990_s5 = sld [smem:[#allocation62_spill]] }
0x12ef   : > { %p71_p8 = scmp.ge.s32.totalorder %s74_s3, 6   ;;  %s8991_s26 = sld [smem:[#allocation63_spill]] }
0x12f0   : > { %s8992_s27 = sld [smem:[#allocation72_spill]]  ;;  %s8993_s22 = sld [smem:[#allocation65_spill]] }
0x12f1   : > { %s8994_s2 = sld [smem:[#allocation73_spill]]  ;;  %s8995_s14 = sld [smem:[#allocation70_spill]] }
0x12f2   : > { %s8996_s21 = sld [smem:[#allocation71_spill]]  ;;  %s8997_s28 = smov %s7057_s6 }
0x12f3   : > { %s8999_s29 = smov %s7073_s7  ;;  %s9000_s0 = smov %s7077_s30 }
0x12f4   :  { %73 = sbr.rel (!%p71_p8) target bundleno = 55 (0x37), region = 430 }
0x12f6   : > { %s8998_s6 = smov %s8993_s22 }
0x12f7   : > { %s9001_s7 = smov %s8995_s14 }
0x12f8   : > { %s9002_s30 = smov %s8996_s21 }
0x12fb   :  { %5128 = vsyncpa [#allocation8], 1 }
0x12fc   :  { %5130 = vsyncpa [#allocation8 + $0x1], 1 }
0x12fd   :  { %5131 = vsyncpa [#allocation11], 1 }
0x12fe   :  { %5133 = vsyncpa [#allocation11 + $0x1], 1 }
0x12ff   :  { %5134 = vsyncpa [#allocation14], 1 }
0x1300   :  { %5136 = vsyncpa [#allocation14 + $0x1], 1 }
0x1301   :  { %5137 = vsyncpa [#allocation17], 1 }
0x1302   :  { %5139 = vsyncpa [#allocation17 + $0x1], 1 }
0x1303   :  { %5140 = vsyncpa [#allocation20], 1 }
0x1304   :  { %5142 = vsyncpa [#allocation20 + $0x1], 1 }
0x1305   :  { %5143 = vsyncpa [#allocation23], 1 }
0x1306   :  { %5145 = vsyncpa [#allocation23 + $0x1], 1 }
0x1307   :  { %5146 = vsyncpa [#allocation26], 1 }
0x1308   :  { %5148 = vsyncpa [#allocation26 + $0x1], 1 }
0x1309   :  { %5149 = vsyncpa [#allocation29], 1 }
0x130a   :  { %5151 = vsyncpa [#allocation29 + $0x1], 1 }
0x130b   :  { %5152 = vsyncpa [#allocation32], 1 }
0x130c   :  { %5154 = vsyncpa [#allocation32 + $0x1], 1 }
0x130d   :  { %5155 = vsyncpa [#allocation35], 1 }
0x130e   :  { %5157 = vsyncpa [#allocation35 + $0x1], 1 }
0x130f   :  { %5158 = vsyncpa [#allocation38], 1 }
0x1310   :  { %5160 = vsyncpa [#allocation38 + $0x1], 1 }
0x1311   :  { %5161 = vsyncpa [#allocation41], 1 }
0x1312   :  { %5163 = vsyncpa [#allocation41 + $0x1], 1 }
0x1313   :  { %5164 = vsyncpa [#allocation44], 1 }
0x1314   :  { %5165 = vsyncpa [#allocation9], 1 }
0x1315   :  { %5167 = vsyncpa [#allocation9 + $0x1], 1 }

</bundles_post_ra>
